<compile_context>
chip_gen: v5e
topology: v5e:2x2
jax: 0.10.0
libtpu: 0.0.40
codegen_flags: <defaults>
</compile_context>

<pallas_src>
import functools
import math

import jax
import jax.numpy as jnp
from jax.experimental import pallas as pl
from jax.experimental.pallas import tpu as pltpu


def _round_up(v, m):
    return (v + m - 1) // m * m


# ----------------------------------------------------------------------------
# Kernel
# ----------------------------------------------------------------------------
def _conv_bn_lrelu_kernel(x_ref, w_ref, b_ref, g_ref, bt_ref, o_ref, *,
                          k, wp, hout, wout, eps, slope):
    """Fused conv(k x k, stride 1) + bias + batch-norm (batch stats) + LeakyReLU.

    x_ref : (N, rows, Cin)        bf16; each image is the zero-padded plane,
                                  row-major flattened (rows >= Hp*Wp + k - 1)
    w_ref : (k*k*Cin, Cout)       bf16; K index = (dy*k + dx)*Cin + cin
    b_ref : (1, Cout)             f32 conv bias
    g_ref : (1, Cout)             f32 BN gamma
    bt_ref: (1, Cout)             f32 BN beta
    o_ref : (N, Hout*Wout, Cout)  f32 output
    """
    n = x_ref.shape[0]
    cout = o_ref.shape[-1]
    l = hout * wp                       # output length in padded-column coords

    convs = []
    csum = jnp.zeros((1, cout), jnp.float32)
    csqs = jnp.zeros((1, cout), jnp.float32)
    for i in range(n):                  # N is tiny and static -> unrolled
        xi = x_ref[i]                   # (rows, Cin) bf16
        # im2col in VMEM: stack the k*k shifted views along K (lane axis).
        taps = [xi[dy * wp + dx: dy * wp + dx + l, :]
                for dy in range(k) for dx in range(k)]
        patch = jnp.concatenate(taps, axis=-1)              # (L, k*k*Cin) bf16
        acc = jnp.dot(patch, w_ref[...],
                      preferred_element_type=jnp.float32)   # one MXU matmul
        acc = acc + b_ref[...]                               # (L, Cout) f32
        # Drop the junk padded columns inside VMEM (never written to HBM).
        acc = acc.reshape(hout, wp, cout)[:, :wout, :].reshape(hout * wout, cout)
        convs.append(acc)
        csum = csum + jnp.sum(acc, axis=0, keepdims=True)
        csqs = csqs + jnp.sum(acc * acc, axis=0, keepdims=True)

    cnt = float(n * hout * wout)
    mean = csum / cnt
    var = csqs / cnt - mean * mean      # biased variance (BN training-mode norm)
    scale = g_ref[...] * jax.lax.rsqrt(var + eps)            # (1, Cout)
    shift = bt_ref[...] - mean * scale

    for i in range(n):
        y = convs[i] * scale + shift
        o_ref[i] = jnp.maximum(y, slope * y)                 # LeakyReLU(slope)


# ----------------------------------------------------------------------------
# Wrapper (layout glue only: transpose / pad / reshape / weight repack)
# ----------------------------------------------------------------------------
def conv_bn_lrelu(x_nchw, w, b, gamma, beta, *, ksize=3, stride=1, padding=1,
                  eps=1e-5, slope=0.1):
    """Forward of Conv_bn_relu. x: (N, Cin, H, W) f32, w: (Cout, Cin, k, k)."""
    # TODO(synk): stride > 1 not implemented (module default stride=1 is used).
    assert stride == 1, "only stride=1 is implemented"
    n, cin, h, wd = x_nchw.shape
    cout, wcin, kh, kw_ = w.shape
    assert wcin == cin and kh == kw_ == ksize

    hout = h + 2 * padding - ksize + 1
    wout = wd + 2 * padding - ksize + 1
    wp = _round_up(wd + 2 * padding, 8)   # sublane-aligned padded width
    hp = h + 2 * padding + 1              # +1 bottom slack row so tap slices fit

    # NCHW -> NHWC, one zero-pad (edges + width alignment + bottom slack),
    # flatten the plane row-major, cast once to bf16 (half-size DMA, MXU dtype).
    x = jnp.transpose(x_nchw, (0, 2, 3, 1))
    x = jnp.pad(x, ((0, 0),
                    (padding, padding + 1),
                    (padding, wp - wd - padding),
                    (0, 0)))
    x2 = x.reshape(n, hp * wp, cin).astype(jnp.bfloat16)

    # (Cout, Cin, kh, kw) -> (kh, kw, Cin, Cout) -> (k*k*Cin, Cout), bf16.
    w2 = jnp.transpose(w, (2, 3, 1, 0)).reshape(ksize * ksize * cin, cout)
    w2 = w2.astype(jnp.bfloat16)
    b2 = b.reshape(1, cout).astype(jnp.float32)
    g2 = gamma.reshape(1, cout).astype(jnp.float32)
    bt2 = beta.reshape(1, cout).astype(jnp.float32)

    kernel = functools.partial(_conv_bn_lrelu_kernel, k=ksize, wp=wp,
                               hout=hout, wout=wout, eps=eps, slope=slope)
    out = pl.pallas_call(
        kernel,
        out_shape=jax.ShapeDtypeStruct((n, hout * wout, cout), jnp.float32),
        grid=(1,),
        in_specs=[
            pl.BlockSpec((n, hp * wp, cin), lambda i: (0, 0, 0)),
            pl.BlockSpec((ksize * ksize * cin, cout), lambda i: (0, 0)),
            pl.BlockSpec((1, cout), lambda i: (0, 0)),
            pl.BlockSpec((1, cout), lambda i: (0, 0)),
            pl.BlockSpec((1, cout), lambda i: (0, 0)),
        ],
        out_specs=pl.BlockSpec((n, hout * wout, cout), lambda i: (0, 0, 0)),
        # Single grid step: BN batch statistics couple the whole batch, so the
        # batch cannot be split across cores without a second pass over HBM.
        compiler_params=pltpu.CompilerParams(
            dimension_semantics=("arbitrary",)),
    )(x2, w2, b2, g2, bt2)

    # (N, Hout*Wout, Cout) -> NCHW (reshape/transpose are layout glue only).
    return jnp.transpose(out.reshape(n, hout, wout, cout), (0, 3, 1, 2))


# ----------------------------------------------------------------------------
# Pure-JAX reference (bf16-quantized conv operands, f32 accumulate, like kernel)
# ----------------------------------------------------------------------------
def _reference(x, w, b, gamma, beta, *, stride=1, padding=1, eps=1e-5, slope=0.1):
    xq = x.astype(jnp.bfloat16).astype(jnp.float32)
    wq = w.astype(jnp.bfloat16).astype(jnp.float32)
    conv = jax.lax.conv_general_dilated(
        xq, wq, window_strides=(stride, stride),
        padding=[(padding, padding), (padding, padding)],
        dimension_numbers=("NCHW", "OIHW", "NCHW"),
        precision=jax.lax.Precision.HIGHEST)
    conv = conv + b.reshape(1, -1, 1, 1)
    mean = jnp.mean(conv, axis=(0, 2, 3), keepdims=True)
    var = jnp.var(conv, axis=(0, 2, 3), keepdims=True)    # biased, BN training
    y = (conv - mean) * jax.lax.rsqrt(var + eps)
    y = gamma.reshape(1, -1, 1, 1) * y + beta.reshape(1, -1, 1, 1)
    return jnp.where(y > 0, y, slope * y)


# ----------------------------------------------------------------------------
# Main
# ----------------------------------------------------------------------------
if __name__ == "__main__":
    key = jax.random.PRNGKey(0)
    kx, kw, kb, kg, kbt = jax.random.split(key, 5)

    batch, in_ch, spatial = 2, 4, 16
    num_filter, ksize = 32, 3

    x = jax.random.normal(kx, (batch, in_ch, spatial, spatial), jnp.float32)
    bound = 1.0 / math.sqrt(in_ch * ksize * ksize)  # PyTorch Conv2d default init
    w = jax.random.uniform(kw, (num_filter, in_ch, ksize, ksize), jnp.float32,
                           -bound, bound)
    b = jax.random.uniform(kb, (num_filter,), jnp.float32, -bound, bound)
    # BatchNorm2d initializes gamma=1, beta=0; use random values here to
    # exercise the affine path.
    gamma = jax.random.uniform(kg, (num_filter,), jnp.float32, 0.5, 1.5)
    beta = jax.random.uniform(kbt, (num_filter,), jnp.float32, -0.5, 0.5)

    fwd = jax.jit(functools.partial(conv_bn_lrelu, ksize=ksize, stride=1,
                                    padding=1))
    out = jax.block_until_ready(fwd(x, w, b, gamma, beta))

    assert out.shape == (batch, num_filter, spatial, spatial), out.shape
    assert bool(jnp.all(jnp.isfinite(out)))
    ref = _reference(x, w, b, gamma, beta)
    err = float(jnp.max(jnp.abs(out - ref)))
    assert err < 1e-2, f"max abs err vs reference: {err}"

    print("KERNEL_OK")
</pallas_src>

<mosaic_0001>
module attributes {stable_mosaic.version = 11 : i64} {
  func.func @_conv_bn_lrelu_kernel(%arg0: i32, %arg1: memref<2x456x4xbf16, #tpu.memory_space<vmem>>, %arg2: memref<36x32xbf16, #tpu.memory_space<vmem>>, %arg3: memref<1x32xf32, #tpu.memory_space<vmem>>, %arg4: memref<1x32xf32, #tpu.memory_space<vmem>>, %arg5: memref<1x32xf32, #tpu.memory_space<vmem>>, %arg6: memref<2x256x32xf32, #tpu.memory_space<vmem>>) attributes {dimension_semantics = [#tpu.dimension_semantics<arbitrary>], iteration_bounds = array<i64: 1>, scalar_prefetch = 0 : i64, scratch_operands = 0 : i64, tpu.core_type = #tpu.core_type<tc>, window_params = [{pipeline_mode = #tpu.pipeline_mode<synchronous>, transform_indices = @transform_0, window_bounds = array<i64: 2, 456, 4>}, {pipeline_mode = #tpu.pipeline_mode<synchronous>, transform_indices = @transform_1, window_bounds = array<i64: 36, 32>}, {pipeline_mode = #tpu.pipeline_mode<synchronous>, transform_indices = @transform_2, window_bounds = array<i64: 1, 32>}, {pipeline_mode = #tpu.pipeline_mode<synchronous>, transform_indices = @transform_3, window_bounds = array<i64: 1, 32>}, {pipeline_mode = #tpu.pipeline_mode<synchronous>, transform_indices = @transform_4, window_bounds = array<i64: 1, 32>}, {pipeline_mode = #tpu.pipeline_mode<synchronous>, transform_indices = @transform_5, window_bounds = array<i64: 2, 256, 32>}]} {
    %cst = arith.constant 0.000000e+00 : f32
    %0 = vector.broadcast %cst : f32 to vector<1x32xf32>
    %cst_0 = arith.constant 0.000000e+00 : f32
    %1 = vector.broadcast %cst_0 : f32 to vector<1x32xf32>
    %c0 = arith.constant 0 : index
    %c0_1 = arith.constant 0 : index
    %c0_2 = arith.constant 0 : index
    %2 = vector.load %arg1[%c0, %c0_1, %c0_2] : memref<2x456x4xbf16, #tpu.memory_space<vmem>>, vector<1x456x4xbf16>
    %3 = vector.shape_cast %2 : vector<1x456x4xbf16> to vector<456x4xbf16>
    %4 = vector.extract_strided_slice %3 {offsets = [0, 0], sizes = [384, 4], strides = [1, 1]} : vector<456x4xbf16> to vector<384x4xbf16>
    %5 = vector.extract_strided_slice %3 {offsets = [1, 0], sizes = [384, 4], strides = [1, 1]} : vector<456x4xbf16> to vector<384x4xbf16>
    %6 = vector.extract_strided_slice %3 {offsets = [2, 0], sizes = [384, 4], strides = [1, 1]} : vector<456x4xbf16> to vector<384x4xbf16>
    %7 = vector.extract_strided_slice %3 {offsets = [24, 0], sizes = [384, 4], strides = [1, 1]} : vector<456x4xbf16> to vector<384x4xbf16>
    %8 = vector.extract_strided_slice %3 {offsets = [25, 0], sizes = [384, 4], strides = [1, 1]} : vector<456x4xbf16> to vector<384x4xbf16>
    %9 = vector.extract_strided_slice %3 {offsets = [26, 0], sizes = [384, 4], strides = [1, 1]} : vector<456x4xbf16> to vector<384x4xbf16>
    %10 = vector.extract_strided_slice %3 {offsets = [48, 0], sizes = [384, 4], strides = [1, 1]} : vector<456x4xbf16> to vector<384x4xbf16>
    %11 = vector.extract_strided_slice %3 {offsets = [49, 0], sizes = [384, 4], strides = [1, 1]} : vector<456x4xbf16> to vector<384x4xbf16>
    %12 = vector.extract_strided_slice %3 {offsets = [50, 0], sizes = [384, 4], strides = [1, 1]} : vector<456x4xbf16> to vector<384x4xbf16>
    %13 = tpu.concatenate %4, %5, %6, %7, %8, %9, %10, %11, %12 in 1 : vector<384x4xbf16>, vector<384x4xbf16>, vector<384x4xbf16>, vector<384x4xbf16>, vector<384x4xbf16>, vector<384x4xbf16>, vector<384x4xbf16>, vector<384x4xbf16>, vector<384x4xbf16> -> vector<384x36xbf16>
    %c0_3 = arith.constant 0 : index
    %c0_4 = arith.constant 0 : index
    %14 = vector.load %arg2[%c0_3, %c0_4] : memref<36x32xbf16, #tpu.memory_space<vmem>>, vector<36x32xbf16>
    %cst_5 = arith.constant dense<0.000000e+00> : vector<384x32xf32>
    %15 = tpu.matmul %13, %14, %cst_5 {dimension_numbers = #tpu.dot_dimension_numbers<[1], [0], [0], [1], [0, 0, 1, 1], [], []>} : vector<384x36xbf16>, vector<36x32xbf16>, vector<384x32xf32> -> vector<384x32xf32>
    %c0_6 = arith.constant 0 : index
    %c0_7 = arith.constant 0 : index
    %16 = vector.load %arg3[%c0_6, %c0_7] : memref<1x32xf32, #tpu.memory_space<vmem>>, vector<1x32xf32>
    %17 = vector.broadcast %16 : vector<1x32xf32> to vector<384x32xf32>
    %18 = arith.addf %15, %17 : vector<384x32xf32>
    %19 = vector.shape_cast %18 : vector<384x32xf32> to vector<16x24x32xf32>
    %20 = vector.extract_strided_slice %19 {offsets = [0, 0, 0], sizes = [16, 16, 32], strides = [1, 1, 1]} : vector<16x24x32xf32> to vector<16x16x32xf32>
    %21 = vector.shape_cast %20 : vector<16x16x32xf32> to vector<256x32xf32>
    %cst_8 = arith.constant dense<0.000000e+00> : vector<32xf32>
    %22 = vector.multi_reduction <add>, %21, %cst_8 [0] : vector<256x32xf32> to vector<32xf32>
    %23 = vector.shape_cast %22 : vector<32xf32> to vector<1x32xf32>
    %24 = arith.addf %0, %23 : vector<1x32xf32>
    %25 = arith.mulf %21, %21 : vector<256x32xf32>
    %cst_9 = arith.constant dense<0.000000e+00> : vector<32xf32>
    %26 = vector.multi_reduction <add>, %25, %cst_9 [0] : vector<256x32xf32> to vector<32xf32>
    %27 = vector.shape_cast %26 : vector<32xf32> to vector<1x32xf32>
    %28 = arith.addf %1, %27 : vector<1x32xf32>
    %c1 = arith.constant 1 : index
    %c0_10 = arith.constant 0 : index
    %c0_11 = arith.constant 0 : index
    %29 = vector.load %arg1[%c1, %c0_10, %c0_11] : memref<2x456x4xbf16, #tpu.memory_space<vmem>>, vector<1x456x4xbf16>
    %30 = vector.shape_cast %29 : vector<1x456x4xbf16> to vector<456x4xbf16>
    %31 = vector.extract_strided_slice %30 {offsets = [0, 0], sizes = [384, 4], strides = [1, 1]} : vector<456x4xbf16> to vector<384x4xbf16>
    %32 = vector.extract_strided_slice %30 {offsets = [1, 0], sizes = [384, 4], strides = [1, 1]} : vector<456x4xbf16> to vector<384x4xbf16>
    %33 = vector.extract_strided_slice %30 {offsets = [2, 0], sizes = [384, 4], strides = [1, 1]} : vector<456x4xbf16> to vector<384x4xbf16>
    %34 = vector.extract_strided_slice %30 {offsets = [24, 0], sizes = [384, 4], strides = [1, 1]} : vector<456x4xbf16> to vector<384x4xbf16>
    %35 = vector.extract_strided_slice %30 {offsets = [25, 0], sizes = [384, 4], strides = [1, 1]} : vector<456x4xbf16> to vector<384x4xbf16>
    %36 = vector.extract_strided_slice %30 {offsets = [26, 0], sizes = [384, 4], strides = [1, 1]} : vector<456x4xbf16> to vector<384x4xbf16>
    %37 = vector.extract_strided_slice %30 {offsets = [48, 0], sizes = [384, 4], strides = [1, 1]} : vector<456x4xbf16> to vector<384x4xbf16>
    %38 = vector.extract_strided_slice %30 {offsets = [49, 0], sizes = [384, 4], strides = [1, 1]} : vector<456x4xbf16> to vector<384x4xbf16>
    %39 = vector.extract_strided_slice %30 {offsets = [50, 0], sizes = [384, 4], strides = [1, 1]} : vector<456x4xbf16> to vector<384x4xbf16>
    %40 = tpu.concatenate %31, %32, %33, %34, %35, %36, %37, %38, %39 in 1 : vector<384x4xbf16>, vector<384x4xbf16>, vector<384x4xbf16>, vector<384x4xbf16>, vector<384x4xbf16>, vector<384x4xbf16>, vector<384x4xbf16>, vector<384x4xbf16>, vector<384x4xbf16> -> vector<384x36xbf16>
    %c0_12 = arith.constant 0 : index
    %c0_13 = arith.constant 0 : index
    %41 = vector.load %arg2[%c0_12, %c0_13] : memref<36x32xbf16, #tpu.memory_space<vmem>>, vector<36x32xbf16>
    %cst_14 = arith.constant dense<0.000000e+00> : vector<384x32xf32>
    %42 = tpu.matmul %40, %41, %cst_14 {dimension_numbers = #tpu.dot_dimension_numbers<[1], [0], [0], [1], [0, 0, 1, 1], [], []>} : vector<384x36xbf16>, vector<36x32xbf16>, vector<384x32xf32> -> vector<384x32xf32>
    %c0_15 = arith.constant 0 : index
    %c0_16 = arith.constant 0 : index
    %43 = vector.load %arg3[%c0_15, %c0_16] : memref<1x32xf32, #tpu.memory_space<vmem>>, vector<1x32xf32>
    %44 = vector.broadcast %43 : vector<1x32xf32> to vector<384x32xf32>
    %45 = arith.addf %42, %44 : vector<384x32xf32>
    %46 = vector.shape_cast %45 : vector<384x32xf32> to vector<16x24x32xf32>
    %47 = vector.extract_strided_slice %46 {offsets = [0, 0, 0], sizes = [16, 16, 32], strides = [1, 1, 1]} : vector<16x24x32xf32> to vector<16x16x32xf32>
    %48 = vector.shape_cast %47 : vector<16x16x32xf32> to vector<256x32xf32>
    %cst_17 = arith.constant dense<0.000000e+00> : vector<32xf32>
    %49 = vector.multi_reduction <add>, %48, %cst_17 [0] : vector<256x32xf32> to vector<32xf32>
    %50 = vector.shape_cast %49 : vector<32xf32> to vector<1x32xf32>
    %51 = arith.addf %24, %50 : vector<1x32xf32>
    %52 = arith.mulf %48, %48 : vector<256x32xf32>
    %cst_18 = arith.constant dense<0.000000e+00> : vector<32xf32>
    %53 = vector.multi_reduction <add>, %52, %cst_18 [0] : vector<256x32xf32> to vector<32xf32>
    %54 = vector.shape_cast %53 : vector<32xf32> to vector<1x32xf32>
    %55 = arith.addf %28, %54 : vector<1x32xf32>
    %cst_19 = arith.constant 5.120000e+02 : f32
    %56 = vector.broadcast %cst_19 : f32 to vector<1x32xf32>
    %57 = arith.divf %51, %56 : vector<1x32xf32>
    %cst_20 = arith.constant 5.120000e+02 : f32
    %58 = vector.broadcast %cst_20 : f32 to vector<1x32xf32>
    %59 = arith.divf %55, %58 : vector<1x32xf32>
    %60 = arith.mulf %57, %57 : vector<1x32xf32>
    %61 = arith.subf %59, %60 : vector<1x32xf32>
    %c0_21 = arith.constant 0 : index
    %c0_22 = arith.constant 0 : index
    %62 = vector.load %arg4[%c0_21, %c0_22] : memref<1x32xf32, #tpu.memory_space<vmem>>, vector<1x32xf32>
    %cst_23 = arith.constant 9.99999974E-6 : f32
    %63 = vector.broadcast %cst_23 : f32 to vector<1x32xf32>
    %64 = arith.addf %61, %63 : vector<1x32xf32>
    %65 = math.rsqrt %64 : vector<1x32xf32>
    %66 = arith.mulf %62, %65 : vector<1x32xf32>
    %c0_24 = arith.constant 0 : index
    %c0_25 = arith.constant 0 : index
    %67 = vector.load %arg5[%c0_24, %c0_25] : memref<1x32xf32, #tpu.memory_space<vmem>>, vector<1x32xf32>
    %68 = arith.mulf %57, %66 : vector<1x32xf32>
    %69 = arith.subf %67, %68 : vector<1x32xf32>
    %70 = vector.broadcast %66 : vector<1x32xf32> to vector<256x32xf32>
    %71 = arith.mulf %21, %70 : vector<256x32xf32>
    %72 = vector.broadcast %69 : vector<1x32xf32> to vector<256x32xf32>
    %73 = arith.addf %71, %72 : vector<256x32xf32>
    %cst_26 = arith.constant 1.000000e-01 : f32
    %74 = vector.broadcast %cst_26 : f32 to vector<256x32xf32>
    %75 = arith.mulf %74, %73 : vector<256x32xf32>
    %76 = arith.maximumf %73, %75 : vector<256x32xf32>
    %c0_27 = arith.constant 0 : index
    %c0_28 = arith.constant 0 : index
    %c0_29 = arith.constant 0 : index
    %77 = vector.load %arg6[%c0_27, %c0_28, %c0_29] : memref<2x256x32xf32, #tpu.memory_space<vmem>>, vector<1x256x32xf32>
    %78 = vector.shape_cast %77 : vector<1x256x32xf32> to vector<256x32xf32>
    %79 = vector.shape_cast %76 : vector<256x32xf32> to vector<1x256x32xf32>
    tpu.vector_store %arg6[%c0_27, %c0_28, %c0_29], %79 {strides = array<i32>} : memref<2x256x32xf32, #tpu.memory_space<vmem>>, vector<1x256x32xf32>,
    %80 = vector.broadcast %66 : vector<1x32xf32> to vector<256x32xf32>
    %81 = arith.mulf %48, %80 : vector<256x32xf32>
    %82 = vector.broadcast %69 : vector<1x32xf32> to vector<256x32xf32>
    %83 = arith.addf %81, %82 : vector<256x32xf32>
    %cst_30 = arith.constant 1.000000e-01 : f32
    %84 = vector.broadcast %cst_30 : f32 to vector<256x32xf32>
    %85 = arith.mulf %84, %83 : vector<256x32xf32>
    %86 = arith.maximumf %83, %85 : vector<256x32xf32>
    %c1_31 = arith.constant 1 : index
    %c0_32 = arith.constant 0 : index
    %c0_33 = arith.constant 0 : index
    %87 = vector.load %arg6[%c1_31, %c0_32, %c0_33] : memref<2x256x32xf32, #tpu.memory_space<vmem>>, vector<1x256x32xf32>
    %88 = vector.shape_cast %87 : vector<1x256x32xf32> to vector<256x32xf32>
    %89 = vector.shape_cast %86 : vector<256x32xf32> to vector<1x256x32xf32>
    tpu.vector_store %arg6[%c1_31, %c0_32, %c0_33], %89 {strides = array<i32>} : memref<2x256x32xf32, #tpu.memory_space<vmem>>, vector<1x256x32xf32>,
    return
  }
  func.func @transform_0(%arg0: i32) -> (i32, i32, i32) {
    %c0_i32 = arith.constant 0 : i32
    %c0_i32_0 = arith.constant 0 : i32
    %c0_i32_1 = arith.constant 0 : i32
    %c0_i32_2 = arith.constant 0 : i32
    return %c0_i32, %c0_i32_0, %c0_i32_1 : i32, i32, i32
  }
  func.func @transform_1(%arg0: i32) -> (i32, i32) {
    %c0_i32 = arith.constant 0 : i32
    %c0_i32_0 = arith.constant 0 : i32
    %c0_i32_1 = arith.constant 0 : i32
    return %c0_i32, %c0_i32_0 : i32, i32
  }
  func.func @transform_2(%arg0: i32) -> (i32, i32) {
    %c0_i32 = arith.constant 0 : i32
    %c0_i32_0 = arith.constant 0 : i32
    %c0_i32_1 = arith.constant 0 : i32
    return %c0_i32, %c0_i32_0 : i32, i32
  }
  func.func @transform_3(%arg0: i32) -> (i32, i32) {
    %c0_i32 = arith.constant 0 : i32
    %c0_i32_0 = arith.constant 0 : i32
    %c0_i32_1 = arith.constant 0 : i32
    return %c0_i32, %c0_i32_0 : i32, i32
  }
  func.func @transform_4(%arg0: i32) -> (i32, i32) {
    %c0_i32 = arith.constant 0 : i32
    %c0_i32_0 = arith.constant 0 : i32
    %c0_i32_1 = arith.constant 0 : i32
    return %c0_i32, %c0_i32_0 : i32, i32
  }
  func.func @transform_5(%arg0: i32) -> (i32, i32, i32) {
    %c0_i32 = arith.constant 0 : i32
    %c0_i32_0 = arith.constant 0 : i32
    %c0_i32_1 = arith.constant 0 : i32
    %c0_i32_2 = arith.constant 0 : i32
    return %c0_i32, %c0_i32_0, %c0_i32_1 : i32, i32, i32
  }
}

</mosaic_0001>

<bundles_post_ra>
// kernel: conv_bn_lrelu.1
= control target key start
LH: loop header
LB: loop body
LE: loop exit
PB: predicated region body
PF: predicated region fallthrough
CT: control target
= control target key end

     0   :  { %vm200_vm0 = vsmask.f32 7424  ;;  %s9702_s0 = inlined_call_operand.vmem [shape: bf16[2,456,4], index: 0, kind: input, shape index: {}]   ;;  %s9703_s1 = inlined_call_operand.vmem [shape: bf16[36,32], index: 1, kind: input, shape index: {}]   ;;  %s9704_s2 = inlined_call_operand.vmem [shape: f32[1,32], index: 2, kind: input, shape index: {}]   ;;  %s9705_s3 = inlined_call_operand.vmem [shape: f32[1,32], index: 3, kind: input, shape index: {}]   ;;  %s9706_s4 = inlined_call_operand.vmem [shape: f32[1,32], index: 4, kind: input, shape index: {}]   ;;  %s9707_s5 = inlined_call_operand.hbm [shape: f32[2,256,32], index: 5, kind: output, shape index: {}]  }
   0x1   :  { %v4984_v0 = vld [vmem:[%s9702_s0 + $0x20] sm:$0xff]   ;;  %v4989_v1 = vld [vmem:[%s9702_s0 + $0x28] sm:$0xff]   ;;  %v4994_v2 = vld [vmem:[%s9702_s0 + $0x10] sm:$0xff]  }
   0x2   :  { %v233_v3 = vshll.u32 %v4984_v0, 16  ;;  %v237_v4 = vshrl.u32 %v4984_v0, 16  ;;  %v241_v5 = vshll.u32 %v4989_v1, 16  ;;  %v5002_v6 = vld [vmem:[%s9702_s0 + $0x18] sm:$0xff]   ;;  %v217_v7 = vshll.u32 %v4994_v2, 16  ;;  %v5008_v8 = vld [vmem:[%s9702_s0 + $0x8] sm:$0xff]  }
   0x3   :  { %v221_v9 = vshrl.u32 %v4994_v2, 16  ;;  %v225_v10 = vshll.u32 %v5002_v6, 16  ;;  %v209_v11 = vshll.u32 %v5008_v8, 16  ;;  %v213_v12 = vshrl.u32 %v5008_v8, 16  ;;  %v5017_v13 = vld [vmem:[%s9702_s0 + $0x30] sm:$0xff]   ;;  %v5022_v14 = vld [vmem:[%s9702_s0] sm:$0xff] }
   0x4   :  { %v235_v15 = vrot.slane %v233_v3, 1  ;;  %v243_v16 = vrot.slane %v241_v5, 1  ;;  %v219_v17 = vrot.slane %v217_v7, 1  ;;  %v245_v18 = vshrl.u32 %v4989_v1, 16  ;;  %v5032_v28 = vld [vmem:[%s9702_s0 + $0x40] sm:$0xff]   ;;  %v5037_v29 = vld [vmem:[%s9702_s0 + $0x38] sm:$0xff]  }
   0x5   :  { %v227_v19 = vrot.slane %v225_v10, 1  ;;  %v211_v20 = vrot.slane %v209_v11, 1  ;;  %v249_v21 = vshll.u32 %v5017_v13, 16  ;;  %v229_v22 = vshrl.u32 %v5002_v6, 16 }
   0x6   :  { %v239_v23 = vor.u32 %v237_v4, %v235_v15  ;;  %v223_v24 = vor.u32 %v221_v9, %v219_v17  ;;  %v202_v26 = vshrl.u32 %v5022_v14, 16  ;;  %v204_v27 = vshll.u32 %v5022_v14, 16 }
   0x7   :  { %v215_v25 = vor.u32 %v213_v12, %v211_v20  ;;  %v247_v32 = vor.u32 %v245_v18, %v243_v16 }
   0x8   :  { %v5040_v30 = vsel %vm200_vm0, %v239_v23, %v243_v16  ;;  %v228_v31 = vsel %vm200_vm0, %v223_v24, %v227_v19 }
   0x9   :  { %10 = vsyncpa [#allocation3], 0  ;;  %s4940_s11 = smov 4   ;;  %v220_v33 = vsel %vm200_vm0, %v215_v25, %v219_v17  ;;  %v251_v34 = vrot.slane %v249_v21, 1  ;;  %v231_v35 = vor.u32 %v229_v22, %v227_v19  ;;  %v206_v36 = vrot.slane %v204_v27, 1  ;;  %v5053_v40 = vld [vmem:[%s9702_s0 + $0x48] sm:$0xff]  }
   0xa   :  { %405 = vrot.lane.b32.xlu2 %v5040_v30, %s4940_s11  ;;  %401 = vrot.lane.b32.xlu1 %v228_v31, %s4940_s11  ;;  %v265_v37 = vshll.u32 %v5032_v28, 16  ;;  %v257_v38 = vshll.u32 %v5037_v29, 16  ;;  %v269_v43 = vshrl.u32 %v5032_v28, 16  ;;  %v273_v45 = vshll.u32 %v5053_v40, 16  ;;  %v5067_v48 = vld [vmem:[%s9702_s0 + $0x58] sm:$0xff]   ;;  %v5074_v51 = vld [vmem:[%s9702_s0 + $0x50] sm:$0xff]  }
   0xb   :  { %399 = vrot.lane.b32.xlu0 %v220_v33, %s4940_s11  ;;  %v207_v39 = vor.u32 %v206_v36, %v202_v26  ;;  %v5056_v41 = vsel %vm200_vm0, %v247_v32, %v251_v34  ;;  %v5059_v42 = vsel %vm200_vm0, %v231_v35, %v235_v15  ;;  %v261_v47 = vshrl.u32 %v5037_v29, 16  ;;  %v5085_v56 = vld [vmem:[%s9702_s0 + $0x60] sm:$0xff]   ;;  %v5104_v9 = vld [vmem:[%s9702_s0 + $0x70] sm:$0xff]   ;;  %v5109_v10 = vld [vmem:[%s9702_s0 + $0x68] sm:$0xff]   ;;  %s4941_s20 = smov 8   ;;  %s4942_s27 = smov 12  }
   0xc   :  { %v267_v44 = vrot.slane %v265_v37, 1  ;;  %v259_v46 = vrot.slane %v257_v38, 1  ;;  %v253_v50 = vshrl.u32 %v5017_v13, 16  ;;  %v289_v52 = vshll.u32 %v5067_v48, 16  ;;  %v5120_v16 = vld [vmem:[%s9702_s0 + $0x78] sm:$0xff]   ;;  %v5136_v27 = vld [vmem:[%s9702_s0 + $0x88] sm:$0xff]  }
   0xd   :  { %v212_v49 = vsel %vm200_vm0, %v207_v39, %v211_v20  ;;  %v275_v54 = vrot.slane %v273_v45, 1  ;;  %v281_v57 = vshll.u32 %v5074_v51, 16  ;;  %v293_v60 = vshrl.u32 %v5067_v48, 16  ;;  %v5145_v33 = vld [vmem:[%s9702_s0 + $0x80] sm:$0xff]   ;;  %v5157_v38 = vld [vmem:[%s9702_s0 + $0x90] sm:$0xff]   ;;  %s4943_s23 = smov 16  }
   0xe   :  { %v271_v53 = vor.u32 %v269_v43, %v267_v44  ;;  %v263_v55 = vor.u32 %v261_v47, %v259_v46  ;;  %v255_v58 = vor.u32 %v253_v50, %v251_v34  ;;  %v291_v59 = vrot.slane %v289_v52, 1  ;;  %s4944_s26 = smov 20   ;;  %s4945_s30 = smov 24  }
   0xf   :  { %v297_v61 = vshll.u32 %v5085_v56, 16  ;;  %v283_v3 = vrot.slane %v281_v57, 1  ;;  %v285_v4 = vshrl.u32 %v5074_v51, 16  ;;  %v277_v7 = vshrl.u32 %v5053_v40, 16  ;;  %v5181_v57 = vld [vmem:[%s9702_s0 + $0x98] sm:$0xff]   ;;  %s4946_s8 = smov 28  }
  0x10   :  { %v5091_v62 = vsel %vm200_vm0, %v271_v53, %v275_v54  ;;  %v5094_v63 = vsel %vm200_vm0, %v263_v55, %v267_v44  ;;  %v5098_v5 = vsel %vm200_vm0, %v255_v58, %v259_v46  ;;  %v295_v11 = vor.u32 %v293_v60, %v291_v59  ;;  %v5172_v53 = vld [vmem:[%s9702_s0 + $0xa0] sm:$0xff]   ;;  %s4947_s12 = smov 32   ;;  %s4116_s6 = sshll.u32 %s9707_s5, 4  ;;  %s4117_s6 = int_to_ptr.hbm [resolvable:$true] %s4116_s6 }
  0x11   :  { %v299_v12 = vrot.slane %v297_v61, 1  ;;  %v287_v15 = vor.u32 %v285_v4, %v283_v3  ;;  %v313_v17 = vshll.u32 %v5104_v9, 16  ;;  %v305_v18 = vshll.u32 %v5109_v10, 16  ;;  %s4950_s7 = smov 128  }
  0x12   :  { %407 = vrot.lane.b32.xlu2 %v5056_v41, %s4940_s11  ;;  %403 = vrot.lane.b32.xlu1 %v5059_v42, %s4940_s11  ;;  %v279_v19 = vor.u32 %v277_v7, %v275_v54  ;;  %v317_v21 = vshrl.u32 %v5104_v9, 16  ;;  %v321_v22 = vshll.u32 %v5120_v16, 16  ;;  %v309_v26 = vshrl.u32 %v5109_v10, 16 }
  0x13   :  { %397 = vrot.lane.b32.xlu0 %v212_v49, %s4940_s11  ;;  %v5125_v20 = vsel %vm200_vm0, %v295_v11, %v299_v12  ;;  %v5130_v23 = vsel %vm200_vm0, %v287_v15, %v291_v59  ;;  %v315_v24 = vrot.slane %v313_v17, 1  ;;  %v307_v25 = vrot.slane %v305_v18, 1  ;;  %v4480_v11 = vld [vmem:[%s9702_s0 + $0xc0] sm:$0xff]  }
  0x14   :  { %v5139_v31 = vsel %vm200_vm0, %v279_v19, %v283_v3  ;;  %v301_v32 = vshrl.u32 %v5085_v56, 16  ;;  %v337_v34 = vshll.u32 %v5136_v27, 16  ;;  %v323_v36 = vrot.slane %v321_v22, 1  ;;  %v5193_v3 = vld [vmem:[%s9702_s0 + $0xa8] sm:$0xff]  }
  0x15   :  { %v319_v35 = vor.u32 %v317_v21, %v315_v24  ;;  %v311_v37 = vor.u32 %v309_v26, %v307_v25  ;;  %v329_v39 = vshll.u32 %v5145_v33, 16  ;;  %v341_v45 = vshrl.u32 %v5136_v27, 16 }
  0x16   :  { %v303_v43 = vor.u32 %v301_v32, %v299_v12  ;;  %v339_v44 = vrot.slane %v337_v34, 1  ;;  %v345_v46 = vshll.u32 %v5157_v38, 16  ;;  %v333_v52 = vshrl.u32 %v5145_v33, 16  ;;  %v5222_v34 = vld [vmem:[%s9702_s0 + $0xb0] sm:$0xff]  }
  0x17   :  { %v5163_v47 = vsel %vm200_vm0, %v319_v35, %v323_v36  ;;  %v5166_v49 = vsel %vm200_vm0, %v311_v37, %v315_v24  ;;  %v331_v50 = vrot.slane %v329_v39, 1  ;;  %v325_v55 = vshrl.u32 %v5120_v16, 16  ;;  %v5211_v24 = vld [vmem:[%s9702_s0 + $0xb8] sm:$0xff]  }
  0x18   :  { %v5175_v54 = vsel %vm200_vm0, %v303_v43, %v307_v25  ;;  %v343_v58 = vor.u32 %v341_v45, %v339_v44  ;;  %v347_v59 = vrot.slane %v345_v46, 1  ;;  %v361_v60 = vshll.u32 %v5172_v53, 16 }
  0x19   :  { %v335_v61 = vor.u32 %v333_v52, %v331_v50  ;;  %v353_v4 = vshll.u32 %v5181_v57, 16  ;;  %v327_v7 = vor.u32 %v325_v55, %v323_v36  ;;  %v365_v17 = vshrl.u32 %v5172_v53, 16 }
  0x1a   :  { %413 = vrot.lane.b32.xlu2 %v5091_v62, %s4940_s11  ;;  %411 = vrot.lane.b32.xlu1 %v5094_v63, %s4940_s11  ;;  %v5200_v12 = vsel %vm200_vm0, %v343_v58, %v347_v59  ;;  %v363_v15 = vrot.slane %v361_v60, 1  ;;  %v369_v18 = vshll.u32 %v5193_v3, 16  ;;  %v357_v22 = vshrl.u32 %v5181_v57, 16 }
  0x1b   :  { %409 = vrot.lane.b32.xlu0 %v5098_v5, %s4940_s11  ;;  %v5205_v19 = vsel %vm200_vm0, %v335_v61, %v339_v44  ;;  %v355_v21 = vrot.slane %v353_v4, 1  ;;  %v5213_v25 = vunpack.c.l.b16 %v4480_v11  ;;  %v5216_v26 = vsel %vm200_vm0, %v327_v7, %v331_v50 }
  0x1c   :  { %v349_v32 = vshrl.u32 %v5157_v38, 16  ;;  %v367_v35 = vor.u32 %v365_v17, %v363_v15  ;;  %v371_v36 = vrot.slane %v369_v18, 1  ;;  %v385_v37 = vshll.u32 %v5211_v24, 16 }
  0x1d   :  { %v359_v39 = vor.u32 %v357_v22, %v355_v21  ;;  %v5233_v43 = vpack.c.b16 %v5213_v25, %v5213_v25  ;;  %v377_v44 = vshll.u32 %v5222_v34, 16  ;;  %v389_v52 = vshrl.u32 %v5211_v24, 16 }
  0x1e   :  { %v351_v45 = vor.u32 %v349_v32, %v347_v59  ;;  %v5237_v46 = vsel %vm200_vm0, %v367_v35, %v371_v36  ;;  %v387_v50 = vrot.slane %v385_v37, 1  ;;  %v381_v61 = vshrl.u32 %v5222_v34, 16 }
  0x1f   :  { %9813 = vst [vmem:[#allocation5_spill] sm:$0xff] %v5237_v46  ;;  %v5241_v55 = vsel %vm200_vm0, %v359_v39, %v363_v15  ;;  %v393_v58 = vshll.u32 %v5233_v43, 16  ;;  %v379_v60 = vrot.slane %v377_v44, 1  ;;  %v373_v7 = vshrl.u32 %v5193_v3, 16 }
  0x20   :  { %9814 = vst [vmem:[#allocation6_spill] sm:$0xff] %v5241_v55  ;;  %v5246_v4 = vsel %vm200_vm0, %v351_v45, %v355_v21  ;;  %v5255_v59 = vor.u32 %v389_v52, %v387_v50  ;;  %v449_v32 = vrot.slane %v4994_v2, 1  ;;  %v451_v35 = vrot.slane %v5002_v6, 1 }
  0x21   :  { %9815 = vst [vmem:[#allocation7_spill] sm:$0xff] %v5246_v4  ;;  %v395_v11 = vrot.slane %v393_v58, 1  ;;  %v383_v15 = vor.u32 %v381_v61, %v379_v60  ;;  %v375_v17 = vor.u32 %v373_v7, %v371_v36  ;;  %v447_v36 = vrot.slane %v5008_v8, 1 }
  0x22   :  { %419 = vrot.lane.b32.xlu2 %v5125_v20, %s4940_s11  ;;  %417 = vrot.lane.b32.xlu1 %v5130_v23, %s4940_s11  ;;  %9816 = vst [vmem:[#allocation8_spill] sm:$0xff] %v5255_v59  ;;  %vm445_vm1 = vcmask 1046528   ;;  %v446_v37 = vrot.slane %v5022_v14, 1  ;;  %v455_v2 = vrot.slane %v4989_v1, 1  ;;  %v457_v6 = vrot.slane %v5017_v13, 1 }
  0x23   :  { %415 = vrot.lane.b32.xlu0 %v5139_v31, %s4940_s11  ;;  %v396_v18 = vsel %vm200_vm0, %v5255_v59, %v395_v11  ;;  %v5260_v21 = vsel %vm200_vm0, %v383_v15, %v387_v50  ;;  %v5263_v22 = vsel %vm200_vm0, %v375_v17, %v379_v60  ;;  %v452_v39 = vsel %vm445_vm1, %v449_v32, %v451_v35 }
  0x24   :  { %9817 = vst [vmem:[#allocation9_spill] sm:$0xff] %v5260_v21  ;;  %v450_v44 = vsel %vm445_vm1, %v447_v36, %v449_v32  ;;  %v448_v45 = vsel %vm445_vm1, %v446_v37, %v447_v36  ;;  %v453_v8 = vrot.slane %v4984_v0, 1  ;;  %v5284_v14 = vsel %vm445_vm1, %v455_v2, %v457_v6 }
  0x25   :  { %9818 = vst [vmem:[#allocation10_spill] sm:$0xff] %v5263_v22  ;;  %v461_v0 = vrot.slane %v5032_v28, 1  ;;  %v463_v1 = vrot.slane %v5053_v40, 1  ;;  %v459_v13 = vrot.slane %v5037_v29, 1  ;;  %v467_v28 = vrot.slane %v5067_v48, 1 }
  0x26   :  { %9819 = vst [vmem:[#allocation11_spill] sm:$0xff] %v5284_v14  ;;  %v5287_v50 = vsel %vm445_vm1, %v453_v8, %v455_v2  ;;  %v5290_v52 = vsel %vm445_vm1, %v451_v35, %v453_v8  ;;  %v469_v29 = vrot.slane %v5085_v56, 1  ;;  %v465_v40 = vrot.slane %v5074_v51, 1 }
  0x27   :  { %9820 = vst [vmem:[#allocation12_spill] sm:$0xff] %v5287_v50  ;;  %v5302_v58 = vsel %vm445_vm1, %v461_v0, %v463_v1  ;;  %v5305_v60 = vsel %vm445_vm1, %v459_v13, %v461_v0  ;;  %v5308_v61 = vsel %vm445_vm1, %v457_v6, %v459_v13  ;;  %v473_v48 = vrot.slane %v5104_v9, 1 }
  0x28   :  { %9821 = vst [vmem:[#allocation13_spill] sm:$0xff] %v5290_v52  ;;  %v5320_v7 = vsel %vm445_vm1, %v467_v28, %v469_v29  ;;  %v5323_v11 = vsel %vm445_vm1, %v465_v40, %v467_v28  ;;  %v5326_v15 = vsel %vm445_vm1, %v463_v1, %v465_v40  ;;  %v475_v51 = vrot.slane %v5120_v16, 1 }
  0x29   :  { %9822 = vst [vmem:[#allocation14_spill] sm:$0xff] %v5302_v58  ;;  %v471_v56 = vrot.slane %v5109_v10, 1  ;;  %v479_v9 = vrot.slane %v5136_v27, 1  ;;  %v481_v10 = vrot.slane %v5157_v38, 1  ;;  %v477_v16 = vrot.slane %v5145_v33, 1 }
  0x2a   :  { %425 = vrot.lane.b32.xlu2 %v5163_v47, %s4940_s11  ;;  %423 = vrot.lane.b32.xlu1 %v5166_v49, %s4940_s11  ;;  %9823 = vst [vmem:[#allocation15_spill] sm:$0xff] %v5305_v60  ;;  %v485_v27 = vrot.slane %v5172_v53, 1  ;;  %v487_v33 = vrot.slane %v5193_v3, 1  ;;  %v483_v38 = vrot.slane %v5181_v57, 1  ;;  %v5395_v53 = vrot.slane %v5211_v24, 1 }
  0x2b   :  { %421 = vrot.lane.b32.xlu0 %v5175_v54, %s4940_s11  ;;  %9824 = vst [vmem:[#allocation16_spill] sm:$0xff] %v5308_v61  ;;  %v5343_v32 = vsel %vm445_vm1, %v471_v56, %v473_v48  ;;  %v5346_v35 = vsel %vm445_vm1, %v469_v29, %v471_v56  ;;  %v5360_v37 = vsel %vm445_vm1, %v479_v9, %v481_v10  ;;  %v493_v57 = vrot.slane %v5233_v43, 1  ;;  %v5428_v56 = vld [vmem:[%s9702_s0 + $0x1c] sm:$0xff]  }
  0x2c   :  { %9825 = vst [vmem:[#allocation17_spill] sm:$0xff] %v5320_v7  ;;  %v5380_v2 = vsel %vm445_vm1, %v485_v27, %v487_v33  ;;  %v5383_v6 = vsel %vm445_vm1, %v483_v38, %v485_v27  ;;  %v5386_v8 = vsel %vm445_vm1, %v481_v10, %v483_v38  ;;  %v489_v3 = vrot.slane %v5222_v34, 1  ;;  %v5438_v10 = vld [vmem:[%s9702_s0 + $0xc] sm:$0xff]   ;;  %v5455_v38 = vld [vmem:[%s9702_s0 + $0x34] sm:$0xff]  }
  0x2d   :  { %9826 = vst [vmem:[#allocation18_spill] sm:$0xff] %v5323_v11  ;;  %v494_v28 = vsel %vm445_vm1, %v5395_v53, %v493_v57  ;;  %v5460_v57 = vld [vmem:[%s9702_s0 + $0x2c] sm:$0xff]   ;;  %vm1619_vm2 = vcmask 1041408   ;;  %vm1154_vm3 = vcmask 31744   ;;  %vm1203_vm4 = vcmask 64512  }
  0x2e   :  { %9827 = vst [vmem:[#allocation19_spill] sm:$0xff] %v5326_v15  ;;  %v5409_v29 = vsel %vm445_vm1, %v489_v3, %v5395_v53  ;;  %v5412_v40 = vsel %vm445_vm1, %v487_v33, %v489_v3  ;;  %v5465_v3 = vld [vmem:[%s9702_s0 + $0x24] sm:$0xff]   ;;  %v658_v59 = vshrl.u32 %v5460_v57, 16  ;;  %vm1252_vm5 = vcmask 97280  }
  0x2f   :  { %9830 = vst [vmem:[#allocation22_spill] sm:$0xff] %v5343_v32  ;;  %vm1301_vm6 = vcmask 130048   ;;  %vm1350_vm7 = vcmask 162816   ;;  %vm1399_vm8 = vcmask 195584   ;;  %vm1448_vm9 = vcmask 228352  }
  0x30   :  { %9831 = vst [vmem:[#allocation23_spill] sm:$0xff] %v5346_v35  ;;  %vm1570_vm10 = vcmask 293888   ;;  %vm1497_vm11 = vcmask 261120  }
  0x31   :  { %9833 = vst [vmem:[#allocation25_spill] sm:$0xff] %v5360_v37 }
  0x32   :  { %431 = vrot.lane.b32.xlu2 %v5200_v12, %s4940_s11  ;;  %429 = vrot.lane.b32.xlu1 %v5205_v19, %s4940_s11  ;;  %9837 = vst [vmem:[#allocation29_spill] sm:$0xff] %v5380_v2 }
  0x33   :  { %427 = vrot.lane.b32.xlu0 %v5216_v26, %s4940_s11  ;;  %9838 = vst [vmem:[#allocation30_spill] sm:$0xff] %v5383_v6 }
  0x34   :  { %9839 = vst [vmem:[#allocation31_spill] sm:$0xff] %v5386_v8 }
  0x35   :  { %9840 = vst [vmem:[#allocation32_spill] sm:$0xff] %v5395_v53  ;;  %v5590_v53 = vld [vmem:[%s9702_s0 + $0xac] sm:$0xff]  }
  0x36   :  { %9844 = vst [vmem:[#allocation36_spill] sm:$0xff] %v5409_v29 }
  0x37   :  { %9845 = vst [vmem:[#allocation37_spill] sm:$0xff] %v5412_v40 }
  0x3a   :  { %437 = vrot.lane.b32.xlu2 %v5237_v46, %s4940_s11  ;;  %435 = vrot.lane.b32.xlu1 %v5241_v55, %s4940_s11 }
  0x3b   :  { %433 = vrot.lane.b32.xlu0 %v5246_v4, %s4940_s11 }
  0x42   :  { %443 = vrot.lane.b32.xlu2 %v396_v18, %s4940_s11  ;;  %441 = vrot.lane.b32.xlu1 %v5260_v21, %s4940_s11  ;;  %v5340_v18 = vsel %vm445_vm1, %v473_v48, %v475_v51 }
  0x43   :  { %439 = vrot.lane.b32.xlu0 %v5263_v22, %s4940_s11  ;;  %9829 = vst [vmem:[#allocation21_spill] sm:$0xff] %v5340_v18 }
  0x4a   :  { %499 = vrot.lane.b32.xlu2 %v452_v39, %s4941_s20  ;;  %497 = vrot.lane.b32.xlu1 %v450_v44, %s4941_s20  ;;  %v5363_v39 = vsel %vm445_vm1, %v477_v16, %v479_v9  ;;  %v5366_v44 = vsel %vm445_vm1, %v475_v51, %v477_v16  ;;  %v5433_v9 = vld [vmem:[%s9702_s0 + $0x14] sm:$0xff]  }
  0x4b   :  { %495 = vrot.lane.b32.xlu0 %v448_v45, %s4941_s20  ;;  %9834 = vst [vmem:[#allocation26_spill] sm:$0xff] %v5363_v39 }
  0x4c   :  { %9835 = vst [vmem:[#allocation27_spill] sm:$0xff] %v5366_v44 }
  0x52   :  { %505 = vrot.lane.b32.xlu2 %v5284_v14, %s4941_s20  ;;  %503 = vrot.lane.b32.xlu1 %v5287_v50, %s4941_s20 }
  0x53   :  { %501 = vrot.lane.b32.xlu0 %v5290_v52, %s4941_s20 }
  0x5a   :  { %511 = vrot.lane.b32.xlu2 %v5302_v58, %s4941_s20  ;;  %509 = vrot.lane.b32.xlu1 %v5305_v60, %s4941_s20  ;;  %v654_v60 = vshll.u32 %v5460_v57, 16 }
  0x5b   :  { %507 = vrot.lane.b32.xlu0 %v5308_v61, %s4941_s20 }
  0x5c   :  { %v656_v21 = vrot.slane %v654_v60, 1 }
  0x5e   :  { %v660_v60 = vor.u32 %v658_v59, %v656_v21 }
  0x62   :  { %517 = vrot.lane.b32.xlu2 %v5320_v7, %s4941_s20  ;;  %515 = vrot.lane.b32.xlu1 %v5323_v11, %s4941_s20  ;;  %v646_v11 = vshll.u32 %v5465_v3, 16 }
  0x63   :  { %513 = vrot.lane.b32.xlu0 %v5326_v15, %s4941_s20  ;;  %v642_v15 = vshrl.u32 %v5428_v56, 16 }
  0x64   :  { %v5337_v17 = vpop.permute.xlu2 %405  ;;  %v648_v7 = vrot.slane %v646_v11, 1 }
  0x65   :  { %9828 = vst [vmem:[#allocation20_spill] sm:$0xff] %v5337_v17  ;;  %v5519_v17 = vld [vmem:[%s9702_s0 + $0x54] sm:$0xff]  }
  0x6a   :  { %523 = vrot.lane.b32.xlu2 %v5340_v18, %s4941_s20  ;;  %521 = vrot.lane.b32.xlu1 %v5343_v32, %s4941_s20  ;;  %v5624_v18 = vld [vmem:[%s9702_s0 + $0xc4] sm:$0xff]  }
  0x6b   :  { %519 = vrot.lane.b32.xlu0 %v5346_v35, %s4941_s20 }
  0x6c   :  { %v5357_v36 = vpop.permute.xlu2 %407 }
  0x6d   :  { %9832 = vst [vmem:[#allocation24_spill] sm:$0xff] %v5357_v36  ;;  %v5509_v36 = vld [vmem:[%s9702_s0 + $0x64] sm:$0xff]  }
  0x72   :  { %529 = vrot.lane.b32.xlu2 %v5360_v37, %s4941_s20  ;;  %527 = vrot.lane.b32.xlu1 %v5363_v39, %s4941_s20  ;;  %v625_v39 = vshll.u32 %v5438_v10, 16 }
  0x73   :  { %525 = vrot.lane.b32.xlu0 %v5366_v44, %s4941_s20 }
  0x74   :  { %v5377_v45 = vpop.permute.xlu2 %413 }
  0x75   :  { %9836 = vst [vmem:[#allocation28_spill] sm:$0xff] %v5377_v45 }
  0x7a   :  { %535 = vrot.lane.b32.xlu2 %v5380_v2, %s4941_s20  ;;  %533 = vrot.lane.b32.xlu1 %v5383_v6, %s4941_s20  ;;  %v5600_v6 = vld [vmem:[%s9702_s0 + $0x9c] sm:$0xff]  }
  0x7b   :  { %531 = vrot.lane.b32.xlu0 %v5386_v8, %s4941_s20  ;;  %v5595_v8 = vld [vmem:[%s9702_s0 + $0xa4] sm:$0xff]  }
  0x7c   :  { %v5399_v0 = vpop.permute.xlu2 %419  ;;  %v5401_v1 = vpop.permute.xlu1 %401 }
  0x7d   :  { %9841 = vst [vmem:[#allocation33_spill] sm:$0xff] %v5399_v0  ;;  %v5403_v13 = vpop.permute.xlu0 %399 }
  0x7e   :  { %9842 = vst [vmem:[#allocation34_spill] sm:$0xff] %v5401_v1  ;;  %v5541_v1 = vld [vmem:[%s9702_s0 + $0x74] sm:$0xff]  }
  0x7f   :  { %9843 = vst [vmem:[#allocation35_spill] sm:$0xff] %v5403_v13  ;;  %v5546_v13 = vld [vmem:[%s9702_s0 + $0x6c] sm:$0xff]  }
  0x82   :  { %541 = vrot.lane.b32.xlu2 %v494_v28, %s4941_s20  ;;  %539 = vrot.lane.b32.xlu1 %v5409_v29, %s4941_s20  ;;  %v5573_v29 = vld [vmem:[%s9702_s0 + $0x84] sm:$0xff]  }
  0x83   :  { %537 = vrot.lane.b32.xlu0 %v5412_v40, %s4941_s20  ;;  %v5568_v40 = vld [vmem:[%s9702_s0 + $0x8c] sm:$0xff]  }
  0x84   :  { %v5419_v43 = vpop.permute.xlu2 %425  ;;  %v5421_v48 = vpop.permute.xlu1 %403 }
  0x85   :  { %9846 = vst [vmem:[#allocation38_spill] sm:$0xff] %v5419_v43  ;;  %v5423_v51 = vpop.permute.xlu0 %397  ;;  %v5514_v43 = vld [vmem:[%s9702_s0 + $0x5c] sm:$0xff]  }
  0x86   :  { %9847 = vst [vmem:[#allocation39_spill] sm:$0xff] %v5421_v48 }
  0x87   :  { %9848 = vst [vmem:[#allocation40_spill] sm:$0xff] %v5423_v51  ;;  %v5563_v51 = vld [vmem:[%s9702_s0 + $0x94] sm:$0xff]  }
  0x8a   :  { %575 = vrot.lane.b32.xlu2 %v5428_v56, %s4942_s27  ;;  %573 = vrot.lane.b32.xlu1 %v5433_v9, %s4942_s27 }
  0x8b   :  { %571 = vrot.lane.b32.xlu0 %v5438_v10, %s4942_s27 }
  0x8c   :  { %v5446_v16 = vpop.permute.xlu2 %431  ;;  %v5448_v27 = vpop.permute.xlu1 %411 }
  0x8d   :  { %9849 = vst [vmem:[#allocation41_spill] sm:$0xff] %v5446_v16  ;;  %v5450_v33 = vpop.permute.xlu0 %409  ;;  %v5487_v16 = vld [vmem:[%s9702_s0 + $0x44] sm:$0xff]  }
  0x8e   :  { %9850 = vst [vmem:[#allocation42_spill] sm:$0xff] %v5448_v27  ;;  %v5482_v27 = vld [vmem:[%s9702_s0 + $0x4c] sm:$0xff]   ;;  %v682_v55 = vshrl.u32 %v5487_v16, 16 }
  0x8f   :  { %9851 = vst [vmem:[#allocation43_spill] sm:$0xff] %v5450_v33  ;;  %v5492_v33 = vld [vmem:[%s9702_s0 + $0x3c] sm:$0xff]  }
  0x90   :  { %v670_v22 = vshll.u32 %v5492_v33, 16 }
  0x92   :  { %581 = vrot.lane.b32.xlu2 %v5455_v38, %s4942_s27  ;;  %579 = vrot.lane.b32.xlu1 %v5460_v57, %s4942_s27 }
  0x93   :  { %577 = vrot.lane.b32.xlu0 %v5465_v3, %s4942_s27 }
  0x94   :  { %v5473_v28 = vpop.permute.xlu2 %437  ;;  %v5475_v0 = vpop.permute.xlu1 %417 }
  0x95   :  { %9852 = vst [vmem:[#allocation44_spill] sm:$0xff] %v5473_v28  ;;  %v5477_v45 = vpop.permute.xlu0 %415 }
  0x96   :  { %9853 = vst [vmem:[#allocation45_spill] sm:$0xff] %v5475_v0 }
  0x97   :  { %9854 = vst [vmem:[#allocation46_spill] sm:$0xff] %v5477_v45 }
  0x9a   :  { %587 = vrot.lane.b32.xlu2 %v5482_v27, %s4942_s27  ;;  %585 = vrot.lane.b32.xlu1 %v5487_v16, %s4942_s27 }
  0x9b   :  { %583 = vrot.lane.b32.xlu0 %v5492_v33, %s4942_s27 }
  0x9c   :  { %v5500_v0 = vpop.permute.xlu2 %443  ;;  %v5502_v28 = vpop.permute.xlu1 %423 }
  0x9d   :  { %9855 = vst [vmem:[#allocation47_spill] sm:$0xff] %v5500_v0  ;;  %v5504_v45 = vpop.permute.xlu0 %421 }
  0x9e   :  { %9856 = vst [vmem:[#allocation48_spill] sm:$0xff] %v5502_v28 }
  0x9f   :  { %9857 = vst [vmem:[#allocation49_spill] sm:$0xff] %v5504_v45  ;;  %v5536_v45 = vld [vmem:[%s9702_s0 + $0x7c] sm:$0xff]  }
  0xa2   :  { %593 = vrot.lane.b32.xlu2 %v5509_v36, %s4942_s27  ;;  %591 = vrot.lane.b32.xlu1 %v5514_v43, %s4942_s27 }
  0xa3   :  { %589 = vrot.lane.b32.xlu0 %v5519_v17, %s4942_s27 }
  0xa4   :  { %v5527_v0 = vpop.permute.xlu2 %499  ;;  %v5529_v28 = vpop.permute.xlu1 %429 }
  0xa5   :  { %9858 = vst [vmem:[#allocation50_spill] sm:$0xff] %v5527_v0  ;;  %v5531_v48 = vpop.permute.xlu0 %427 }
  0xa6   :  { %9859 = vst [vmem:[#allocation51_spill] sm:$0xff] %v5529_v28 }
  0xa7   :  { %9860 = vst [vmem:[#allocation52_spill] sm:$0xff] %v5531_v48 }
  0xaa   :  { %599 = vrot.lane.b32.xlu2 %v5536_v45, %s4942_s27  ;;  %597 = vrot.lane.b32.xlu1 %v5541_v1, %s4942_s27 }
  0xab   :  { %595 = vrot.lane.b32.xlu0 %v5546_v13, %s4942_s27 }
  0xac   :  { %v5554_v28 = vpop.permute.xlu2 %505  ;;  %v5556_v48 = vpop.permute.xlu1 %435 }
  0xad   :  { %9861 = vst [vmem:[#allocation53_spill] sm:$0xff] %v5554_v28  ;;  %v5558_v0 = vpop.permute.xlu0 %433 }
  0xae   :  { %9862 = vst [vmem:[#allocation54_spill] sm:$0xff] %v5556_v48 }
  0xaf   :  { %9863 = vst [vmem:[#allocation55_spill] sm:$0xff] %v5558_v0 }
  0xb2   :  { %605 = vrot.lane.b32.xlu2 %v5563_v51, %s4942_s27  ;;  %603 = vrot.lane.b32.xlu1 %v5568_v40, %s4942_s27 }
  0xb3   :  { %601 = vrot.lane.b32.xlu0 %v5573_v29, %s4942_s27 }
  0xb4   :  { %v5581_v48 = vpop.permute.xlu2 %511  ;;  %v5583_v0 = vpop.permute.xlu1 %441 }
  0xb5   :  { %9864 = vst [vmem:[#allocation56_spill] sm:$0xff] %v5581_v48  ;;  %v5585_v28 = vpop.permute.xlu0 %439  ;;  %v4352_v48 = vunpack.c.h.b16 %v5211_v24 }
  0xb6   :  { %9865 = vst [vmem:[#allocation57_spill] sm:$0xff] %v5583_v0  ;;  %v638_v0 = vshll.u32 %v5428_v56, 16 }
  0xb7   :  { %9866 = vst [vmem:[#allocation58_spill] sm:$0xff] %v5585_v28  ;;  %v630_v28 = vshll.u32 %v5433_v9, 16  ;;  %v5619_v35 = vpack.c.b16 %v5213_v25, %v4352_v48  ;;  %v623_v25 = vshrl.u32 %v5438_v10, 16 }
  0xb8   :  { %v640_v32 = vrot.slane %v638_v0, 1  ;;  %v627_v0 = vrot.slane %v625_v39, 1 }
  0xba   :  { %611 = vrot.lane.b32.xlu2 %v5590_v53, %s4942_s27  ;;  %609 = vrot.lane.b32.xlu1 %v5595_v8, %s4942_s27  ;;  %v644_v48 = vor.u32 %v642_v15, %v640_v32  ;;  %v628_v39 = vor.u32 %v627_v0, %v623_v25  ;;  %v686_v25 = vshll.u32 %v5482_v27, 16  ;;  %v672_v0 = vrot.slane %v670_v22, 1 }
  0xbb   :  { %607 = vrot.lane.b32.xlu0 %v5600_v6, %s4942_s27 }
  0xbc   :  { %v5611_v2 = vpop.permute.xlu2 %517  ;;  %v5613_v44 = vpop.permute.xlu1 %497  ;;  %v649_v14 = vsel %vm200_vm0, %v644_v48, %v648_v7 }
  0xbd   :  { %9867 = vst [vmem:[#allocation59_spill] sm:$0xff] %v5611_v2  ;;  %v5616_v37 = vpop.permute.xlu0 %495  ;;  %v632_v2 = vrot.slane %v630_v28, 1  ;;  %v662_v28 = vshll.u32 %v5455_v38, 16 }
  0xbe   :  { %9868 = vst [vmem:[#allocation60_spill] sm:$0xff] %v5613_v44  ;;  %v634_v44 = vshrl.u32 %v5433_v9, 16 }
  0xbf   :  { %9869 = vst [vmem:[#allocation61_spill] sm:$0xff] %v5616_v37  ;;  %v5632_v37 = vld [vmem:[%s9702_s0 + $0xb4] sm:$0xff]   ;;  %v664_v11 = vrot.slane %v662_v28, 1  ;;  %v633_v4 = vsel %vm200_vm0, %v628_v39, %v632_v2 }
  0xc0   :  { %v636_v61 = vor.u32 %v634_v44, %v632_v2  ;;  %v666_v44 = vshrl.u32 %v5455_v38, 16 }
  0xc1   :  { %v665_v22 = vsel %vm200_vm0, %v660_v60, %v664_v11 }
  0xc2   :  { %617 = vrot.lane.b32.xlu2 %v5624_v18, %s4942_s27  ;;  %615 = vrot.lane.b32.xlu1 %v5619_v35, %s4942_s27  ;;  %v641_v15 = vsel %vm200_vm0, %v636_v61, %v640_v32  ;;  %v678_v61 = vshll.u32 %v5487_v16, 16  ;;  %v668_v32 = vor.u32 %v666_v44, %v664_v11  ;;  %v674_v44 = vshrl.u32 %v5492_v33, 16 }
  0xc3   :  { %613 = vrot.lane.b32.xlu0 %v5632_v37, %s4942_s27 }
  0xc4   :  { %v5643_v58 = vpop.permute.xlu2 %523  ;;  %v5645_v52 = vpop.permute.xlu1 %503 }
  0xc5   :  { %9870 = vst [vmem:[#allocation62_spill] sm:$0xff] %v5643_v58  ;;  %v5647_v50 = vpop.permute.xlu0 %501  ;;  %v650_v58 = vshrl.u32 %v5465_v3, 16 }
  0xc6   :  { %9871 = vst [vmem:[#allocation63_spill] sm:$0xff] %v5645_v52  ;;  %v688_v52 = vrot.slane %v686_v25, 1 }
  0xc7   :  { %9872 = vst [vmem:[#allocation64_spill] sm:$0xff] %v5647_v50  ;;  %v652_v2 = vor.u32 %v650_v58, %v648_v7  ;;  %v690_v50 = vshrl.u32 %v5482_v27, 16 }
  0xc9   :  { %v657_v59 = vsel %vm200_vm0, %v652_v2, %v656_v21  ;;  %v692_v58 = vor.u32 %v690_v50, %v688_v52  ;;  %v676_v21 = vor.u32 %v674_v44, %v672_v0 }
  0xca   :  { %822 = vrot.lane.b32.xlu2 %v649_v14, %s4943_s23  ;;  %820 = vrot.lane.b32.xlu1 %v641_v15, %s4943_s23  ;;  %v694_v14 = vshll.u32 %v5519_v17, 16  ;;  %v680_v15 = vrot.slane %v678_v61, 1  ;;  %v702_v61 = vshll.u32 %v5514_v43, 16 }
  0xcb   :  { %818 = vrot.lane.b32.xlu0 %v633_v4, %s4943_s23  ;;  %v673_v4 = vsel %vm200_vm0, %v668_v32, %v672_v0  ;;  %v734_v0 = vshll.u32 %v5536_v45, 16 }
  0xcc   :  { %v5661_v48 = vpop.permute.xlu2 %529  ;;  %v5663_v28 = vpop.permute.xlu1 %509  ;;  %v696_v7 = vrot.slane %v694_v14, 1  ;;  %v684_v25 = vor.u32 %v682_v55, %v680_v15  ;;  %v714_v55 = vshrl.u32 %v5509_v36, 16  ;;  %v718_v14 = vshll.u32 %v5546_v13, 16 }
  0xcd   :  { %9873 = vst [vmem:[#allocation65_spill] sm:$0xff] %v5661_v48  ;;  %v5665_v39 = vpop.permute.xlu0 %507  ;;  %v681_v48 = vsel %vm200_vm0, %v676_v21, %v680_v15 }
  0xce   :  { %9874 = vst [vmem:[#allocation66_spill] sm:$0xff] %v5663_v28  ;;  %v710_v28 = vshll.u32 %v5509_v36, 16  ;;  %v697_v2 = vsel %vm200_vm0, %v692_v58, %v696_v7  ;;  %v720_v44 = vrot.slane %v718_v14, 1 }
  0xcf   :  { %9875 = vst [vmem:[#allocation67_spill] sm:$0xff] %v5665_v39  ;;  %v730_v39 = vshrl.u32 %v5541_v1, 16 }
  0xd0   :  { %v712_v50 = vrot.slane %v710_v28, 1 }
  0xd2   :  { %828 = vrot.lane.b32.xlu2 %v673_v4, %s4943_s23  ;;  %826 = vrot.lane.b32.xlu1 %v665_v22, %s4943_s23  ;;  %v689_v4 = vsel %vm200_vm0, %v684_v25, %v688_v52  ;;  %v704_v22 = vrot.slane %v702_v61, 1  ;;  %v726_v52 = vshll.u32 %v5541_v1, 16  ;;  %v716_v28 = vor.u32 %v714_v55, %v712_v50 }
  0xd3   :  { %824 = vrot.lane.b32.xlu0 %v657_v59, %s4943_s23  ;;  %v706_v59 = vshrl.u32 %v5514_v43, 16 }
  0xd4   :  { %v5679_v32 = vpop.permute.xlu2 %535  ;;  %v5681_v11 = vpop.permute.xlu1 %515 }
  0xd5   :  { %9876 = vst [vmem:[#allocation68_spill] sm:$0xff] %v5679_v32  ;;  %v5683_v60 = vpop.permute.xlu0 %513  ;;  %v698_v32 = vshrl.u32 %v5519_v17, 16  ;;  %v708_v58 = vor.u32 %v706_v59, %v704_v22  ;;  %v722_v59 = vshrl.u32 %v5546_v13, 16 }
  0xd6   :  { %9877 = vst [vmem:[#allocation69_spill] sm:$0xff] %v5681_v11  ;;  %v736_v11 = vrot.slane %v734_v0, 1 }
  0xd7   :  { %9878 = vst [vmem:[#allocation70_spill] sm:$0xff] %v5683_v60  ;;  %v700_v15 = vor.u32 %v698_v32, %v696_v7  ;;  %v738_v60 = vshrl.u32 %v5536_v45, 16  ;;  %v713_v55 = vsel %vm200_vm0, %v708_v58, %v712_v50 }
  0xd9   :  { %v705_v14 = vsel %vm200_vm0, %v700_v15, %v704_v22  ;;  %v740_v7 = vor.u32 %v738_v60, %v736_v11  ;;  %v724_v22 = vor.u32 %v722_v59, %v720_v44 }
  0xda   :  { %834 = vrot.lane.b32.xlu2 %v697_v2, %s4943_s23  ;;  %832 = vrot.lane.b32.xlu1 %v689_v4, %s4943_s23  ;;  %v742_v2 = vshll.u32 %v5573_v29, 16  ;;  %v728_v4 = vrot.slane %v726_v52, 1  ;;  %v750_v52 = vshll.u32 %v5568_v40, 16 }
  0xdb   :  { %830 = vrot.lane.b32.xlu0 %v681_v48, %s4943_s23  ;;  %v721_v48 = vsel %vm200_vm0, %v716_v28, %v720_v44  ;;  %v782_v44 = vshll.u32 %v5590_v53, 16 }
  0xdc   :  { %v5697_v25 = vpop.permute.xlu2 %541  ;;  %v5699_v61 = vpop.permute.xlu1 %521  ;;  %v744_v32 = vrot.slane %v742_v2, 1  ;;  %v732_v0 = vor.u32 %v730_v39, %v728_v4  ;;  %v762_v39 = vshrl.u32 %v5563_v51, 16  ;;  %v766_v2 = vshll.u32 %v5600_v6, 16 }
  0xdd   :  { %9879 = vst [vmem:[#allocation71_spill] sm:$0xff] %v5697_v25  ;;  %v5701_v21 = vpop.permute.xlu0 %519  ;;  %v758_v25 = vshll.u32 %v5563_v51, 16 }
  0xde   :  { %9880 = vst [vmem:[#allocation72_spill] sm:$0xff] %v5699_v61  ;;  %v745_v15 = vsel %vm200_vm0, %v740_v7, %v744_v32  ;;  %v729_v61 = vsel %vm200_vm0, %v724_v22, %v728_v4  ;;  %v768_v59 = vrot.slane %v766_v2, 1  ;;  %v5740_v22 = vld [vmem:[%s9702_s0 + $0xc8] sm:$0xff]   ;;  %v778_v2 = vshrl.u32 %v5595_v8, 16 }
  0xdf   :  { %9881 = vst [vmem:[#allocation73_spill] sm:$0xff] %v5701_v21  ;;  %v760_v60 = vrot.slane %v758_v25, 1 }
  0xe1   :  { %v764_v25 = vor.u32 %v762_v39, %v760_v60 }
  0xe2   :  { %840 = vrot.lane.b32.xlu2 %v721_v48, %s4943_s23  ;;  %838 = vrot.lane.b32.xlu1 %v713_v55, %s4943_s23  ;;  %v737_v48 = vsel %vm200_vm0, %v732_v0, %v736_v11  ;;  %v752_v55 = vrot.slane %v750_v52, 1  ;;  %v774_v11 = vshll.u32 %v5595_v8, 16 }
  0xe3   :  { %836 = vrot.lane.b32.xlu0 %v705_v14, %s4943_s23  ;;  %v754_v14 = vshrl.u32 %v5568_v40, 16 }
  0xe4   :  { %v5715_v28 = vpop.permute.xlu2 %575  ;;  %v5717_v50 = vpop.permute.xlu1 %527  ;;  %v776_v39 = vrot.slane %v774_v11, 1  ;;  %v806_v11 = vshll.u32 %v5624_v18, 16 }
  0xe5   :  { %9882 = vst [vmem:[#allocation74_spill] sm:$0xff] %v5715_v28  ;;  %v5719_v58 = vpop.permute.xlu0 %525  ;;  %v746_v28 = vshrl.u32 %v5573_v29, 16  ;;  %v756_v7 = vor.u32 %v754_v14, %v752_v55  ;;  %v769_v14 = vsel %vm200_vm0, %v764_v25, %v768_v59 }
  0xe6   :  { %9883 = vst [vmem:[#allocation75_spill] sm:$0xff] %v5717_v50  ;;  %v786_v50 = vshrl.u32 %v5590_v53, 16 }
  0xe7   :  { %9884 = vst [vmem:[#allocation76_spill] sm:$0xff] %v5719_v58  ;;  %v748_v4 = vor.u32 %v746_v28, %v744_v32  ;;  %v4360_v32 = vunpack.c.h.b16 %v5740_v22  ;;  %v780_v58 = vor.u32 %v778_v2, %v776_v39  ;;  %v810_v2 = vshrl.u32 %v5624_v18, 16 }
  0xe9   :  { %v753_v28 = vsel %vm200_vm0, %v748_v4, %v752_v55  ;;  %v5756_v25 = vpack.c.b16 %v4360_v32, %v4360_v32 }
  0xea   :  { %846 = vrot.lane.b32.xlu2 %v745_v15, %s4943_s23  ;;  %844 = vrot.lane.b32.xlu1 %v737_v48, %s4943_s23  ;;  %v784_v48 = vrot.slane %v782_v44, 1 }
  0xeb   :  { %842 = vrot.lane.b32.xlu0 %v729_v61, %s4943_s23  ;;  %v790_v61 = vshll.u32 %v5632_v37, 16 }
  0xec   :  { %v5733_v0 = vpop.permute.xlu2 %581  ;;  %v5735_v52 = vpop.permute.xlu1 %533  ;;  %v788_v44 = vor.u32 %v786_v50, %v784_v48  ;;  %v785_v50 = vsel %vm200_vm0, %v780_v58, %v784_v48 }
  0xed   :  { %9885 = vst [vmem:[#allocation77_spill] sm:$0xff] %v5733_v0  ;;  %v5742_v15 = vpop.permute.xlu0 %531  ;;  %v770_v0 = vshrl.u32 %v5600_v6, 16 }
  0xee   :  { %9886 = vst [vmem:[#allocation78_spill] sm:$0xff] %v5735_v52  ;;  %v761_v52 = vsel %vm200_vm0, %v756_v7, %v760_v60  ;;  %v798_v60 = vshll.u32 %v5619_v35, 16 }
  0xef   :  { %9887 = vst [vmem:[#allocation79_spill] sm:$0xff] %v5742_v15  ;;  %v792_v15 = vrot.slane %v790_v61, 1  ;;  %v772_v4 = vor.u32 %v770_v0, %v768_v59  ;;  %v808_v61 = vrot.slane %v806_v11, 1 }
  0xf0   :  { %v800_v32 = vrot.slane %v798_v60, 1 }
  0xf1   :  { %v777_v46 = vsel %vm200_vm0, %v772_v4, %v776_v39  ;;  %v812_v59 = vor.u32 %v810_v2, %v808_v61 }
  0xf2   :  { %852 = vrot.lane.b32.xlu2 %v769_v14, %s4943_s23  ;;  %850 = vrot.lane.b32.xlu1 %v761_v52, %s4943_s23  ;;  %v793_v52 = vsel %vm200_vm0, %v788_v44, %v792_v15  ;;  %v814_v14 = vshll.u32 %v5756_v25, 16 }
  0xf3   :  { %848 = vrot.lane.b32.xlu0 %v753_v28, %s4943_s23  ;;  %v802_v28 = vshrl.u32 %v5619_v35, 16 }
  0xf4   :  { %v5759_v7 = vpop.permute.xlu2 %587  ;;  %v5761_v55 = vpop.permute.xlu1 %539  ;;  %v816_v58 = vrot.slane %v814_v14, 1 }
  0xf5   :  { %9888 = vst [vmem:[#allocation80_spill] sm:$0xff] %v5759_v7  ;;  %v5763_v21 = vpop.permute.xlu0 %537  ;;  %v794_v7 = vshrl.u32 %v5632_v37, 16  ;;  %v804_v0 = vor.u32 %v802_v28, %v800_v32 }
  0xf6   :  { %9889 = vst [vmem:[#allocation81_spill] sm:$0xff] %v5761_v55  ;;  %v817_v39 = vsel %vm200_vm0, %v812_v59, %v816_v58  ;;  %v4862_v55 = vld [vmem:[%s9702_s0 + $0x78] sm:$0xff]  }
  0xf7   :  { %9890 = vst [vmem:[#allocation82_spill] sm:$0xff] %v5763_v21  ;;  %v796_v11 = vor.u32 %v794_v7, %v792_v15  ;;  %v809_v4 = vsel %vm200_vm0, %v804_v0, %v808_v61  ;;  %v867_v15 = vrot.slane %v5433_v9, 1  ;;  %v866_v61 = vrot.slane %v5438_v10, 1 }
  0xf8   :  { %v877_v9 = vrot.slane %v5492_v33, 1  ;;  %v873_v10 = vrot.slane %v5460_v57, 1  ;;  %v881_v33 = vrot.slane %v5482_v27, 1  ;;  %v879_v57 = vrot.slane %v5487_v16, 1 }
  0xf9   :  { %v868_v59 = vsel %vm445_vm1, %v866_v61, %v867_v15  ;;  %v889_v16 = vrot.slane %v5546_v13, 1  ;;  %v885_v27 = vrot.slane %v5514_v43, 1  ;;  %v895_v13 = vrot.slane %v5573_v29, 1 }
  0xfa   :  { %858 = vrot.lane.b32.xlu2 %v793_v52, %s4943_s23  ;;  %856 = vrot.lane.b32.xlu1 %v785_v50, %s4943_s23  ;;  %v801_v52 = vsel %vm200_vm0, %v796_v11, %v800_v32  ;;  %v871_v50 = vrot.slane %v5465_v3, 1  ;;  %v882_v61 = vsel %vm445_vm1, %v879_v57, %v881_v33  ;;  %v891_v43 = vrot.slane %v5541_v1, 1 }
  0xfb   :  { %854 = vrot.lane.b32.xlu0 %v777_v46, %s4943_s23  ;;  %v869_v46 = vrot.slane %v5428_v56, 1  ;;  %v875_v56 = vrot.slane %v5455_v38, 1  ;;  %v883_v38 = vrot.slane %v5519_v17, 1  ;;  %v887_v17 = vrot.slane %v5509_v36, 1 }
  0xfc   :  { %v5775_v48 = vpop.permute.xlu2 %593  ;;  %v5777_v44 = vpop.permute.xlu1 %573  ;;  %v893_v36 = vrot.slane %v5536_v45, 1  ;;  %v899_v45 = vrot.slane %v5563_v51, 1  ;;  %v901_v1 = vrot.slane %v5600_v6, 1  ;;  %v897_v29 = vrot.slane %v5568_v40, 1 }
  0xfd   :  { %9891 = vst [vmem:[#allocation83_spill] sm:$0xff] %v5775_v48  ;;  %v5779_v60 = vpop.permute.xlu0 %571  ;;  %v872_v32 = vsel %vm445_vm1, %v869_v46, %v871_v50  ;;  %v870_v28 = vsel %vm445_vm1, %v867_v15, %v869_v46  ;;  %v878_v11 = vsel %vm445_vm1, %v875_v56, %v877_v9  ;;  %v905_v6 = vrot.slane %v5590_v53, 1 }
  0xfe   :  { %v907_v40 = vrot.slane %v5632_v37, 1  ;;  %v903_v51 = vrot.slane %v5595_v8, 1  ;;  %v911_v37 = vrot.slane %v5624_v18, 1  ;;  %v913_v8 = vrot.slane %v5756_v25, 1 }
  0xff   :  { %v909_v53 = vrot.slane %v5619_v35, 1 }
 0x102   :  { %864 = vrot.lane.b32.xlu2 %v817_v39, %s4943_s23  ;;  %862 = vrot.lane.b32.xlu1 %v809_v4, %s4943_s23  ;;  %v876_v39 = vsel %vm445_vm1, %v873_v10, %v875_v56  ;;  %v874_v4 = vsel %vm445_vm1, %v871_v50, %v873_v10  ;;  %v884_v50 = vsel %vm445_vm1, %v881_v33, %v883_v38 }
 0x103   :  { %860 = vrot.lane.b32.xlu0 %v801_v52, %s4943_s23  ;;  %v888_v10 = vsel %vm445_vm1, %v885_v27, %v887_v17 }
 0x104   :  { %v5790_v7 = vpop.permute.xlu2 %599  ;;  %v5792_v2 = vpop.permute.xlu1 %579 }
 0x105   :  { %9892 = vst [vmem:[#allocation84_spill] sm:$0xff] %v5790_v7  ;;  %v5795_v14 = vpop.permute.xlu0 %577 }
 0x106   :  { %9893 = vst [vmem:[#allocation85_spill] sm:$0xff] %v5792_v2 }
 0x107   :  { %9894 = vst [vmem:[#allocation86_spill] sm:$0xff] %v5795_v14 }
 0x10a   :  { %919 = vrot.lane.b32.xlu2 %v872_v32, %s4944_s26  ;;  %917 = vrot.lane.b32.xlu1 %v870_v28, %s4944_s26  ;;  %v880_v32 = vsel %vm445_vm1, %v877_v9, %v879_v57  ;;  %v890_v9 = vsel %vm445_vm1, %v887_v17, %v889_v16  ;;  %v894_v57 = vsel %vm445_vm1, %v891_v43, %v893_v36 }
 0x10b   :  { %915 = vrot.lane.b32.xlu0 %v868_v59, %s4944_s26 }
 0x10c   :  { %v5806_v3 = vpop.permute.xlu2 %605  ;;  %v5808_v58 = vpop.permute.xlu1 %585 }
 0x10d   :  { %9895 = vst [vmem:[#allocation87_spill] sm:$0xff] %v5806_v3  ;;  %v5810_v0 = vpop.permute.xlu0 %583 }
 0x10e   :  { %9896 = vst [vmem:[#allocation88_spill] sm:$0xff] %v5808_v58 }
 0x10f   :  { %9897 = vst [vmem:[#allocation89_spill] sm:$0xff] %v5810_v0 }
 0x112   :  { %925 = vrot.lane.b32.xlu2 %v878_v11, %s4944_s26  ;;  %923 = vrot.lane.b32.xlu1 %v876_v39, %s4944_s26  ;;  %v886_v11 = vsel %vm445_vm1, %v883_v38, %v885_v27  ;;  %v896_v38 = vsel %vm445_vm1, %v893_v36, %v895_v13  ;;  %v900_v27 = vsel %vm445_vm1, %v897_v29, %v899_v45 }
 0x113   :  { %921 = vrot.lane.b32.xlu0 %v874_v4, %s4944_s26 }
 0x114   :  { %v5821_v52 = vpop.permute.xlu2 %611  ;;  %v5823_v46 = vpop.permute.xlu1 %591 }
 0x115   :  { %9898 = vst [vmem:[#allocation90_spill] sm:$0xff] %v5821_v52  ;;  %v5825_v15 = vpop.permute.xlu0 %589 }
 0x116   :  { %9899 = vst [vmem:[#allocation91_spill] sm:$0xff] %v5823_v46 }
 0x117   :  { %9900 = vst [vmem:[#allocation92_spill] sm:$0xff] %v5825_v15 }
 0x11a   :  { %931 = vrot.lane.b32.xlu2 %v884_v50, %s4944_s26  ;;  %929 = vrot.lane.b32.xlu1 %v882_v61, %s4944_s26  ;;  %v892_v50 = vsel %vm445_vm1, %v889_v16, %v891_v43  ;;  %v902_v16 = vsel %vm445_vm1, %v899_v45, %v901_v1  ;;  %v906_v43 = vsel %vm445_vm1, %v903_v51, %v905_v6 }
 0x11b   :  { %927 = vrot.lane.b32.xlu0 %v880_v32, %s4944_s26 }
 0x11c   :  { %v5836_v28 = vpop.permute.xlu2 %617  ;;  %v5838_v59 = vpop.permute.xlu1 %597 }
 0x11d   :  { %9901 = vst [vmem:[#allocation93_spill] sm:$0xff] %v5836_v28  ;;  %v5840_v56 = vpop.permute.xlu0 %595  ;;  %v4860_v28 = vld [vmem:[%s9702_s0 + $0x88] sm:$0xff]  }
 0x11e   :  { %9902 = vst [vmem:[#allocation94_spill] sm:$0xff] %v5838_v59 }
 0x122   :  { %937 = vrot.lane.b32.xlu2 %v890_v9, %s4944_s26  ;;  %935 = vrot.lane.b32.xlu1 %v888_v10, %s4944_s26  ;;  %v898_v9 = vsel %vm445_vm1, %v895_v13, %v897_v29  ;;  %v908_v13 = vsel %vm445_vm1, %v905_v6, %v907_v40  ;;  %v912_v29 = vsel %vm445_vm1, %v909_v53, %v911_v37  ;;  %v5925_v6 = vld [vmem:[%s9702_s0 + $0x18] sm:$0xff]  }
 0x123   :  { %933 = vrot.lane.b32.xlu0 %v886_v11, %s4944_s26 }
 0x124   :  { %v5851_v39 = vpop.permute.xlu2 %822  ;;  %v5853_v4 = vpop.permute.xlu1 %603 }
 0x125   :  { %9903 = vst [vmem:[#allocation95_spill] sm:$0xff] %v5853_v4  ;;  %v5855_v33 = vpop.permute.xlu0 %601 }
 0x126   :  { %9904 = vst [vmem:[#allocation96_spill] sm:$0xff] %v5855_v33 }
 0x12a   :  { %943 = vrot.lane.b32.xlu2 %v896_v38, %s4944_s26  ;;  %941 = vrot.lane.b32.xlu1 %v894_v57, %s4944_s26  ;;  %v904_v38 = vsel %vm445_vm1, %v901_v1, %v903_v51  ;;  %v914_v1 = vsel %vm445_vm1, %v911_v37, %v913_v8  ;;  %v4853_v37 = vld [vmem:[%s9702_s0 + $0x30] sm:$0xff]  }
 0x12b   :  { %939 = vrot.lane.b32.xlu0 %v892_v50, %s4944_s26 }
 0x12c   :  { %v5866_v61 = vpop.permute.xlu2 %828  ;;  %v5868_v32 = vpop.permute.xlu1 %609 }
 0x12d   :  { %9905 = vst [vmem:[#allocation97_spill] sm:$0xff] %v5866_v61  ;;  %v5870_v17 = vpop.permute.xlu0 %607 }
 0x12e   :  { %9906 = vst [vmem:[#allocation98_spill] sm:$0xff] %v5868_v32  ;;  %v1030_v32 = vshll.u32 %v5740_v22, 16 }
 0x12f   :  { %9907 = vst [vmem:[#allocation99_spill] sm:$0xff] %v5870_v17 }
 0x132   :  { %949 = vrot.lane.b32.xlu2 %v902_v16, %s4944_s26  ;;  %947 = vrot.lane.b32.xlu1 %v900_v27, %s4944_s26  ;;  %v910_v16 = vsel %vm445_vm1, %v907_v40, %v909_v53  ;;  %v4848_v27 = vld [vmem:[%s9702_s0 + $0x28] sm:$0xff]  }
 0x133   :  { %945 = vrot.lane.b32.xlu0 %v898_v9, %s4944_s26  ;;  %v4849_v9 = vld [vmem:[%s9702_s0 + $0x20] sm:$0xff]  }
 0x134   :  { %v5881_v10 = vpop.permute.xlu2 %834  ;;  %v5883_v11 = vpop.permute.xlu1 %615 }
 0x135   :  { %9908 = vst [vmem:[#allocation100_spill] sm:$0xff] %v5881_v10  ;;  %v5885_v36 = vpop.permute.xlu0 %613  ;;  %v1032_v10 = vrot.slane %v1030_v32, 1 }
 0x136   :  { %9909 = vst [vmem:[#allocation101_spill] sm:$0xff] %v5883_v11  ;;  %v4861_v11 = vld [vmem:[%s9702_s0 + $0x80] sm:$0xff]  }
 0x137   :  { %9910 = vst [vmem:[#allocation102_spill] sm:$0xff] %v5885_v36 }
 0x13a   :  { %955 = vrot.lane.b32.xlu2 %v908_v13, %s4944_s26  ;;  %953 = vrot.lane.b32.xlu1 %v906_v43, %s4944_s26  ;;  %v4851_v43 = vld [vmem:[%s9702_s0 + $0x40] sm:$0xff]  }
 0x13b   :  { %951 = vrot.lane.b32.xlu0 %v904_v38, %s4944_s26  ;;  %v4852_v38 = vld [vmem:[%s9702_s0 + $0x38] sm:$0xff]  }
 0x13c   :  { %v5896_v57 = vpop.permute.xlu2 %840  ;;  %v5898_v50 = vpop.permute.xlu1 %820 }
 0x13d   :  { %9911 = vst [vmem:[#allocation103_spill] sm:$0xff] %v5896_v57  ;;  %v5900_v45 = vpop.permute.xlu0 %818 }
 0x142   :  { %961 = vrot.lane.b32.xlu2 %v914_v1, %s4944_s26  ;;  %959 = vrot.lane.b32.xlu1 %v912_v29, %s4944_s26  ;;  %v4854_v29 = vld [vmem:[%s9702_s0 + $0x58] sm:$0xff]  }
 0x143   :  { %957 = vrot.lane.b32.xlu0 %v910_v16, %s4944_s26  ;;  %v4855_v16 = vld [vmem:[%s9702_s0 + $0x50] sm:$0xff]  }
 0x144   :  { %v5908_v18 = vpop.permute.xlu2 %846  ;;  %v5910_v35 = vpop.permute.xlu1 %826 }
 0x145   :  { %9912 = vst [vmem:[#allocation104_spill] sm:$0xff] %v5908_v18  ;;  %v5912_v25 = vpop.permute.xlu0 %824 }
 0x146   :  { %9913 = vst [vmem:[#allocation105_spill] sm:$0xff] %v5910_v35 }
 0x147   :  { %9914 = vst [vmem:[#allocation106_spill] sm:$0xff] %v5912_v25 }
 0x14a   :  { %974 = vrot.lane.b32.xlu2 %v4848_v27, %s4945_s30  ;;  %972 = vrot.lane.b32.xlu1 %v4849_v9, %s4945_s30  ;;  %v4856_v27 = vld [vmem:[%s9702_s0 + $0x48] sm:$0xff]  }
 0x14b   :  { %970 = vrot.lane.b32.xlu0 %v5925_v6, %s4945_s30 }
 0x14c   :  { %v5929_v40 = vpop.permute.xlu2 %852  ;;  %v5931_v51 = vpop.permute.xlu1 %832 }
 0x14d   :  { %9915 = vst [vmem:[#allocation107_spill] sm:$0xff] %v5929_v40  ;;  %v5933_v13 = vpop.permute.xlu0 %830 }
 0x14e   :  { %9916 = vst [vmem:[#allocation108_spill] sm:$0xff] %v5931_v51 }
 0x14f   :  { %9917 = vst [vmem:[#allocation109_spill] sm:$0xff] %v5933_v13 }
 0x152   :  { %980 = vrot.lane.b32.xlu2 %v4851_v43, %s4945_s30  ;;  %978 = vrot.lane.b32.xlu1 %v4852_v38, %s4945_s30 }
 0x153   :  { %976 = vrot.lane.b32.xlu0 %v4853_v37, %s4945_s30  ;;  %v4857_v37 = vld [vmem:[%s9702_s0 + $0x70] sm:$0xff]  }
 0x154   :  { %v5947_v8 = vpop.permute.xlu2 %858  ;;  %v5949_v53 = vpop.permute.xlu1 %838 }
 0x155   :  { %9918 = vst [vmem:[#allocation110_spill] sm:$0xff] %v5947_v8  ;;  %v5951_v1 = vpop.permute.xlu0 %836 }
 0x156   :  { %9919 = vst [vmem:[#allocation111_spill] sm:$0xff] %v5949_v53 }
 0x157   :  { %9920 = vst [vmem:[#allocation112_spill] sm:$0xff] %v5951_v1 }
 0x15a   :  { %986 = vrot.lane.b32.xlu2 %v4854_v29, %s4945_s30  ;;  %984 = vrot.lane.b32.xlu1 %v4855_v16, %s4945_s30  ;;  %v5978_v29 = vld [vmem:[%s9702_s0 + $0x68] sm:$0xff]   ;;  %v5985_v16 = vld [vmem:[%s9702_s0 + $0x60] sm:$0xff]  }
 0x15b   :  { %982 = vrot.lane.b32.xlu0 %v4856_v27, %s4945_s30 }
 0x15c   :  { %v5965_v9 = vpop.permute.xlu2 %864  ;;  %v5967_v43 = vpop.permute.xlu1 %844 }
 0x15d   :  { %9921 = vst [vmem:[#allocation113_spill] sm:$0xff] %v5965_v9  ;;  %v5969_v38 = vpop.permute.xlu0 %842 }
 0x15e   :  { %9922 = vst [vmem:[#allocation114_spill] sm:$0xff] %v5967_v43 }
 0x162   :  { %992 = vrot.lane.b32.xlu2 %v4857_v37, %s4945_s30  ;;  %990 = vrot.lane.b32.xlu1 %v5978_v29, %s4945_s30 }
 0x163   :  { %988 = vrot.lane.b32.xlu0 %v5985_v16, %s4945_s30 }
 0x164   :  { %v5989_v27 = vpop.permute.xlu2 %919  ;;  %v5991_v9 = vpop.permute.xlu1 %850 }
 0x165   :  { %9923 = vst [vmem:[#allocation115_spill] sm:$0xff] %v5991_v9  ;;  %v5993_v37 = vpop.permute.xlu0 %848 }
 0x166   :  { %9924 = vst [vmem:[#allocation116_spill] sm:$0xff] %v5993_v37  ;;  %v6331_v37 = vld [vmem:[%s9702_s0 + $0x11c] sm:$0xff]  }
 0x167   :  { %v2147_v18 = vshrl.u32 %v6331_v37, 16 }
 0x16a   :  { %998 = vrot.lane.b32.xlu2 %v4860_v28, %s4945_s30  ;;  %996 = vrot.lane.b32.xlu1 %v4861_v11, %s4945_s30  ;;  %v4863_v28 = vld [vmem:[%s9702_s0 + $0xa0] sm:$0xff]   ;;  %v4864_v11 = vld [vmem:[%s9702_s0 + $0x98] sm:$0xff]  }
 0x16b   :  { %994 = vrot.lane.b32.xlu0 %v4862_v55, %s4945_s30  ;;  %v4865_v55 = vld [vmem:[%s9702_s0 + $0x90] sm:$0xff]  }
 0x16c   :  { %v6007_v57 = vpop.permute.xlu2 %925  ;;  %v6009_v36 = vpop.permute.xlu1 %856 }
 0x16d   :  { %9925 = vst [vmem:[#allocation117_spill] sm:$0xff] %v6007_v57  ;;  %v6011_v48 = vpop.permute.xlu0 %854 }
 0x16e   :  { %9926 = vst [vmem:[#allocation118_spill] sm:$0xff] %v6009_v36 }
 0x16f   :  { %9927 = vst [vmem:[#allocation119_spill] sm:$0xff] %v6011_v48 }
 0x172   :  { %1004 = vrot.lane.b32.xlu2 %v4863_v28, %s4945_s30  ;;  %1002 = vrot.lane.b32.xlu1 %v4864_v11, %s4945_s30  ;;  %v4866_v28 = vld [vmem:[%s9702_s0 + $0xa8] sm:$0xff]  }
 0x173   :  { %1000 = vrot.lane.b32.xlu0 %v4865_v55, %s4945_s30 }
 0x174   :  { %v6025_v21 = vpop.permute.xlu2 %931  ;;  %v6027_v53 = vpop.permute.xlu1 %862 }
 0x175   :  { %9928 = vst [vmem:[#allocation120_spill] sm:$0xff] %v6025_v21  ;;  %v6029_v8 = vpop.permute.xlu0 %860 }
 0x176   :  { %9929 = vst [vmem:[#allocation121_spill] sm:$0xff] %v6027_v53  ;;  %v6048_v53 = vld [vmem:[%s9702_s0 + $0xd0] sm:$0xff] }
 0x177   :  { %9930 = vst [vmem:[#allocation122_spill] sm:$0xff] %v6029_v8 }
 0x17a   :  { %1010 = vrot.lane.b32.xlu2 %v5211_v24, %s4945_s30  ;;  %1008 = vrot.lane.b32.xlu1 %v5222_v34, %s4945_s30  ;;  %v6057_v24 = vld [vmem:[%s9702_s0 + $0xc0] sm:$0xff]  }
 0x17b   :  { %1006 = vrot.lane.b32.xlu0 %v4866_v28, %s4945_s30 }
 0x17c   :  { %v6039_v11 = vpop.permute.xlu2 %937  ;;  %v6041_v55 = vpop.permute.xlu1 %917 }
 0x17d   :  { %9931 = vst [vmem:[#allocation123_spill] sm:$0xff] %v6039_v11  ;;  %v6043_v46 = vpop.permute.xlu0 %915 }
 0x182   :  { %1016 = vrot.lane.b32.xlu2 %v6048_v53, %s4945_s30  ;;  %1014 = vrot.lane.b32.xlu1 %v5740_v22, %s4945_s30 }
 0x183   :  { %1012 = vrot.lane.b32.xlu0 %v6057_v24, %s4945_s30 }
 0x184   :  { %v6061_v34 = vpop.permute.xlu2 %943  ;;  %v6063_v28 = vpop.permute.xlu1 %923 }
 0x185   :  { %9932 = vst [vmem:[#allocation124_spill] sm:$0xff] %v6061_v34  ;;  %v6065_v11 = vpop.permute.xlu0 %921 }
 0x186   :  { %9933 = vst [vmem:[#allocation125_spill] sm:$0xff] %v6063_v28 }
 0x187   :  { %9934 = vst [vmem:[#allocation126_spill] sm:$0xff] %v6065_v11 }
 0x18a   :  { %1054 = vrot.lane.b32.xlu2 %v5056_v41, %s4946_s8  ;;  %1052 = vrot.lane.b32.xlu1 %v5040_v30, %s4946_s8 }
 0x18b   :  { %1050 = vrot.lane.b32.xlu0 %v5059_v42, %s4946_s8 }
 0x18c   :  { %v6073_v8 = vpop.permute.xlu2 %949  ;;  %v6075_v52 = vpop.permute.xlu1 %929 }
 0x18d   :  { %9935 = vst [vmem:[#allocation127_spill] sm:$0xff] %v6073_v8  ;;  %v6077_v36 = vpop.permute.xlu0 %927 }
 0x18e   :  { %9936 = vst [vmem:[#allocation128_spill] sm:$0xff] %v6075_v52 }
 0x18f   :  { %9937 = vst [vmem:[#allocation129_spill] sm:$0xff] %v6077_v36 }
 0x192   :  { %1060 = vrot.lane.b32.xlu2 %v5091_v62, %s4946_s8  ;;  %1058 = vrot.lane.b32.xlu1 %v5094_v63, %s4946_s8 }
 0x193   :  { %1056 = vrot.lane.b32.xlu0 %v5098_v5, %s4946_s8 }
 0x194   :  { %v6085_v41 = vpop.permute.xlu2 %955  ;;  %v6087_v30 = vpop.permute.xlu1 %935 }
 0x195   :  { %9938 = vst [vmem:[#allocation130_spill] sm:$0xff] %v6085_v41  ;;  %v6089_v42 = vpop.permute.xlu0 %933 }
 0x196   :  { %9939 = vst [vmem:[#allocation131_spill] sm:$0xff] %v6087_v30  ;;  %v1022_v30 = vshll.u32 %v6057_v24, 16 }
 0x197   :  { %9940 = vst [vmem:[#allocation132_spill] sm:$0xff] %v6089_v42  ;;  %v1038_v42 = vshll.u32 %v6048_v53, 16 }
 0x19a   :  { %1066 = vrot.lane.b32.xlu2 %v5125_v20, %s4946_s8  ;;  %1064 = vrot.lane.b32.xlu1 %v5130_v23, %s4946_s8 }
 0x19b   :  { %1062 = vrot.lane.b32.xlu0 %v5139_v31, %s4946_s8 }
 0x19c   :  { %v6097_v62 = vpop.permute.xlu2 %961  ;;  %v6099_v63 = vpop.permute.xlu1 %941 }
 0x19d   :  { %9941 = vst [vmem:[#allocation133_spill] sm:$0xff] %v6097_v62  ;;  %v6101_v5 = vpop.permute.xlu0 %939 }
 0x19e   :  { %9942 = vst [vmem:[#allocation134_spill] sm:$0xff] %v6099_v63  ;;  %v6503_v63 = vld [vmem:[%s9702_s0 + $0x17c] sm:$0xff]  }
 0x19f   :  { %10027 = vst [vmem:[#allocation165_spill] sm:$0xff] %v6503_v63 }
 0x1a2   :  { %1072 = vrot.lane.b32.xlu2 %v5163_v47, %s4946_s8  ;;  %1070 = vrot.lane.b32.xlu1 %v5166_v49, %s4946_s8 }
 0x1a3   :  { %1068 = vrot.lane.b32.xlu0 %v5175_v54, %s4946_s8  ;;  %v76_v54 = vld [vmem:[%s9702_s0 + $0xd8] sm:$0xf] }
 0x1a4   :  { %v6109_v20 = vpop.permute.xlu2 %974  ;;  %v6111_v23 = vpop.permute.xlu1 %947  ;;  %v1019_v41 = vunpack.c.l.b16 %v76_v54 }
 0x1a5   :  { %9943 = vst [vmem:[#allocation135_spill] sm:$0xff] %v6111_v23  ;;  %v6113_v31 = vpop.permute.xlu0 %945  ;;  %v1100_v23 = vrot.slane %v5740_v22, 1 }
 0x1a6   :  { %9944 = vst [vmem:[#allocation136_spill] sm:$0xff] %v6113_v31  ;;  %v6138_v1 = vpack.c.b16 %v1019_v41, %v1019_v41  ;;  %v1034_v41 = vshrl.u32 %v5740_v22, 16  ;;  %v6294_v22 = vld [vmem:[%s9702_s0 + $0x10c] sm:$0xff]  }
 0x1a7   :  { %v2131_v61 = vshrl.u32 %v6294_v22, 16 }
 0x1a8   :  { %v1046_v48 = vshll.u32 %v6138_v1, 16 }
 0x1aa   :  { %1078 = vrot.lane.b32.xlu2 %v5200_v12, %s4946_s8  ;;  %1076 = vrot.lane.b32.xlu1 %v5205_v19, %s4946_s8  ;;  %v9948_v12 = vld [vmem:[#allocation5_spill] sm:$0xff]  ;;  %v9949_v19 = vld [vmem:[#allocation6_spill] sm:$0xff] }
 0x1ab   :  { %1074 = vrot.lane.b32.xlu0 %v5216_v26, %s4946_s8  ;;  %v1024_v26 = vrot.slane %v1022_v30, 1  ;;  %v1042_v30 = vshrl.u32 %v6048_v53, 16 }
 0x1ac   :  { %v6121_v47 = vpop.permute.xlu2 %980  ;;  %v6123_v49 = vpop.permute.xlu1 %953 }
 0x1ad   :  { %9945 = vst [vmem:[#allocation137_spill] sm:$0xff] %v6121_v47  ;;  %v6128_v62 = vpop.permute.xlu0 %951 }
 0x1ae   :  { %9946 = vst [vmem:[#allocation138_spill] sm:$0xff] %v6123_v49  ;;  %v9950_v49 = vld [vmem:[#allocation7_spill] sm:$0xff] }
 0x1af   :  { %9947 = vst [vmem:[#allocation139_spill] sm:$0xff] %v6128_v62 }
 0x1b2   :  { %1084 = vrot.lane.b32.xlu2 %v9948_v12, %s4946_s8  ;;  %1082 = vrot.lane.b32.xlu1 %v9949_v19, %s4946_s8  ;;  %v9954_v12 = vld [vmem:[#allocation8_spill] sm:$0xff]  ;;  %v1040_v19 = vrot.slane %v1038_v42, 1  ;;  %v1036_v42 = vor.u32 %v1034_v41, %v1032_v10  ;;  %v9968_v41 = vld [vmem:[#allocation15_spill] sm:$0xff] }
 0x1b3   :  { %1080 = vrot.lane.b32.xlu0 %v9950_v49, %s4946_s8  ;;  %v1025_v21 = vsel %vm200_vm0, %v9954_v12, %v1024_v26  ;;  %v1026_v49 = vshrl.u32 %v6057_v24, 16  ;;  %v1048_v12 = vrot.slane %v1046_v48, 1 }
 0x1b4   :  { %v6141_v15 = vpop.permute.xlu2 %986  ;;  %v6143_v62 = vpop.permute.xlu1 %959 }
 0x1b5   :  { %9951 = vst [vmem:[#allocation5_spill] sm:$0xff] %v6141_v15  ;;  %v6145_v54 = vpop.permute.xlu0 %957  ;;  %v9955_v15 = vld [vmem:[#allocation9_spill] sm:$0xff]  ;;  %v1028_v32 = vor.u32 %v1026_v49, %v1024_v26  ;;  %v9961_v26 = vld [vmem:[#allocation11_spill] sm:$0xff]  ;;  %v9969_v49 = vld [vmem:[#allocation16_spill] sm:$0xff] }
 0x1b6   :  { %9952 = vst [vmem:[#allocation6_spill] sm:$0xff] %v6143_v62  ;;  %v9956_v62 = vld [vmem:[#allocation10_spill] sm:$0xff] }
 0x1b7   :  { %9953 = vst [vmem:[#allocation7_spill] sm:$0xff] %v6145_v54  ;;  %v1044_v54 = vor.u32 %v1042_v30, %v1040_v19  ;;  %v1033_v40 = vsel %vm200_vm0, %v1028_v32, %v1032_v10  ;;  %v9963_v10 = vld [vmem:[#allocation13_spill] sm:$0xff]  ;;  %v9967_v30 = vld [vmem:[#allocation14_spill] sm:$0xff] }
 0x1b9   :  { %v1049_v51 = vsel %vm200_vm0, %v1044_v54, %v1048_v12  ;;  %v9962_v54 = vld [vmem:[#allocation12_spill] sm:$0xff] }
 0x1ba   :  { %1090 = vrot.lane.b32.xlu2 %v1025_v21, %s4946_s8  ;;  %1088 = vrot.lane.b32.xlu1 %v9955_v15, %s4946_s8  ;;  %v1041_v21 = vsel %vm200_vm0, %v1036_v42, %v1040_v19 }
 0x1bb   :  { %1086 = vrot.lane.b32.xlu0 %v9956_v62, %s4946_s8 }
 0x1bc   :  { %v6158_v17 = vpop.permute.xlu2 %992  ;;  %v6160_v52 = vpop.permute.xlu1 %972 }
 0x1bd   :  { %9957 = vst [vmem:[#allocation8_spill] sm:$0xff] %v6158_v17  ;;  %v6162_v8 = vpop.permute.xlu0 %970  ;;  %v9979_v17 = vld [vmem:[#allocation22_spill] sm:$0xff] }
 0x1c2   :  { %1096 = vrot.lane.b32.xlu2 %v1049_v51, %s4946_s8  ;;  %1094 = vrot.lane.b32.xlu1 %v1041_v21, %s4946_s8  ;;  %v9973_v21 = vld [vmem:[#allocation17_spill] sm:$0xff] }
 0x1c3   :  { %1092 = vrot.lane.b32.xlu0 %v1033_v40, %s4946_s8 }
 0x1c4   :  { %v6170_v48 = vpop.permute.xlu2 %998  ;;  %v6172_v15 = vpop.permute.xlu1 %978 }
 0x1c5   :  { %9958 = vst [vmem:[#allocation9_spill] sm:$0xff] %v6170_v48  ;;  %v6174_v62 = vpop.permute.xlu0 %976 }
 0x1c6   :  { %9959 = vst [vmem:[#allocation10_spill] sm:$0xff] %v6172_v15 }
 0x1c7   :  { %9960 = vst [vmem:[#allocation140_spill] sm:$0xff] %v6174_v62 }
 0x1ca   :  { %1110 = vrot.lane.b32.xlu2 %v9961_v26, %s4947_s12  ;;  %1108 = vrot.lane.b32.xlu1 %v9962_v54, %s4947_s12  ;;  %v9974_v26 = vld [vmem:[#allocation18_spill] sm:$0xff]  ;;  %v9975_v54 = vld [vmem:[#allocation19_spill] sm:$0xff] }
 0x1cb   :  { %1106 = vrot.lane.b32.xlu0 %v9963_v10, %s4947_s12 }
 0x1cc   :  { %v6182_v51 = vpop.permute.xlu2 %1004  ;;  %v6184_v19 = vpop.permute.xlu1 %984 }
 0x1cd   :  { %9964 = vst [vmem:[#allocation11_spill] sm:$0xff] %v6182_v51  ;;  %v6186_v40 = vpop.permute.xlu0 %982  ;;  %v9990_v51 = vld [vmem:[#allocation30_spill] sm:$0xff] }
 0x1ce   :  { %9965 = vst [vmem:[#allocation12_spill] sm:$0xff] %v6184_v19  ;;  %v9989_v19 = vld [vmem:[#allocation29_spill] sm:$0xff] }
 0x1cf   :  { %9966 = vst [vmem:[#allocation13_spill] sm:$0xff] %v6186_v40  ;;  %v1104_v40 = vrot.slane %v6138_v1, 1 }
 0x1d2   :  { %1116 = vrot.lane.b32.xlu2 %v9967_v30, %s4947_s12  ;;  %1114 = vrot.lane.b32.xlu1 %v9968_v41, %s4947_s12 }
 0x1d3   :  { %1112 = vrot.lane.b32.xlu0 %v9969_v49, %s4947_s12  ;;  %v9978_v49 = vld [vmem:[#allocation21_spill] sm:$0xff] }
 0x1d4   :  { %v6194_v12 = vpop.permute.xlu2 %1010  ;;  %v6196_v42 = vpop.permute.xlu1 %990 }
 0x1d5   :  { %9970 = vst [vmem:[#allocation14_spill] sm:$0xff] %v6194_v12  ;;  %v6198_v32 = vpop.permute.xlu0 %988  ;;  %v9984_v12 = vld [vmem:[#allocation26_spill] sm:$0xff] }
 0x1d6   :  { %9971 = vst [vmem:[#allocation15_spill] sm:$0xff] %v6196_v42 }
 0x1d7   :  { %9972 = vst [vmem:[#allocation16_spill] sm:$0xff] %v6198_v32 }
 0x1da   :  { %1122 = vrot.lane.b32.xlu2 %v9973_v21, %s4947_s12  ;;  %1120 = vrot.lane.b32.xlu1 %v9974_v26, %s4947_s12  ;;  %v9980_v21 = vld [vmem:[#allocation23_spill] sm:$0xff] }
 0x1db   :  { %1118 = vrot.lane.b32.xlu0 %v9975_v54, %s4947_s12 }
 0x1dc   :  { %v6206_v10 = vpop.permute.xlu2 %1016  ;;  %v6208_v30 = vpop.permute.xlu1 %996 }
 0x1dd   :  { %9976 = vst [vmem:[#allocation17_spill] sm:$0xff] %v6206_v10  ;;  %v6210_v41 = vpop.permute.xlu0 %994  ;;  %v9983_v10 = vld [vmem:[#allocation25_spill] sm:$0xff] }
 0x1de   :  { %9977 = vst [vmem:[#allocation18_spill] sm:$0xff] %v6208_v30 }
 0x1e2   :  { %1128 = vrot.lane.b32.xlu2 %v9978_v49, %s4947_s12  ;;  %1126 = vrot.lane.b32.xlu1 %v9979_v17, %s4947_s12  ;;  %v9985_v49 = vld [vmem:[#allocation27_spill] sm:$0xff] }
 0x1e3   :  { %1124 = vrot.lane.b32.xlu0 %v9980_v21, %s4947_s12 }
 0x1e4   :  { %v6218_v42 = vpop.permute.xlu2 %1054  ;;  %v6220_v26 = vpop.permute.xlu1 %1002 }
 0x1e5   :  { %9981 = vst [vmem:[#allocation19_spill] sm:$0xff] %v6220_v26  ;;  %v6222_v54 = vpop.permute.xlu0 %1000  ;;  %v1102_v26 = vrot.slane %v6048_v53, 1 }
 0x1e6   :  { %9982 = vst [vmem:[#allocation21_spill] sm:$0xff] %v6222_v54 }
 0x1e7   :  { %v1105_v1 = vsel %vm445_vm1, %v1102_v26, %v1104_v40  ;;  %v2127_v40 = vshll.u32 %v6294_v22, 16 }
 0x1ea   :  { %1134 = vrot.lane.b32.xlu2 %v9983_v10, %s4947_s12  ;;  %1132 = vrot.lane.b32.xlu1 %v9984_v12, %s4947_s12  ;;  %v9991_v10 = vld [vmem:[#allocation31_spill] sm:$0xff]  ;;  %v1098_v12 = vrot.slane %v6057_v24, 1  ;;  %v6264_v24 = vld [vmem:[%s9702_s0 + $0xe4] sm:$0xff] }
 0x1eb   :  { %1130 = vrot.lane.b32.xlu0 %v9985_v49, %s4947_s12 }
 0x1ec   :  { %v6230_v32 = vpop.permute.xlu2 %1060  ;;  %v6232_v17 = vpop.permute.xlu1 %1008 }
 0x1ed   :  { %9986 = vst [vmem:[#allocation22_spill] sm:$0xff] %v6230_v32  ;;  %v6234_v21 = vpop.permute.xlu0 %1006  ;;  %v1101_v32 = vsel %vm445_vm1, %v1098_v12, %v1100_v23 }
 0x1ee   :  { %9987 = vst [vmem:[#allocation23_spill] sm:$0xff] %v6232_v17  ;;  %v6252_v17 = vld [vmem:[%s9702_s0 + $0xf4] sm:$0xff]  }
 0x1ef   :  { %9988 = vst [vmem:[#allocation25_spill] sm:$0xff] %v6234_v21  ;;  %v2107_v4 = vshrl.u32 %v6252_v17, 16 }
 0x1f2   :  { %1140 = vrot.lane.b32.xlu2 %v9989_v19, %s4947_s12  ;;  %1138 = vrot.lane.b32.xlu1 %v9990_v51, %s4947_s12  ;;  %v6257_v51 = vld [vmem:[%s9702_s0 + $0xec] sm:$0xff]   ;;  %v9995_v19 = vld [vmem:[#allocation32_spill] sm:$0xff] }
 0x1f3   :  { %1136 = vrot.lane.b32.xlu0 %v9991_v10, %s4947_s12  ;;  %v1099_v10 = vsel %vm445_vm1, %v9995_v19, %v1098_v12  ;;  %v2095_v21 = vshll.u32 %v6257_v51, 16  ;;  %v9997_v19 = vld [vmem:[#allocation37_spill] sm:$0xff]  ;;  %v2099_v53 = vshrl.u32 %v6257_v51, 16 }
 0x1f4   :  { %v6243_v58 = vpop.permute.xlu2 %1066  ;;  %v6245_v49 = vpop.permute.xlu1 %1014 }
 0x1f5   :  { %9992 = vst [vmem:[#allocation26_spill] sm:$0xff] %v6243_v58  ;;  %v6247_v3 = vpop.permute.xlu0 %1012  ;;  %v6273_v58 = vld [vmem:[%s9702_s0 + $0xfc] sm:$0xff]  }
 0x1f6   :  { %9993 = vst [vmem:[#allocation27_spill] sm:$0xff] %v6245_v49  ;;  %v2103_v49 = vshll.u32 %v6252_v17, 16  ;;  %v2111_v0 = vshll.u32 %v6273_v58, 16 }
 0x1f7   :  { %9994 = vst [vmem:[#allocation29_spill] sm:$0xff] %v6247_v3  ;;  %v9996_v3 = vld [vmem:[#allocation36_spill] sm:$0xff] }
 0x1f8   :  { %v2105_v13 = vrot.slane %v2103_v49, 1  ;;  %v6301_v49 = vld [vmem:[%s9702_s0 + $0x104] sm:$0xff]   ;;  %v2113_v31 = vrot.slane %v2111_v0, 1 }
 0x1f9   :  { %v6324_v0 = vld [vmem:[%s9702_s0 + $0x124] sm:$0xff]   ;;  %v2123_v33 = vshrl.u32 %v6301_v49, 16 }
 0x1fa   :  { %1146 = vrot.lane.b32.xlu2 %v1099_v10, %s4947_s12  ;;  %1144 = vrot.lane.b32.xlu1 %v9996_v3, %s4947_s12  ;;  %v2090_v3 = vshll.u32 %v6264_v24, 16  ;;  %v2109_v47 = vor.u32 %v2107_v4, %v2105_v13  ;;  %v2155_v28 = vshrl.u32 %v6324_v0, 16 }
 0x1fb   :  { %1142 = vrot.lane.b32.xlu0 %v9997_v19, %s4947_s12  ;;  %v2097_v19 = vrot.slane %v2095_v21, 1  ;;  %v2088_v21 = vshrl.u32 %v6264_v24, 16 }
 0x1fc   :  { %v6281_v10 = vpop.permute.xlu2 %1072  ;;  %v6283_v36 = vpop.permute.xlu1 %1052  ;;  %v2092_v54 = vrot.slane %v2090_v3, 1  ;;  %v2114_v4 = vsel %vm200_vm0, %v2109_v47, %v2113_v31  ;;  %v2151_v47 = vshll.u32 %v6324_v0, 16 }
 0x1fd   :  { %9998 = vst [vmem:[#allocation30_spill] sm:$0xff] %v6281_v10  ;;  %v6286_v9 = vpop.permute.xlu0 %1050  ;;  %v1103_v10 = vsel %vm445_vm1, %v1100_v23, %v1102_v26  ;;  %v2101_v57 = vor.u32 %v2099_v53, %v2097_v19  ;;  %v6312_v26 = vld [vmem:[%s9702_s0 + $0x114] sm:$0xff]   ;;  %v2119_v23 = vshll.u32 %v6301_v49, 16  ;;  %v2129_v53 = vrot.slane %v2127_v40, 1 }
 0x1ff   :  { %v2133_v40 = vor.u32 %v2131_v61, %v2129_v53  ;;  %v6360_v61 = vld [vmem:[%s9702_s0 + $0x13c] sm:$0xff]  }
 0x202   :  { %1152 = vrot.lane.b32.xlu2 %v1105_v1, %s4947_s12  ;;  %1150 = vrot.lane.b32.xlu1 %v1103_v10, %s4947_s12  ;;  %v2093_v1 = vor.u32 %v2092_v54, %v2088_v21  ;;  %v2135_v54 = vshll.u32 %v6312_v26, 16  ;;  %v2121_v21 = vrot.slane %v2119_v23, 1 }
 0x203   :  { %1148 = vrot.lane.b32.xlu0 %v1101_v32, %s4947_s12  ;;  %v2106_v32 = vsel %vm200_vm0, %v2101_v57, %v2105_v13  ;;  %v6344_v57 = vld [vmem:[%s9702_s0 + $0x12c] sm:$0xff]   ;;  %v2143_v13 = vshll.u32 %v6331_v37, 16 }
 0x204   :  { %v6315_v12 = vpop.permute.xlu2 %1078  ;;  %v6317_v3 = vpop.permute.xlu1 %1058  ;;  %v2137_v23 = vrot.slane %v2135_v54, 1  ;;  %v2159_v34 = vshll.u32 %v6344_v57, 16 }
 0x205   :  { %9999 = vst [vmem:[#allocation31_spill] sm:$0xff] %v6315_v12  ;;  %v6319_v10 = vpop.permute.xlu0 %1056  ;;  %v2115_v12 = vshrl.u32 %v6273_v58, 16  ;;  %v2145_v35 = vrot.slane %v2143_v13, 1  ;;  %v2139_v13 = vshrl.u32 %v6312_v26, 16 }
 0x206   :  { %10000 = vst [vmem:[#allocation32_spill] sm:$0xff] %v6317_v3  ;;  %v2098_v3 = vsel %vm200_vm0, %v2093_v1, %v2097_v19  ;;  %v2125_v19 = vor.u32 %v2123_v33, %v2121_v21  ;;  %v1550_v33 = vld [vmem:[%s9703_s1 + $0x10] sm:$0x3] }
 0x207   :  { %10001 = vst [vmem:[#allocation36_spill] sm:$0xff] %v6319_v10  ;;  %v2117_v48 = vor.u32 %v2115_v12, %v2113_v31  ;;  %v6366_v31 = vsel %vm200_vm0, %v2133_v40, %v2137_v23  ;;  %v1564_v54 = vunpack.c.l.b16 %v1550_v33  ;;  %v2149_v40 = vor.u32 %v2147_v18, %v2145_v35 }
 0x208   :  { %10005 = vst [vmem:[#allocation143_spill] sm:$0xff] %v6366_v31  ;;  %v6369_v12 = vsel %vm200_vm0, %v2125_v19, %v2129_v53  ;;  %v2161_v53 = vrot.slane %v2159_v34, 1  ;;  %v2175_v19 = vshll.u32 %v6360_v61, 16  ;;  %v2141_v34 = vor.u32 %v2139_v13, %v2137_v23  ;;  %v6413_v23 = vld [vmem:[%s9702_s0 + $0x14c] sm:$0xff]  }
 0x209   :  { %10006 = vst [vmem:[#allocation144_spill] sm:$0xff] %v6369_v12  ;;  %v4258_v13 = vld [vmem:[%s9703_s1 + $0x8] sm:$0xff] }
 0x20a   :  { %2287 = vrot.lane.b32.xlu2 %v2114_v4, %s4940_s11  ;;  %2285 = vrot.lane.b32.xlu1 %v2106_v32, %s4940_s11  ;;  %v2153_v32 = vrot.slane %v2151_v47, 1  ;;  %v6377_v47 = vsel %vm200_vm0, %v2117_v48, %v2121_v21  ;;  %v6390_v48 = vld [vmem:[%s9702_s0 + $0x144] sm:$0xff]  }
 0x20b   :  { %2283 = vrot.lane.b32.xlu0 %v2098_v3, %s4940_s11  ;;  %v6374_v3 = vld [vmem:[%s9702_s0 + $0x134] sm:$0xff]   ;;  %10007 = vst [vmem:[#allocation145_spill] sm:$0xff] %v6377_v47 }
 0x20c   :  { %v6348_v1 = vpop.permute.xlu2 %1084  ;;  %v6350_v15 = vpop.permute.xlu1 %1064 }
 0x20d   :  { %10002 = vst [vmem:[#allocation37_spill] sm:$0xff] %v6348_v1  ;;  %v6352_v4 = vpop.permute.xlu0 %1062  ;;  %v1567_v1 = vpack.c.b16 %v1564_v54, %v1564_v54 }
 0x20e   :  { %10003 = vst [vmem:[#allocation141_spill] sm:$0xff] %v6350_v15  ;;  %v2157_v15 = vor.u32 %v2155_v28, %v2153_v32  ;;  %v2167_v28 = vshll.u32 %v6374_v3, 16 }
 0x20f   :  { %10004 = vst [vmem:[#allocation142_spill] sm:$0xff] %v6352_v4  ;;  %v1621_v21 = vsel %vm1619_vm2, %v1567_v1, 0  ;;  %v6408_v1 = vsel %vm200_vm0, %v2149_v40, %v2153_v32  ;;  %v6422_v32 = vsel %vm200_vm0, %v2141_v34, %v2145_v35  ;;  %v2163_v40 = vshrl.u32 %v6344_v57, 16  ;;  %v4257_v34 = vld [vmem:[%s9703_s1] sm:$0xff] }
 0x210   :  { %1628 = vmatpush.bf16.msra.mxu0 %v1621_v21  ;;  %4779 = vmatpush.bf16.msra.mxu2 %v1621_v21  ;;  %v6405_v4 = vsel %vm200_vm0, %v2157_v15, %v2161_v53  ;;  %10012 = vst [vmem:[#allocation150_spill] sm:$0xff] %v6408_v1  ;;  %v2171_v15 = vshrl.u32 %v6374_v3, 16  ;;  %v2191_v35 = vshll.u32 %v6413_v23, 16 }
 0x211   :  { %3476 = vmatpush.bf16.msra.mxu1 %v1621_v21  ;;  %4782 = vmatpush.bf16.msra.mxu3 %v1621_v21  ;;  %10011 = vst [vmem:[#allocation149_spill] sm:$0xff] %v6405_v4  ;;  %v2183_v21 = vshll.u32 %v6390_v48, 16  ;;  %v2165_v2 = vor.u32 %v2163_v40, %v2161_v53  ;;  %v6464_v40 = vld [vmem:[%s9702_s0 + $0x164] sm:$0xff]  }
 0x212   :  { %2293 = vrot.lane.b32.xlu2 %v6366_v31, %s4940_s11  ;;  %2291 = vrot.lane.b32.xlu1 %v6369_v12, %s4940_s11  ;;  %v6402_v31 = vld [vmem:[%s9702_s0 + $0x154] sm:$0xff]   ;;  %10013 = vst [vmem:[#allocation151_spill] sm:$0xff] %v6422_v32 }
 0x213   :  { %2289 = vrot.lane.b32.xlu0 %v6377_v47, %s4940_s11  ;;  %v2185_v12 = vrot.slane %v2183_v21, 1  ;;  %v2203_v30 = vshrl.u32 %v6402_v31, 16  ;;  %v6453_v21 = vld [vmem:[%s9702_s0 + $0x16c] sm:$0xff]   ;;  %10019 = vst [vmem:[#allocation157_spill] sm:$0xff] %v6464_v40 }
 0x214   :  { %v6393_v33 = vpop.permute.xlu2 %1090  ;;  %v6395_v54 = vpop.permute.xlu1 %1070  ;;  %1629 = vmatpush.bf16.msra.mxu0 %v4258_v13  ;;  %4780 = vmatpush.bf16.msra.mxu2 %v4258_v13  ;;  %10016 = vst [vmem:[#allocation154_spill] sm:$0xff] %v6453_v21 }
 0x215   :  { %10008 = vst [vmem:[#allocation146_spill] sm:$0xff] %v6393_v33  ;;  %v6397_v18 = vpop.permute.xlu0 %1068  ;;  %v2177_v33 = vrot.slane %v2175_v19, 1  ;;  %v2199_v19 = vshll.u32 %v6402_v31, 16  ;;  %3477 = vmatpush.bf16.msra.mxu1 %v4258_v13  ;;  %4783 = vmatpush.bf16.msra.mxu3 %v4258_v13 }
 0x216   :  { %10009 = vst [vmem:[#allocation147_spill] sm:$0xff] %v6395_v54  ;;  %v2179_v54 = vshrl.u32 %v6360_v61, 16 }
 0x217   :  { %10010 = vst [vmem:[#allocation148_spill] sm:$0xff] %v6397_v18  ;;  %v2169_v18 = vrot.slane %v2167_v28, 1  ;;  %v6433_v28 = vld [vmem:[%s9702_s0 + $0x15c] sm:$0xff]   ;;  %v2201_v10 = vrot.slane %v2199_v19, 1 }
 0x218   :  { %v2181_v13 = vor.u32 %v2179_v54, %v2177_v33  ;;  %1630 = vmatpush.bf16.msra.mxu0 %v4257_v34  ;;  %4781 = vmatpush.bf16.msra.mxu2 %v4257_v34  ;;  %v2207_v62 = vshll.u32 %v6433_v28, 16  ;;  %v2195_v54 = vshrl.u32 %v6413_v23, 16 }
 0x219   :  { %3478 = vmatpush.bf16.msra.mxu1 %v4257_v34  ;;  %4784 = vmatpush.bf16.msra.mxu3 %v4257_v34  ;;  %v6467_v19 = vsel %vm200_vm0, %v2165_v2, %v2169_v18  ;;  %v2205_v34 = vor.u32 %v2203_v30, %v2201_v10  ;;  %v6480_v2 = vld [vmem:[%s9702_s0 + $0x174] sm:$0xff]  }
 0x21a   :  { %2299 = vrot.lane.b32.xlu2 %v6405_v4, %s4940_s11  ;;  %2297 = vrot.lane.b32.xlu1 %v6408_v1, %s4940_s11  ;;  %v2173_v4 = vor.u32 %v2171_v15, %v2169_v18  ;;  %v6456_v53 = vsel %vm200_vm0, %v2181_v13, %v2185_v12  ;;  %10020 = vst [vmem:[#allocation158_spill] sm:$0xff] %v6467_v19  ;;  %v2209_v13 = vrot.slane %v2207_v62, 1  ;;  %v2215_v18 = vshll.u32 %v6464_v40, 16  ;;  %v6492_v62 = vld [vmem:[%s9702_s0 + $0x184] sm:$0xff]  }
 0x21b   :  { %2295 = vrot.lane.b32.xlu0 %v6422_v32, %s4940_s11  ;;  %v2193_v32 = vrot.slane %v2191_v35, 1  ;;  %10017 = vst [vmem:[#allocation155_spill] sm:$0xff] %v6456_v53  ;;  %v2187_v35 = vshrl.u32 %v6390_v48, 16  ;;  %v2251_v59 = vshrl.u32 %v6492_v62, 16 }
 0x21c   :  { %v6441_v47 = vpop.permute.xlu2 %1096  ;;  %v6443_v1 = vpop.permute.xlu1 %1076  ;;  %v6459_v15 = vsel %vm200_vm0, %v2173_v4, %v2177_v33  ;;  %v2223_v33 = vshll.u32 %v6453_v21, 16  ;;  %10021 = vst [vmem:[#allocation159_spill] sm:$0xff] %v6480_v2 }
 0x21d   :  { %10014 = vst [vmem:[#allocation152_spill] sm:$0xff] %v6441_v47  ;;  %v6445_v7 = vpop.permute.xlu0 %1074  ;;  %v2197_v4 = vor.u32 %v2195_v54, %v2193_v32  ;;  %v6495_v54 = vsel %vm200_vm0, %v2205_v34, %v2209_v13  ;;  %v2211_v34 = vshrl.u32 %v6433_v28, 16 }
 0x21e   :  { %10015 = vst [vmem:[#allocation153_spill] sm:$0xff] %v6443_v1  ;;  %v2225_v1 = vrot.slane %v2223_v33, 1  ;;  %v2239_v33 = vshll.u32 %v6503_v63, 16 }
 0x21f   :  { %10018 = vst [vmem:[#allocation156_spill] sm:$0xff] %v6459_v15 }
 0x220   :  { %10024 = vst [vmem:[#allocation162_spill] sm:$0xff] %v6492_v62 }
 0x221   :  { %10025 = vst [vmem:[#allocation163_spill] sm:$0xff] %v6495_v54 }
 0x222   :  { %2305 = vrot.lane.b32.xlu2 %v6456_v53, %s4940_s11  ;;  %2303 = vrot.lane.b32.xlu1 %v6459_v15, %s4940_s11  ;;  %v2189_v15 = vor.u32 %v2187_v35, %v2185_v12  ;;  %v2227_v12 = vshrl.u32 %v6453_v21, 16  ;;  %v2231_v35 = vshll.u32 %v6480_v2, 16 }
 0x223   :  { %2301 = vrot.lane.b32.xlu0 %v6467_v19, %s4940_s11  ;;  %v6498_v19 = vsel %vm200_vm0, %v2197_v4, %v2201_v10  ;;  %v2247_v10 = vshll.u32 %v6492_v62, 16  ;;  %v6520_v4 = vld [vmem:[%s9702_s0 + $0x18c] sm:$0xff]  }
 0x224   :  { %v6483_v47 = vpop.permute.xlu2 %1110  ;;  %v6485_v53 = vpop.permute.xlu1 %1082  ;;  %10026 = vst [vmem:[#allocation164_spill] sm:$0xff] %v6498_v19  ;;  %v6509_v11 = vsel %vm200_vm0, %v2189_v15, %v2193_v32  ;;  %v2229_v32 = vor.u32 %v2227_v12, %v2225_v1  ;;  %v2233_v15 = vrot.slane %v2231_v35, 1  ;;  %v2255_v14 = vshll.u32 %v6520_v4, 16 }
 0x225   :  { %10022 = vst [vmem:[#allocation160_spill] sm:$0xff] %v6485_v53  ;;  %v6487_v30 = vpop.permute.xlu0 %1080  ;;  %v2217_v53 = vrot.slane %v2215_v18, 1  ;;  %v2249_v25 = vrot.slane %v2247_v10, 1  ;;  %v2243_v12 = vshrl.u32 %v6503_v63, 16  ;;  %v6551_v10 = vld [vmem:[%s9702_s0 + $0x194] sm:$0xff]  }
 0x226   :  { %10023 = vst [vmem:[#allocation161_spill] sm:$0xff] %v6487_v30  ;;  %v2219_v30 = vshrl.u32 %v6464_v40, 16 }
 0x227   :  { %10028 = vst [vmem:[#allocation166_spill] sm:$0xff] %v6509_v11 }
 0x228   :  { %v2221_v18 = vor.u32 %v2219_v30, %v2217_v53  ;;  %v4831_v30 = vld [vmem:[%s9702_s0 + $0x19c] sm:$0xff]   ;;  %10035 = vst [vmem:[#allocation173_spill] sm:$0xff] %v6551_v10 }
 0x22a   :  { %2311 = vrot.lane.b32.xlu2 %v6495_v54, %s4940_s11  ;;  %2309 = vrot.lane.b32.xlu1 %v6498_v19, %s4940_s11  ;;  %v2213_v54 = vor.u32 %v2211_v34, %v2209_v13  ;;  %v4614_v19 = vld [vmem:[%s9702_s0 + $0x1a0] sm:$0xff]   ;;  %v6541_v13 = vsel %vm200_vm0, %v2229_v32, %v2233_v15  ;;  %v6544_v35 = vsel %vm200_vm0, %v2221_v18, %v2225_v1  ;;  %v2257_v32 = vrot.slane %v2255_v14, 1 }
 0x22b   :  { %2307 = vrot.lane.b32.xlu0 %v6509_v11, %s4940_s11  ;;  %v2241_v11 = vrot.slane %v2239_v33, 1  ;;  %10032 = vst [vmem:[#allocation170_spill] sm:$0xff] %v6541_v13  ;;  %v6546_v34 = vunpack.c.h.b16 %v4614_v19  ;;  %v2253_v1 = vor.u32 %v2251_v59, %v2249_v25  ;;  %v2271_v18 = vshll.u32 %v4831_v30, 16 }
 0x22c   :  { %v6525_v40 = vpop.permute.xlu2 %1116  ;;  %v6527_v21 = vpop.permute.xlu1 %1088  ;;  %10033 = vst [vmem:[#allocation171_spill] sm:$0xff] %v6544_v35  ;;  %v6554_v33 = vsel %vm200_vm0, %v2213_v54, %v2217_v53  ;;  %v2263_v54 = vshll.u32 %v6551_v10, 16 }
 0x22d   :  { %10029 = vst [vmem:[#allocation167_spill] sm:$0xff] %v6525_v40  ;;  %v6532_v43 = vpop.permute.xlu0 %1086  ;;  %v2245_v19 = vor.u32 %v2243_v12, %v2241_v11  ;;  %v6565_v53 = vpack.c.b16 %v6546_v34, %v6546_v34  ;;  %v6582_v63 = vsel %vm200_vm0, %v2253_v1, %v2257_v32 }
 0x22e   :  { %10030 = vst [vmem:[#allocation168_spill] sm:$0xff] %v6527_v21  ;;  %v2235_v21 = vshrl.u32 %v6480_v2, 16  ;;  %v2273_v2 = vrot.slane %v2271_v18, 1 }
 0x22f   :  { %10031 = vst [vmem:[#allocation169_spill] sm:$0xff] %v6532_v43  ;;  %v10038_v43 = vld [vmem:[#allocation40_spill] sm:$0xff]  ;;  %v6585_v62 = vsel %vm200_vm0, %v2245_v19, %v2249_v25 }
 0x230   :  { %10034 = vst [vmem:[#allocation172_spill] sm:$0xff] %v6546_v34 }
 0x231   :  { %10036 = vst [vmem:[#allocation174_spill] sm:$0xff] %v6554_v33 }
 0x232   :  { %2317 = vrot.lane.b32.xlu2 %v6541_v13, %s4940_s11  ;;  %2315 = vrot.lane.b32.xlu1 %v6544_v35, %s4940_s11  ;;  %10037 = vst [vmem:[#allocation175_spill] sm:$0xff] %v6565_v53  ;;  %v4868_v13 = vld [vmem:[%s9702_s0] sm:$0xff]  ;;  %v2237_v35 = vor.u32 %v2235_v21, %v2233_v15 }
 0x233   :  { %2313 = vrot.lane.b32.xlu0 %v6554_v33, %s4940_s11  ;;  %v1156_v59 = vsel %vm1154_vm3, %v4868_v13, %v10038_v43  ;;  %v10041_v33 = vld [vmem:[#allocation61_spill] sm:$0xff]  ;;  %v2275_v43 = vshrl.u32 %v4831_v30, 16  ;;  %v2279_v13 = vshll.u32 %v6565_v53, 16 }
 0x234   :  { %v6573_v14 = vpop.permute.xlu2 %1122  ;;  %v6575_v12 = vpop.permute.xlu1 %1094  ;;  %v1205_v40 = vsel %vm1203_vm4, %v1156_v59, %v10041_v33  ;;  %v6592_v15 = vsel %vm200_vm0, %v2237_v35, %v2241_v11  ;;  %v2259_v33 = vshrl.u32 %v6520_v4, 16 }
 0x235   :  { %10039 = vst [vmem:[#allocation40_spill] sm:$0xff] %v6573_v14  ;;  %v6579_v34 = vpop.permute.xlu0 %1092  ;;  %v2265_v14 = vrot.slane %v2263_v54, 1  ;;  %v1254_v21 = vsel %vm1252_vm5, %v1205_v40, %v5779_v60  ;;  %v6605_v60 = vor.u32 %v2275_v43, %v2273_v2  ;;  %v2281_v11 = vrot.slane %v2279_v13, 1 }
 0x236   :  { %10040 = vst [vmem:[#allocation176_spill] sm:$0xff] %v6575_v12  ;;  %v2267_v12 = vshrl.u32 %v6551_v10, 16  ;;  %v1303_v25 = vsel %vm1301_vm6, %v1254_v21, %v5900_v45  ;;  %v2261_v1 = vor.u32 %v2259_v33, %v2257_v32  ;;  %v2336_v32 = vrot.slane %v6273_v58, 1  ;;  %v4869_v33 = vld [vmem:[%s9702_s0 + $0x8] sm:$0xff]  }
 0x237   :  { %v1352_v30 = vsel %vm1350_vm7, %v1303_v25, %v6043_v46  ;;  %10042 = vst [vmem:[#allocation61_spill] sm:$0xff] %v6605_v60  ;;  %v2282_v59 = vsel %vm200_vm0, %v6605_v60, %v2281_v11  ;;  %v2332_v43 = vrot.slane %v6257_v51, 1  ;;  %v10045_v25 = vld [vmem:[#allocation35_spill] sm:$0xff]  ;;  %v10046_v51 = vld [vmem:[#allocation60_spill] sm:$0xff]  ;;  %v10082_v60 = vld [vmem:[#allocation85_spill] sm:$0xff] }
 0x238   :  { %v2269_v40 = vor.u32 %v2267_v12, %v2265_v14  ;;  %v1401_v45 = vsel %vm1399_vm8, %v1352_v30, %v6162_v8  ;;  %v6621_v12 = vsel %vm200_vm0, %v2261_v1, %v2265_v14  ;;  %v2331_v14 = vrot.slane %v6264_v24, 1 }
 0x239   :  { %v1450_v19 = vsel %vm1448_vm9, %v1401_v45, %v6286_v9  ;;  %10044 = vst [vmem:[#allocation178_spill] sm:$0xff] %v6621_v12  ;;  %v2334_v9 = vrot.slane %v6252_v17, 1  ;;  %v1158_v30 = vsel %vm1154_vm3, %v4869_v33, %v10045_v25  ;;  %v2344_v33 = vrot.slane %v6331_v37, 1 }
 0x23a   :  { %2323 = vrot.lane.b32.xlu2 %v6582_v63, %s4940_s11  ;;  %2321 = vrot.lane.b32.xlu1 %v6585_v62, %s4940_s11  ;;  %v6618_v8 = vsel %vm200_vm0, %v2269_v40, %v2273_v2  ;;  %v1207_v40 = vsel %vm1203_vm4, %v1158_v30, %v10046_v51  ;;  %v2333_v45 = vsel %vm445_vm1, %v2331_v14, %v2332_v43 }
 0x23b   :  { %2319 = vrot.lane.b32.xlu0 %v6592_v15, %s4940_s11  ;;  %10043 = vst [vmem:[#allocation177_spill] sm:$0xff] %v6618_v8  ;;  %v2337_v17 = vsel %vm445_vm1, %v2334_v9, %v2336_v32  ;;  %v2335_v11 = vsel %vm445_vm1, %v2332_v43, %v2334_v9  ;;  %v1256_v24 = vsel %vm1252_vm5, %v1207_v40, %v5777_v44  ;;  %v10048_v40 = vld [vmem:[#allocation49_spill] sm:$0xff] }
 0x23c   :  { %v6609_v35 = vpop.permute.xlu2 %1128  ;;  %v1109_v46 = vpop.permute.xlu1 %1108  ;;  %v1305_v1 = vsel %vm1301_vm6, %v1256_v24, %v5898_v50 }
 0x23d   :  { %v1107_v18 = vpop.permute.xlu0 %1106 }
 0x23e   :  { %v1499_v54 = vsel %vm1497_vm11, %v1450_v19, %v1107_v18  ;;  %v1354_v19 = vsel %vm1350_vm7, %v1305_v1, %v6041_v55  ;;  %v2340_v18 = vrot.slane %v6294_v22, 1  ;;  %v10050_v1 = vld [vmem:[#allocation73_spill] sm:$0xff] }
 0x23f   :  { %4144 = vmatmul.msk.bf16.vlgmr.msra.gmra.mxu0 %vm1570_vm10, %v1499_v54  ;;  %v2342_v54 = vrot.slane %v6312_v26, 1  ;;  %v1403_v44 = vsel %vm1399_vm8, %v1354_v19, %v6160_v52 }
 0x240   :  { %v1452_v43 = vsel %vm1448_vm9, %v1403_v44, %v6283_v36  ;;  %v2346_v36 = vrot.slane %v6324_v0, 1  ;;  %v1180_v0 = vsel %vm1154_vm3, %v5985_v16, %v10048_v40  ;;  %v2356_v40 = vrot.slane %v6413_v23, 1 }
 0x241   :  { %v1501_v55 = vsel %vm1497_vm11, %v1452_v43, %v1109_v46  ;;  %v6673_v22 = vsel %vm445_vm1, %v2340_v18, %v2342_v54  ;;  %v2348_v46 = vrot.slane %v6344_v57, 1  ;;  %v10049_v57 = vld [vmem:[#allocation50_spill] sm:$0xff]  ;;  %v1229_v19 = vsel %vm1203_vm4, %v1180_v0, %v10050_v1 }
 0x242   :  { %2329 = vrot.lane.b32.xlu2 %v2282_v59, %s4940_s11  ;;  %2327 = vrot.lane.b32.xlu1 %v6618_v8, %s4940_s11  ;;  %v2338_v59 = vrot.slane %v6301_v49, 1  ;;  %v6710_v24 = vsel %vm445_vm1, %v2344_v33, %v2346_v36  ;;  %v6717_v44 = vsel %vm445_vm1, %v2342_v54, %v2344_v33  ;;  %v1278_v16 = vsel %vm1252_vm5, %v1229_v19, %v5840_v56  ;;  %v10054_v19 = vld [vmem:[#allocation48_spill] sm:$0xff]  ;;  %v10084_v8 = vld [vmem:[#allocation105_spill] sm:$0xff] }
 0x243   :  { %2325 = vrot.lane.b32.xlu0 %v6621_v12, %s4940_s11  ;;  %v2352_v56 = vrot.slane %v6360_v61, 1 }
 0x244   :  { %v6631_v13 = vpop.permute.xlu2 %1134  ;;  %v6633_v2 = vpop.permute.xlu1 %1114  ;;  %v6676_v26 = vsel %vm445_vm1, %v2338_v59, %v2340_v18  ;;  %v6679_v52 = vsel %vm445_vm1, %v2336_v32, %v2338_v59  ;;  %v10051_v18 = vld [vmem:[#allocation74_spill] sm:$0xff] }
 0x245   :  { %v6636_v21 = vpop.permute.xlu0 %1112 }
 0x24a   :  { %2384 = vrot.lane.b32.xlu2 %v2337_v17, %s4941_s20  ;;  %2382 = vrot.lane.b32.xlu1 %v2335_v11, %s4941_s20  ;;  %v4870_v17 = vld [vmem:[%s9702_s0 + $0x10] sm:$0xff]   ;;  %v10047_v11 = vld [vmem:[#allocation34_spill] sm:$0xff] }
 0x24b   :  { %2380 = vrot.lane.b32.xlu0 %v2333_v45, %s4941_s20  ;;  %v1160_v51 = vsel %vm1154_vm3, %v4870_v17, %v10047_v11  ;;  %v6707_v45 = vsel %vm445_vm1, %v2346_v36, %v2348_v46 }
 0x24c   :  { %v6662_v9 = vpop.permute.xlu2 %1140  ;;  %v6664_v50 = vpop.permute.xlu1 %1120  ;;  %v1209_v37 = vsel %vm1203_vm4, %v1160_v51, %v10049_v57 }
 0x24d   :  { %v6668_v14 = vpop.permute.xlu0 %1118  ;;  %v1258_v59 = vsel %vm1252_vm5, %v1209_v37, %v10051_v18  ;;  %v10053_v37 = vld [vmem:[#allocation39_spill] sm:$0xff]  ;;  %v1182_v18 = vsel %vm1154_vm3, %v5978_v29, %v10054_v19 }
 0x24e   :  { %v1307_v43 = vsel %vm1301_vm6, %v1258_v59, %v5851_v39  ;;  %v2354_v39 = vrot.slane %v6390_v48, 1  ;;  %v1162_v1 = vsel %vm1154_vm3, %v5925_v6, %v10053_v37  ;;  %v10055_v59 = vld [vmem:[#allocation64_spill] sm:$0xff] }
 0x24f   :  { %4145 = vmatmul.msk.bf16.gmra.mxu0 %vm1570_vm10, %v1501_v55  ;;  %v1327_v55 = vsel %vm1301_vm6, %v1278_v16, %v5969_v38  ;;  %v1356_v36 = vsel %vm1350_vm7, %v1307_v43, %v5989_v27  ;;  %v2350_v38 = vrot.slane %v6374_v3, 1  ;;  %v10058_v43 = vld [vmem:[#allocation72_spill] sm:$0xff] }
 0x250   :  { %v1376_v54 = vsel %vm1350_vm7, %v1327_v55, %v6101_v5  ;;  %v1405_v27 = vsel %vm1399_vm8, %v1356_v36, %v6109_v20  ;;  %v6754_v20 = vsel %vm445_vm1, %v2352_v56, %v2354_v39  ;;  %v1231_v55 = vsel %vm1203_vm4, %v1182_v18, %v10058_v43  ;;  %v10059_v36 = vld [vmem:[#allocation86_spill] sm:$0xff]  ;;  %v10069_v18 = vld [vmem:[#allocation140_spill] sm:$0xff] }
 0x251   :  { %v1425_v33 = vsel %vm1399_vm8, %v1376_v54, %v6210_v41  ;;  %v1454_v5 = vsel %vm1448_vm9, %v1405_v27, %v6218_v42  ;;  %10052 = vst [vmem:[#allocation35_spill] sm:$0xff] %v6754_v20  ;;  %v6757_v41 = vsel %vm445_vm1, %v2350_v38, %v2352_v56  ;;  %v6760_v42 = vsel %vm445_vm1, %v2348_v46, %v2350_v38  ;;  %v10061_v56 = vld [vmem:[#allocation94_spill] sm:$0xff] }
 0x252   :  { %2390 = vrot.lane.b32.xlu2 %v6673_v22, %s4941_s20  ;;  %2388 = vrot.lane.b32.xlu1 %v6676_v26, %s4941_s20  ;;  %v1474_v51 = vsel %vm1448_vm9, %v1425_v33, %v6445_v7  ;;  %v1503_v48 = vsel %vm1497_vm11, %v1454_v5, %v6483_v47  ;;  %v2358_v7 = vrot.slane %v6402_v31, 1  ;;  %v2360_v47 = vrot.slane %v6433_v28, 1  ;;  %v10062_v38 = vld [vmem:[#allocation106_spill] sm:$0xff] }
 0x253   :  { %2386 = vrot.lane.b32.xlu0 %v6679_v52, %s4941_s20  ;;  %v1211_v31 = vsel %vm1203_vm4, %v1162_v1, %v10055_v59  ;;  %v6796_v6 = vsel %vm445_vm1, %v2354_v39, %v2356_v40  ;;  %v1280_v29 = vsel %vm1252_vm5, %v1231_v55, %v10061_v56  ;;  %v10063_v33 = vld [vmem:[#allocation114_spill] sm:$0xff]  ;;  %v10068_v1 = vld [vmem:[#allocation157_spill] sm:$0xff] }
 0x254   :  { %v6690_v25 = vpop.permute.xlu2 %1146  ;;  %v6692_v30 = vpop.permute.xlu1 %1126  ;;  %v6786_v16 = vsel %vm445_vm1, %v2358_v7, %v2360_v47  ;;  %v6789_v23 = vsel %vm445_vm1, %v2356_v40, %v2358_v7  ;;  %v1260_v54 = vsel %vm1252_vm5, %v1211_v31, %v10059_v36  ;;  %10060 = vst [vmem:[#allocation49_spill] sm:$0xff] %v6796_v6  ;;  %v1329_v5 = vsel %vm1301_vm6, %v1280_v29, %v10063_v33  ;;  %v10065_v39 = vld [vmem:[#allocation134_spill] sm:$0xff]  ;;  %v10067_v40 = vld [vmem:[#allocation159_spill] sm:$0xff]  ;;  %v10073_v29 = vld [vmem:[#allocation153_spill] sm:$0xff] }
 0x255   :  { %v6694_v32 = vpop.permute.xlu0 %1124  ;;  %10056 = vst [vmem:[#allocation60_spill] sm:$0xff] %v6786_v16  ;;  %v1309_v27 = vsel %vm1301_vm6, %v1260_v54, %v10062_v38  ;;  %v2366_v37 = vrot.slane %v10067_v40, 1  ;;  %v2362_v19 = vrot.slane %v10068_v1, 1  ;;  %v10070_v31 = vld [vmem:[#allocation18_spill] sm:$0xff]  ;;  %v10072_v54 = vld [vmem:[#allocation36_spill] sm:$0xff] }
 0x256   :  { %10057 = vst [vmem:[#allocation34_spill] sm:$0xff] %v6789_v23 }
 0x25a   :  { %2396 = vrot.lane.b32.xlu2 %v6707_v45, %s4941_s20  ;;  %2394 = vrot.lane.b32.xlu1 %v6710_v24, %s4941_s20 }
 0x25b   :  { %2392 = vrot.lane.b32.xlu0 %v6717_v44, %s4941_s20 }
 0x25c   :  { %v6742_v17 = vpop.permute.xlu2 %1152  ;;  %v1133_v11 = vpop.permute.xlu1 %1132 }
 0x25d   :  { %v1131_v61 = vpop.permute.xlu0 %1130 }
 0x25e   :  { %v1523_v3 = vsel %vm1497_vm11, %v1474_v51, %v1131_v61  ;;  %v10064_v51 = vld [vmem:[#allocation126_spill] sm:$0xff] }
 0x25f   :  { %4146 = vmatmul.msk.bf16.gmra.mxu0 %vm1570_vm10, %v1503_v48  ;;  %4156 = vmatmul.msk.bf16.vlgmr.msra.gmra.mxu2 %vm1570_vm10, %v1523_v3  ;;  %v1358_v61 = vsel %vm1350_vm7, %v1309_v27, %v10064_v51  ;;  %v1378_v48 = vsel %vm1350_vm7, %v1329_v5, %v10065_v39  ;;  %v10066_v3 = vld [vmem:[#allocation154_spill] sm:$0xff]  ;;  %v6843_v39 = vsel %vm445_vm1, %v2360_v47, %v2362_v19  ;;  %v10075_v47 = vld [vmem:[#allocation165_spill] sm:$0xff] }
 0x260   :  { %v2364_v7 = vrot.slane %v10066_v3, 1  ;;  %v1407_v59 = vsel %vm1399_vm8, %v1358_v61, %v10069_v18  ;;  %v1427_v43 = vsel %vm1399_vm8, %v1378_v48, %v10070_v31  ;;  %v6848_v48 = vld [vmem:[%s9702_s0 + $0xf0] sm:$0xff]   ;;  %v2372_v3 = vrot.slane %v6520_v4, 1  ;;  %v4871_v4 = vld [vmem:[%s9702_s0 + $0x20] sm:$0xff]  }
 0x261   :  { %v1456_v56 = vsel %vm1448_vm9, %v1407_v59, %v10072_v54  ;;  %v1476_v38 = vsel %vm1448_vm9, %v1427_v43, %v10073_v29  ;;  %v2510_v40 = vshll.u32 %v6848_v48, 16  ;;  %v6867_v59 = vld [vmem:[%s9702_s0 + $0xf8] sm:$0xff]   ;;  %v10078_v29 = vld [vmem:[#allocation38_spill] sm:$0xff] }
 0x262   :  { %2402 = vrot.lane.b32.xlu2 %v6754_v20, %s4941_s20  ;;  %2400 = vrot.lane.b32.xlu1 %v6757_v41, %s4941_s20  ;;  %v1505_v33 = vsel %vm1497_vm11, %v1456_v56, %v6636_v21  ;;  %v1525_v5 = vsel %vm1497_vm11, %v1476_v38, %v1133_v11  ;;  %v6837_v51 = vsel %vm445_vm1, %v2364_v7, %v2366_v37  ;;  %v10074_v21 = vld [vmem:[#allocation162_spill] sm:$0xff]  ;;  %v10077_v43 = vld [vmem:[#allocation20_spill] sm:$0xff]  ;;  %v4872_v56 = vld [vmem:[%s9702_s0 + $0x70] sm:$0xff]   ;;  %v2515_v53 = vshll.u32 %v6867_v59, 16 }
 0x263   :  { %2398 = vrot.lane.b32.xlu0 %v6760_v42, %s4941_s20  ;;  %v6840_v61 = vsel %vm445_vm1, %v2362_v19, %v2364_v7  ;;  %v2370_v11 = vrot.slane %v10074_v21, 1  ;;  %v2368_v7 = vrot.slane %v10075_v47, 1  ;;  %v1164_v54 = vsel %vm1154_vm3, %v4871_v4, %v10077_v43  ;;  %v10080_v43 = vld [vmem:[#allocation63_spill] sm:$0xff] }
 0x264   :  { %v6771_v0 = vpop.permute.xlu2 %2287  ;;  %v6773_v57 = vpop.permute.xlu1 %1138  ;;  %v1184_v38 = vsel %vm1154_vm3, %v4872_v56, %v10078_v29  ;;  %v2508_v21 = vshrl.u32 %v6848_v48, 16  ;;  %v2512_v47 = vrot.slane %v2510_v40, 1  ;;  %v10081_v56 = vld [vmem:[#allocation84_spill] sm:$0xff] }
 0x265   :  { %v6775_v46 = vpop.permute.xlu0 %1136 }
 0x26a   :  { %2408 = vrot.lane.b32.xlu2 %v6786_v16, %s4941_s20  ;;  %2406 = vrot.lane.b32.xlu1 %v6789_v23, %s4941_s20  ;;  %v1213_v16 = vsel %vm1203_vm4, %v1164_v54, %v10080_v43  ;;  %v6894_v23 = vsel %vm445_vm1, %v2366_v37, %v2368_v7  ;;  %v10085_v37 = vld [vmem:[#allocation124_spill] sm:$0xff] }
 0x26b   :  { %2404 = vrot.lane.b32.xlu0 %v6796_v6, %s4941_s20  ;;  %v10083_v6 = vld [vmem:[#allocation104_spill] sm:$0xff] }
 0x26c   :  { %v6821_v55 = vpop.permute.xlu2 %2293  ;;  %v6823_v36 = vpop.permute.xlu1 %1144 }
 0x26d   :  { %10071 = vst [vmem:[#allocation50_spill] sm:$0xff] %v6821_v55  ;;  %v6829_v27 = vpop.permute.xlu0 %1142 }
 0x26f   :  { %4147 = vmatmul.msk.bf16.gmra.mxu0 %vm1570_vm10, %v1505_v33  ;;  %4157 = vmatmul.msk.bf16.gmra.mxu2 %vm1570_vm10, %v1525_v5  ;;  %v6882_v33 = vsel %vm445_vm1, %v2370_v11, %v2372_v3  ;;  %v6885_v5 = vsel %vm445_vm1, %v2368_v7, %v2370_v11  ;;  %v1262_v11 = vsel %vm1252_vm5, %v1213_v16, %v10082_v60  ;;  %v2517_v16 = vrot.slane %v2515_v53, 1 }
 0x270   :  { %v1311_v55 = vsel %vm1301_vm6, %v1262_v11, %v10084_v8  ;;  %v2513_v60 = vor.u32 %v2512_v47, %v2508_v21  ;;  %v10090_v11 = vld [vmem:[#allocation31_spill] sm:$0xff] }
 0x272   :  { %2414 = vrot.lane.b32.xlu2 %v6837_v51, %s4941_s20  ;;  %2412 = vrot.lane.b32.xlu1 %v6840_v61, %s4941_s20 }
 0x273   :  { %2410 = vrot.lane.b32.xlu0 %v6843_v39, %s4941_s20 }
 0x274   :  { %v6860_v19 = vpop.permute.xlu2 %2299  ;;  %v6862_v18 = vpop.permute.xlu1 %1150 }
 0x275   :  { %10076 = vst [vmem:[#allocation73_spill] sm:$0xff] %v6860_v19  ;;  %v6869_v31 = vpop.permute.xlu0 %1148  ;;  %v10079_v19 = vld [vmem:[#allocation62_spill] sm:$0xff] }
 0x276   :  { %v1233_v4 = vsel %vm1203_vm4, %v1184_v38, %v10079_v19  ;;  %v10086_v19 = vld [vmem:[#allocation125_spill] sm:$0xff]  ;;  %v10088_v38 = vld [vmem:[#allocation10_spill] sm:$0xff] }
 0x277   :  { %v1282_v29 = vsel %vm1252_vm5, %v1233_v4, %v10081_v56  ;;  %v1360_v54 = vsel %vm1350_vm7, %v1311_v55, %v10086_v19 }
 0x278   :  { %v1331_v40 = vsel %vm1301_vm6, %v1282_v29, %v10083_v6  ;;  %v10087_v6 = vld [vmem:[#allocation9_spill] sm:$0xff]  ;;  %v1409_v4 = vsel %vm1399_vm8, %v1360_v54, %v10088_v38  ;;  %v9763_v29 = vrot.slane %v6551_v10, 1  ;;  %v2751_v54 = vrot.slane %v6848_v48, 1  ;;  %v10094_v38 = vld [vmem:[#allocation24_spill] sm:$0xff] }
 0x279   :  { %v1380_v7 = vsel %vm1350_vm7, %v1331_v40, %v10085_v37  ;;  %v10091_v40 = vld [vmem:[#allocation32_spill] sm:$0xff] }
 0x27a   :  { %2420 = vrot.lane.b32.xlu2 %v6882_v33, %s4941_s20  ;;  %2418 = vrot.lane.b32.xlu1 %v6885_v5, %s4941_s20  ;;  %v1429_v8 = vsel %vm1399_vm8, %v1380_v7, %v10087_v6  ;;  %v1458_v37 = vsel %vm1448_vm9, %v1409_v4, %v10091_v40  ;;  %v2518_v7 = vsel %vm200_vm0, %v2513_v60, %v2517_v16  ;;  %v2752_v60 = vrot.slane %v6867_v59, 1  ;;  %v10099_v10 = vld [vmem:[#allocation96_spill] sm:$0xff] }
 0x27b   :  { %2416 = vrot.lane.b32.xlu0 %v6894_v23, %s4941_s20  ;;  %v1478_v55 = vsel %vm1448_vm9, %v1429_v8, %v10090_v11  ;;  %v1507_v53 = vsel %vm1497_vm11, %v1458_v37, %v6633_v2  ;;  %v6939_v19 = vsel %vm445_vm1, %v2372_v3, %v9763_v29  ;;  %v6955_v3 = vld [vmem:[%s9702_s0 + $0x100] sm:$0xff]   ;;  %v4873_v8 = vld [vmem:[%s9702_s0 + $0x28] sm:$0xff]   ;;  %v10095_v11 = vld [vmem:[#allocation52_spill] sm:$0xff]  ;;  %v2519_v40 = vshrl.u32 %v6867_v59, 16 }
 0x27c   :  { %v6918_v43 = vpop.permute.xlu2 %2305  ;;  %v6920_v56 = vpop.permute.xlu1 %2285  ;;  %v1527_v47 = vsel %vm1497_vm11, %v1478_v55, %v6631_v13  ;;  %10092 = vst [vmem:[#allocation39_spill] sm:$0xff] %v6939_v19  ;;  %v1166_v4 = vsel %vm1154_vm3, %v4873_v8, %v10094_v38  ;;  %v2523_v37 = vshll.u32 %v6955_v3, 16  ;;  %v10098_v8 = vld [vmem:[#allocation77_spill] sm:$0xff] }
 0x27d   :  { %10089 = vst [vmem:[#allocation74_spill] sm:$0xff] %v6918_v43  ;;  %v6927_v21 = vpop.permute.xlu0 %2283  ;;  %v2753_v43 = vsel %vm445_vm1, %v2751_v54, %v2752_v60 }
 0x27f   :  { %4148 = vmatmul.msk.bf16.gmra.mxu0 %vm1570_vm10, %v1507_v53  ;;  %4158 = vmatmul.msk.bf16.gmra.mxu2 %vm1570_vm10, %v1527_v47  ;;  %v10096_v53 = vld [vmem:[#allocation53_spill] sm:$0xff] }
 0x280   :  { %v1215_v47 = vsel %vm1203_vm4, %v1166_v4, %v10096_v53  ;;  %v10103_v4 = vld [vmem:[#allocation117_spill] sm:$0xff] }
 0x281   :  { %v1264_v38 = vsel %vm1252_vm5, %v1215_v47, %v10098_v8  ;;  %v10106_v47 = vld [vmem:[#allocation21_spill] sm:$0xff]  ;;  %v10109_v8 = vld [vmem:[#allocation22_spill] sm:$0xff] }
 0x282   :  { %2703 = vrot.lane.b32.xlu2 %v2518_v7, %s4943_s23  ;;  %2456 = vrot.lane.b32.xlu1 %v6848_v48, %s4942_s27  ;;  %v4874_v48 = vld [vmem:[%s9702_s0 + $0x78] sm:$0xff]  }
 0x283   :  { %2422 = vrot.lane.b32.xlu0 %v6939_v19, %s4941_s20  ;;  %v1186_v55 = vsel %vm1154_vm3, %v4874_v48, %v10095_v11  ;;  %v10097_v7 = vld [vmem:[#allocation76_spill] sm:$0xff]  ;;  %v10100_v19 = vld [vmem:[#allocation97_spill] sm:$0xff] }
 0x284   :  { %v6946_v13 = vpop.permute.xlu2 %2311  ;;  %v6948_v2 = vpop.permute.xlu1 %2291  ;;  %v1235_v29 = vsel %vm1203_vm4, %v1186_v55, %v10097_v7  ;;  %v1313_v48 = vsel %vm1301_vm6, %v1264_v38, %v10100_v19  ;;  %v10101_v11 = vld [vmem:[#allocation116_spill] sm:$0xff]  ;;  %v10105_v19 = vld [vmem:[#allocation137_spill] sm:$0xff] }
 0x285   :  { %10093 = vst [vmem:[#allocation48_spill] sm:$0xff] %v6948_v2  ;;  %v6957_v6 = vpop.permute.xlu0 %2289  ;;  %v1284_v20 = vsel %vm1252_vm5, %v1235_v29, %v10099_v10  ;;  %v10102_v2 = vld [vmem:[#allocation145_spill] sm:$0xff]  ;;  %v1362_v54 = vsel %vm1350_vm7, %v1313_v48, %v10103_v4  ;;  %v10104_v55 = vld [vmem:[#allocation136_spill] sm:$0xff]  ;;  %v2521_v10 = vor.u32 %v2519_v40, %v2517_v16  ;;  %v6993_v29 = vrot.slane %v2523_v37, 1  ;;  %v10112_v16 = vld [vmem:[#allocation167_spill] sm:$0xff] }
 0x286   :  { %v1333_v12 = vsel %vm1301_vm6, %v1284_v20, %v10101_v11  ;;  %v1411_v20 = vsel %vm1399_vm8, %v1362_v54, %v10105_v19  ;;  %v10110_v48 = vld [vmem:[#allocation161_spill] sm:$0xff]  ;;  %v7020_v4 = vld [vmem:[%s9702_s0 + $0x150] sm:$0xff]  }
 0x287   :  { %v1382_v53 = vsel %vm1350_vm7, %v1333_v12, %v10104_v55  ;;  %v1460_v38 = vsel %vm1448_vm9, %v1411_v20, %v10109_v8  ;;  %v2526_v11 = vsel %vm200_vm0, %v2521_v10, %v6993_v29  ;;  %10113 = vst [vmem:[#allocation94_spill] sm:$0xff] %v7020_v4  ;;  %v7036_v10 = vld [vmem:[%s9702_s0 + $0x158] sm:$0xff]  }
 0x288   :  { %v1509_v40 = vsel %vm1497_vm11, %v1460_v38, %v10112_v16  ;;  %v10120_v16 = vld [vmem:[#allocation67_spill] sm:$0xff] }
 0x28a   :  { %2935 = vrot.lane.b32.xlu2 %v10102_v2, %s4946_s8  ;;  %2855 = vrot.lane.b32.xlu1 %v6273_v58, %s4945_s30  ;;  %v1431_v2 = vsel %vm1399_vm8, %v1382_v53, %v10106_v47  ;;  %v9768_v53 = vrot.slane %v6955_v3, 1  ;;  %v4876_v47 = vld [vmem:[%s9702_s0 + $0x80] sm:$0xff]  }
 0x28b   :  { %2800 = vrot.lane.b32.xlu0 %v2753_v43, %s4944_s26  ;;  %v1480_v12 = vsel %vm1448_vm9, %v1431_v2, %v10110_v48  ;;  %v10118_v2 = vld [vmem:[#allocation51_spill] sm:$0xff]  ;;  %v2607_v48 = vshrl.u32 %v7020_v4, 16 }
 0x28c   :  { %v6999_v7 = vpop.permute.xlu2 %2317  ;;  %v7001_v58 = vpop.permute.xlu1 %2297  ;;  %v1529_v37 = vsel %vm1497_vm11, %v1480_v12, %v6775_v46  ;;  %v2603_v46 = vshll.u32 %v7020_v4, 16  ;;  %v1188_v8 = vsel %vm1154_vm3, %v4876_v47, %v10118_v2  ;;  %v2611_v12 = vshll.u32 %v7036_v10, 16  ;;  %v10123_v47 = vld [vmem:[#allocation95_spill] sm:$0xff]  ;;  %v10124_v2 = vld [vmem:[#allocation109_spill] sm:$0xff] }
 0x28d   :  { %10107 = vst [vmem:[#allocation64_spill] sm:$0xff] %v6999_v7  ;;  %v7007_v43 = vpop.permute.xlu0 %2295  ;;  %v10141_v7 = vld [vmem:[#allocation108_spill] sm:$0xff] }
 0x28e   :  { %10108 = vst [vmem:[#allocation72_spill] sm:$0xff] %v7001_v58  ;;  %v7050_v38 = vrot.slane %v2603_v46, 1 }
 0x28f   :  { %10111 = vst [vmem:[#allocation86_spill] sm:$0xff] %v7007_v43  ;;  %4149 = vmatmul.msk.bf16.gmra.mxu0 %vm1570_vm10, %v1509_v40  ;;  %4159 = vmatmul.msk.bf16.gmra.mxu2 %vm1570_vm10, %v1529_v37  ;;  %v10121_v37 = vld [vmem:[#allocation75_spill] sm:$0xff]  ;;  %v10183_v43 = vld [vmem:[#allocation118_spill] sm:$0xff] }
 0x290   :  { %10119 = vst [vmem:[#allocation134_spill] sm:$0xff] %v7050_v38 }
 0x292   :  { %2705 = vrot.lane.b32.xlu2 %v2526_v11, %s4943_s23  ;;  %2458 = vrot.lane.b32.xlu1 %v6867_v59, %s4942_s27  ;;  %v4875_v59 = vld [vmem:[%s9702_s0 + $0x30] sm:$0xff]   ;;  %v1237_v11 = vsel %vm1203_vm4, %v1188_v8, %v10121_v37  ;;  %v10127_v8 = vld [vmem:[#allocation129_spill] sm:$0xff]  ;;  %v2609_v37 = vor.u32 %v2607_v48, %v7050_v38 }
 0x293   :  { %2991 = vrot.lane.b32.xlu0 %v6679_v52, %s4947_s12  ;;  %v10117_v52 = vld [vmem:[#allocation43_spill] sm:$0xff]  ;;  %v1286_v46 = vsel %vm1252_vm5, %v1237_v11, %v10123_v47  ;;  %v10129_v11 = vld [vmem:[#allocation13_spill] sm:$0xff] }
 0x294   :  { %v7028_v54 = vpop.permute.xlu2 %2323  ;;  %v7030_v55 = vpop.permute.xlu1 %2303  ;;  %v1168_v20 = vsel %vm1154_vm3, %v4875_v59, %v10117_v52  ;;  %v2755_v59 = vsel %vm445_vm1, %v2752_v60, %v9768_v53  ;;  %v10122_v52 = vld [vmem:[#allocation89_spill] sm:$0xff] }
 0x295   :  { %10114 = vst [vmem:[#allocation106_spill] sm:$0xff] %v7028_v54  ;;  %v7038_v19 = vpop.permute.xlu0 %2301  ;;  %v1217_v40 = vsel %vm1203_vm4, %v1168_v20, %v10120_v16  ;;  %v10126_v20 = vld [vmem:[#allocation144_spill] sm:$0xff]  ;;  %v10128_v16 = vld [vmem:[#allocation135_spill] sm:$0xff] }
 0x296   :  { %10115 = vst [vmem:[#allocation114_spill] sm:$0xff] %v7030_v55  ;;  %v1266_v55 = vsel %vm1252_vm5, %v1217_v40, %v10122_v52  ;;  %v10130_v52 = vld [vmem:[#allocation19_spill] sm:$0xff] }
 0x297   :  { %10116 = vst [vmem:[#allocation126_spill] sm:$0xff] %v7038_v19  ;;  %v1315_v54 = vsel %vm1301_vm6, %v1266_v55, %v10124_v2  ;;  %v10125_v19 = vld [vmem:[#allocation115_spill] sm:$0xff]  ;;  %v7079_v55 = vrot.slane %v2611_v12, 1 }
 0x298   :  { %v1335_v58 = vsel %vm1301_vm6, %v1286_v46, %v10125_v19  ;;  %v1364_v60 = vsel %vm1350_vm7, %v1315_v54, %v10127_v8  ;;  %v10132_v54 = vld [vmem:[#allocation142_spill] sm:$0xff] }
 0x299   :  { %v1384_v40 = vsel %vm1350_vm7, %v1335_v58, %v10128_v16  ;;  %v1413_v19 = vsel %vm1399_vm8, %v1364_v60, %v10129_v11  ;;  %v10133_v58 = vld [vmem:[#allocation160_spill] sm:$0xff]  ;;  %v2614_v8 = vsel %vm200_vm0, %v2609_v37, %v7079_v55  ;;  %v9771_v16 = vrot.slane %v7036_v10, 1  ;;  %v4877_v11 = vld [vmem:[%s9702_s0 + $0x88] sm:$0xff]  }
 0x29a   :  { %2937 = vrot.lane.b32.xlu2 %v10126_v20, %s4946_s8  ;;  %2857 = vrot.lane.b32.xlu1 %v6301_v49, %s4945_s30  ;;  %v1433_v47 = vsel %vm1399_vm8, %v1384_v40, %v10130_v52  ;;  %v1462_v2 = vsel %vm1448_vm9, %v1413_v19, %v10132_v54  ;;  %v7117_v40 = vld [vmem:[%s9702_s0 + $0x108] sm:$0xff]   ;;  %v4878_v52 = vld [vmem:[%s9702_s0 + $0x38] sm:$0xff]  }
 0x29b   :  { %2802 = vrot.lane.b32.xlu0 %v2755_v59, %s4944_s26  ;;  %v1482_v59 = vsel %vm1448_vm9, %v1433_v47, %v10133_v58  ;;  %v1511_v48 = vsel %vm1497_vm11, %v1462_v2, %v6668_v14  ;;  %v10135_v47 = vld [vmem:[#allocation42_spill] sm:$0xff]  ;;  %v2527_v2 = vshrl.u32 %v6955_v3, 16  ;;  %v2531_v58 = vshll.u32 %v7117_v40, 16 }
 0x29c   :  { %v7085_v46 = vpop.permute.xlu2 %2329  ;;  %v7087_v49 = vpop.permute.xlu1 %2309  ;;  %v1531_v12 = vsel %vm1497_vm11, %v1482_v59, %v6773_v57  ;;  %v9770_v57 = vrot.slane %v7020_v4, 1  ;;  %v1170_v54 = vsel %vm1154_vm3, %v4878_v52, %v10135_v47  ;;  %v10136_v59 = vld [vmem:[#allocation65_spill] sm:$0xff]  ;;  %v10139_v52 = vld [vmem:[#allocation88_spill] sm:$0xff] }
 0x29d   :  { %10131 = vst [vmem:[#allocation154_spill] sm:$0xff] %v7085_v46  ;;  %v7093_v20 = vpop.permute.xlu0 %2307  ;;  %v10140_v46 = vld [vmem:[#allocation107_spill] sm:$0xff] }
 0x29f   :  { %4150 = vmatmul.msk.bf16.gmra.mxu0 %vm1570_vm10, %v1511_v48  ;;  %4160 = vmatmul.msk.bf16.gmra.mxu2 %vm1570_vm10, %v1531_v12  ;;  %v10137_v12 = vld [vmem:[#allocation66_spill] sm:$0xff] }
 0x2a2   :  { %2727 = vrot.lane.b32.xlu2 %v2614_v8, %s4943_s23  ;;  %2480 = vrot.lane.b32.xlu1 %v7020_v4, %s4942_s27  ;;  %v1219_v8 = vsel %vm1203_vm4, %v1170_v54, %v10137_v12  ;;  %v10142_v54 = vld [vmem:[#allocation174_spill] sm:$0xff] }
 0x2a3   :  { %2993 = vrot.lane.b32.xlu0 %v6676_v26, %s4947_s12  ;;  %v10134_v26 = vld [vmem:[#allocation41_spill] sm:$0xff]  ;;  %v1268_v47 = vsel %vm1252_vm5, %v1219_v8, %v10139_v52  ;;  %v2529_v8 = vor.u32 %v2527_v2, %v6993_v29 }
 0x2a4   :  { %v7108_v60 = vpop.permute.xlu2 %2384  ;;  %v7110_v14 = vpop.permute.xlu1 %2315  ;;  %v1190_v19 = vsel %vm1154_vm3, %v4877_v11, %v10134_v26  ;;  %v2777_v11 = vsel %vm445_vm1, %v9770_v57, %v9771_v16  ;;  %v10138_v26 = vld [vmem:[#allocation87_spill] sm:$0xff]  ;;  %v10144_v57 = vld [vmem:[#allocation128_spill] sm:$0xff] }
 0x2a5   :  { %v7119_v37 = vpop.permute.xlu0 %2313  ;;  %v1239_v48 = vsel %vm1203_vm4, %v1190_v19, %v10136_v59  ;;  %v1317_v19 = vsel %vm1301_vm6, %v1268_v47, %v10141_v7  ;;  %v10143_v59 = vld [vmem:[#allocation127_spill] sm:$0xff] }
 0x2a6   :  { %v1288_v53 = vsel %vm1252_vm5, %v1239_v48, %v10138_v26  ;;  %v1366_v48 = vsel %vm1350_vm7, %v1317_v19, %v10144_v57  ;;  %v10146_v26 = vld [vmem:[#allocation12_spill] sm:$0xff]  ;;  %v10149_v57 = vld [vmem:[#allocation141_spill] sm:$0xff] }
 0x2a7   :  { %v1337_v38 = vsel %vm1301_vm6, %v1288_v53, %v10140_v46  ;;  %v7160_v53 = vrot.slane %v2531_v58, 1  ;;  %v10145_v46 = vld [vmem:[#allocation11_spill] sm:$0xff]  ;;  %v1415_v52 = vsel %vm1399_vm8, %v1366_v48, %v10146_v26 }
 0x2a8   :  { %v1386_v12 = vsel %vm1350_vm7, %v1337_v38, %v10143_v59  ;;  %v10148_v38 = vld [vmem:[#allocation37_spill] sm:$0xff]  ;;  %v10155_v26 = vld [vmem:[#allocation55_spill] sm:$0xff] }
 0x2a9   :  { %v1435_v7 = vsel %vm1399_vm8, %v1386_v12, %v10145_v46  ;;  %v2534_v58 = vsel %vm200_vm0, %v2529_v8, %v7160_v53  ;;  %v7197_v12 = vld [vmem:[%s9702_s0 + $0x160] sm:$0xff]   ;;  %v10154_v46 = vld [vmem:[#allocation28_spill] sm:$0xff] }
 0x2aa   :  { %2959 = vrot.lane.b32.xlu2 %v10142_v54, %s4946_s8  ;;  %2879 = vrot.lane.b32.xlu1 %v6433_v28, %s4945_s30  ;;  %v1484_v54 = vsel %vm1448_vm9, %v1435_v7, %v10148_v38  ;;  %v4879_v8 = vld [vmem:[%s9702_s0 + $0x40] sm:$0xff]   ;;  %v4880_v7 = vld [vmem:[%s9702_s0 + $0x90] sm:$0xff]   ;;  %v2615_v38 = vshrl.u32 %v7036_v10, 16 }
 0x2ab   :  { %2824 = vrot.lane.b32.xlu0 %v2777_v11, %s4944_s26  ;;  %v1464_v11 = vsel %vm1448_vm9, %v1415_v52, %v10149_v57  ;;  %v1533_v2 = vsel %vm1497_vm11, %v1484_v54, %v6662_v9  ;;  %v9772_v9 = vrot.slane %v7117_v40, 1  ;;  %v1192_v52 = vsel %vm1154_vm3, %v4880_v7, %v10155_v26  ;;  %v10156_v57 = vld [vmem:[#allocation56_spill] sm:$0xff]  ;;  %v10160_v7 = vld [vmem:[#allocation99_spill] sm:$0xff] }
 0x2ac   :  { %v7166_v47 = vpop.permute.xlu2 %2390  ;;  %v7168_v28 = vpop.permute.xlu1 %2321  ;;  %v1513_v29 = vsel %vm1497_vm11, %v1464_v11, %v6664_v50  ;;  %v2619_v54 = vshll.u32 %v7197_v12, 16 }
 0x2ad   :  { %10147 = vst [vmem:[#allocation159_spill] sm:$0xff] %v7168_v28  ;;  %v7174_v19 = vpop.permute.xlu0 %2319  ;;  %v10162_v28 = vld [vmem:[#allocation119_spill] sm:$0xff] }
 0x2ae   :  { %10150 = vst [vmem:[#allocation157_spill] sm:$0xff] %v7174_v19  ;;  %v10182_v19 = vld [vmem:[#allocation112_spill] sm:$0xff] }
 0x2af   :  { %4151 = vmatmul.msk.bf16.gmra.mxu0 %vm1570_vm10, %v1513_v29  ;;  %4161 = vmatmul.msk.bf16.gmra.mxu2 %vm1570_vm10, %v1533_v2  ;;  %v10157_v29 = vld [vmem:[#allocation79_spill] sm:$0xff] }
 0x2b0   :  { %v1241_v2 = vsel %vm1203_vm4, %v1192_v52, %v10157_v29  ;;  %v10163_v52 = vld [vmem:[#allocation143_spill] sm:$0xff] }
 0x2b1   :  { %v1290_v26 = vsel %vm1252_vm5, %v1241_v2, %v10160_v7  ;;  %v10165_v29 = vld [vmem:[#allocation139_spill] sm:$0xff]  ;;  %v10166_v2 = vld [vmem:[#allocation5_spill] sm:$0xff] }
 0x2b2   :  { %2707 = vrot.lane.b32.xlu2 %v2534_v58, %s4943_s23  ;;  %2460 = vrot.lane.b32.xlu1 %v6955_v3, %s4942_s27  ;;  %v10158_v58 = vrot.slane %v6955_v3, 1  ;;  %v7235_v3 = vld [vmem:[%s9702_s0 + $0x10c] sm:$0xff]  }
 0x2b3   :  { %3015 = vrot.lane.b32.xlu0 %v6843_v39, %s4947_s12  ;;  %v1172_v39 = vsel %vm1154_vm3, %v4879_v8, %v10154_v46  ;;  %v10159_v46 = vld [vmem:[#allocation80_spill] sm:$0xff] }
 0x2b4   :  { %v7189_v59 = vpop.permute.xlu2 %2396  ;;  %v7191_v50 = vpop.permute.xlu1 %2327  ;;  %v1221_v11 = vsel %vm1203_vm4, %v1172_v39, %v10156_v57  ;;  %v2757_v8 = vsel %vm445_vm1, %v10158_v58, %v9772_v9  ;;  %v1339_v39 = vsel %vm1301_vm6, %v1290_v26, %v10162_v28  ;;  %v10164_v57 = vld [vmem:[#allocation120_spill] sm:$0xff]  ;;  %v2617_v28 = vor.u32 %v2615_v38, %v7079_v55 }
 0x2b5   :  { %10151 = vst [vmem:[#allocation140_spill] sm:$0xff] %v7189_v59  ;;  %v7199_v48 = vpop.permute.xlu0 %2325  ;;  %v1270_v16 = vsel %vm1252_vm5, %v1221_v11, %v10159_v46  ;;  %v10167_v46 = vld [vmem:[#allocation25_spill] sm:$0xff]  ;;  %v10172_v38 = vld [vmem:[#allocation40_spill] sm:$0xff] }
 0x2b6   :  { %10152 = vst [vmem:[#allocation18_spill] sm:$0xff] %v7191_v50  ;;  %v10161_v50 = vld [vmem:[#allocation100_spill] sm:$0xff] }
 0x2b7   :  { %10153 = vst [vmem:[#allocation36_spill] sm:$0xff] %v7199_v48  ;;  %v1319_v48 = vsel %vm1301_vm6, %v1270_v16, %v10161_v50  ;;  %v1388_v16 = vsel %vm1350_vm7, %v1339_v39, %v10165_v29  ;;  %v7245_v50 = vrot.slane %v2619_v54, 1  ;;  %v10171_v39 = vld [vmem:[#allocation169_spill] sm:$0xff] }
 0x2b8   :  { %v1368_v11 = vsel %vm1350_vm7, %v1319_v48, %v10164_v57  ;;  %v1437_v7 = vsel %vm1399_vm8, %v1388_v16, %v10167_v46  ;;  %v10170_v48 = vld [vmem:[#allocation26_spill] sm:$0xff]  ;;  %v7284_v46 = vld [vmem:[%s9702_s0 + $0x110] sm:$0xff]  }
 0x2b9   :  { %v1417_v58 = vsel %vm1399_vm8, %v1368_v11, %v10166_v2  ;;  %v2622_v16 = vsel %vm200_vm0, %v2617_v28, %v7245_v50 }
 0x2ba   :  { %2939 = vrot.lane.b32.xlu2 %v10163_v52, %s4946_s8  ;;  %2859 = vrot.lane.b32.xlu1 %v7235_v3, %s4945_s30  ;;  %v1466_v57 = vsel %vm1448_vm9, %v1417_v58, %v10170_v48  ;;  %v4882_v48 = vld [vmem:[%s9702_s0 + $0x48] sm:$0xff]  }
 0x2bb   :  { %2804 = vrot.lane.b32.xlu0 %v2757_v8, %s4944_s26  ;;  %v1486_v8 = vsel %vm1448_vm9, %v1437_v7, %v10171_v39  ;;  %v1515_v54 = vsel %vm1497_vm11, %v1466_v57, %v10172_v38  ;;  %v4883_v39 = vld [vmem:[%s9702_s0 + $0x98] sm:$0xff]  }
 0x2bc   :  { %v7251_v26 = vpop.f32.mrf.mxu0  ;;  %v7253_v52 = vpop.permute.xlu2 %2402  ;;  %v1535_v11 = vsel %vm1497_vm11, %v1486_v8, %v6829_v27  ;;  %v10175_v8 = vld [vmem:[#allocation54_spill] sm:$0xff] }
 0x2bd   :  { %10168 = vst [vmem:[#allocation153_spill] sm:$0xff] %v7251_v26  ;;  %v7259_v29 = vpop.permute.xlu1 %2382  ;;  %v7261_v55 = vpop.permute.xlu0 %2380  ;;  %v1194_v38 = vsel %vm1154_vm3, %v4883_v39, %v10175_v8  ;;  %v10177_v27 = vld [vmem:[#allocation78_spill] sm:$0xff] }
 0x2be   :  { %10169 = vst [vmem:[#allocation162_spill] sm:$0xff] %v7253_v52  ;;  %v1243_v26 = vsel %vm1203_vm4, %v1194_v38, %v10177_v27  ;;  %v10180_v52 = vld [vmem:[#allocation92_spill] sm:$0xff]  ;;  %v10181_v39 = vld [vmem:[#allocation98_spill] sm:$0xff]  ;;  %v10184_v27 = vld [vmem:[#allocation171_spill] sm:$0xff] }
 0x2bf   :  { %4152 = vmatmul.msk.bf16.gmra.mxu0 %vm1570_vm10, %v1515_v54  ;;  %4162 = vmatmul.msk.bf16.gmra.mxu2 %vm1570_vm10, %v1535_v11  ;;  %v2535_v54 = vshrl.u32 %v7117_v40, 16  ;;  %v2539_v11 = vshll.u32 %v7284_v46, 16  ;;  %v1292_v8 = vsel %vm1252_vm5, %v1243_v26, %v10181_v39  ;;  %v10186_v38 = vld [vmem:[#allocation138_spill] sm:$0xff]  ;;  %v10190_v39 = vld [vmem:[#allocation148_spill] sm:$0xff] }
 0x2c1   :  { %v2537_v26 = vor.u32 %v2535_v54, %v7160_v53 }
 0x2c2   :  { %2729 = vrot.lane.b32.xlu2 %v2622_v16, %s4943_s23  ;;  %2482 = vrot.lane.b32.xlu1 %v7036_v10, %s4942_s27  ;;  %v10176_v16 = vld [vmem:[#allocation70_spill] sm:$0xff] }
 0x2c3   :  { %2995 = vrot.lane.b32.xlu0 %v6673_v22, %s4947_s12  ;;  %v10174_v22 = vld [vmem:[#allocation46_spill] sm:$0xff] }
 0x2c4   :  { %v7276_v2 = vpop.f32.mrf.mxu0  ;;  %v7278_v58 = vpop.permute.xlu2 %2408  ;;  %v1174_v57 = vsel %vm1154_vm3, %v4882_v48, %v10174_v22  ;;  %v10179_v48 = vrot.slane %v7036_v10, 1  ;;  %v10185_v10 = vld [vmem:[#allocation132_spill] sm:$0xff] }
 0x2c5   :  { %10173 = vst [vmem:[#allocation165_spill] sm:$0xff] %v7276_v2  ;;  %v7286_v28 = vpop.permute.xlu1 %2388  ;;  %v7288_v7 = vpop.permute.xlu0 %2386  ;;  %v1223_v9 = vsel %vm1203_vm4, %v1174_v57, %v10176_v16  ;;  %v10178_v2 = vrot.slane %v7197_v12, 1  ;;  %v1341_v57 = vsel %vm1301_vm6, %v1292_v8, %v10183_v43  ;;  %v10191_v8 = vld [vmem:[#allocation168_spill] sm:$0xff] }
 0x2c6   :  { %v1272_v59 = vsel %vm1252_vm5, %v1223_v9, %v10180_v52  ;;  %v1390_v9 = vsel %vm1350_vm7, %v1341_v57, %v10186_v38  ;;  %v10188_v52 = vld [vmem:[#allocation23_spill] sm:$0xff] }
 0x2c7   :  { %v2779_v22 = vsel %vm445_vm1, %v10179_v48, %v10178_v2  ;;  %v1321_v4 = vsel %vm1301_vm6, %v1272_v59, %v10182_v19  ;;  %v7329_v19 = vrot.slane %v2539_v11, 1  ;;  %v10187_v59 = vld [vmem:[#allocation16_spill] sm:$0xff]  ;;  %v1439_v16 = vsel %vm1399_vm8, %v1390_v9, %v10188_v52  ;;  %v10199_v52 = vld [vmem:[#allocation45_spill] sm:$0xff] }
 0x2c8   :  { %v1370_v2 = vsel %vm1350_vm7, %v1321_v4, %v10185_v10  ;;  %v1488_v57 = vsel %vm1448_vm9, %v1439_v16, %v10191_v8 }
 0x2c9   :  { %v1419_v43 = vsel %vm1399_vm8, %v1370_v2, %v10187_v59  ;;  %v1537_v11 = vsel %vm1497_vm11, %v1488_v57, %v6823_v36  ;;  %v9774_v36 = vrot.slane %v7284_v46, 1  ;;  %v7366_v2 = vld [vmem:[%s9702_s0 + $0x168] sm:$0xff]   ;;  %v10201_v57 = vld [vmem:[#allocation69_spill] sm:$0xff] }
 0x2ca   :  { %2961 = vrot.lane.b32.xlu2 %v10184_v27, %s4946_s8  ;;  %2881 = vrot.lane.b32.xlu1 %v10068_v1, %s4945_s30  ;;  %v1468_v4 = vsel %vm1448_vm9, %v1419_v43, %v10190_v39  ;;  %v2542_v27 = vsel %vm200_vm0, %v2537_v26, %v7329_v19  ;;  %v4884_v26 = vld [vmem:[%s9702_s0 + $0xa0] sm:$0xff]   ;;  %v4885_v43 = vld [vmem:[%s9702_s0 + $0x50] sm:$0xff]   ;;  %v2627_v39 = vshll.u32 %v7366_v2, 16 }
 0x2cb   :  { %2826 = vrot.lane.b32.xlu0 %v2779_v22, %s4944_s26  ;;  %v1517_v54 = vsel %vm1497_vm11, %v1468_v4, %v6694_v32  ;;  %v1176_v16 = vsel %vm1154_vm3, %v4885_v43, %v10199_v52  ;;  %v10200_v4 = vld [vmem:[#allocation68_spill] sm:$0xff]  ;;  %v10204_v43 = vld [vmem:[#allocation91_spill] sm:$0xff] }
 0x2cc   :  { %v1637_v48 = vpop.f32.mrf.mxu0  ;;  %v7335_v1 = vpop.permute.xlu2 %2414 }
 0x2cd   :  { %10189 = vst [vmem:[#allocation20_spill] sm:$0xff] %v7335_v1  ;;  %v7341_v22 = vpop.permute.xlu1 %2394  ;;  %v7343_v53 = vpop.permute.xlu0 %2392  ;;  %v2623_v48 = vshrl.u32 %v7197_v12, 16 }
 0x2ce   :  { %10192 = vst [vmem:[#allocation38_spill] sm:$0xff] %v7341_v22  ;;  %v10224_v22 = vld [vmem:[#allocation103_spill] sm:$0xff] }
 0x2cf   :  { %10193 = vst [vmem:[#allocation62_spill] sm:$0xff] %v7343_v53  ;;  %4153 = vmatmul.msk.bf16.gmra.mxu0 %vm1570_vm10, %v1517_v54  ;;  %4163 = vmatmul.msk.bf16.gmra.mxu2 %vm1570_vm10, %v1537_v11  ;;  %v1225_v54 = vsel %vm1203_vm4, %v1176_v16, %v10201_v57  ;;  %v10202_v11 = vrot.slane %v7117_v40, 1  ;;  %v10207_v16 = vld [vmem:[#allocation151_spill] sm:$0xff]  ;;  %v10225_v53 = vld [vmem:[#allocation122_spill] sm:$0xff] }
 0x2d0   :  { %v1274_v52 = vsel %vm1252_vm5, %v1225_v54, %v10204_v43  ;;  %v10209_v57 = vld [vmem:[#allocation131_spill] sm:$0xff]  ;;  %v7416_v54 = vrot.slane %v2627_v39, 1 }
 0x2d2   :  { %2709 = vrot.lane.b32.xlu2 %v2542_v27, %s4943_s23  ;;  %2462 = vrot.lane.b32.xlu1 %v7117_v40, %s4942_s27  ;;  %v2759_v27 = vsel %vm445_vm1, %v10202_v11, %v9774_v36  ;;  %v7406_v40 = vld [vmem:[%s9702_s0 + $0x114] sm:$0xff]   ;;  %v10210_v11 = vld [vmem:[#allocation14_spill] sm:$0xff] }
 0x2d3   :  { %3017 = vrot.lane.b32.xlu0 %v6840_v61, %s4947_s12  ;;  %v10198_v61 = vld [vmem:[#allocation44_spill] sm:$0xff]  ;;  %v10219_v36 = vld [vmem:[#allocation82_spill] sm:$0xff] }
 0x2d4   :  { %v7358_v10 = vpop.f32.mrf.mxu0  ;;  %v7360_v32 = vpop.permute.xlu2 %2420  ;;  %v1196_v59 = vsel %vm1154_vm3, %v4884_v26, %v10198_v61  ;;  %v10203_v26 = vld [vmem:[#allocation90_spill] sm:$0xff] }
 0x2d5   :  { %10194 = vst [vmem:[#allocation63_spill] sm:$0xff] %v7358_v10  ;;  %v7368_v38 = vpop.permute.xlu1 %2400  ;;  %v7370_v9 = vpop.permute.xlu0 %2398  ;;  %v1245_v8 = vsel %vm1203_vm4, %v1196_v59, %v10200_v4  ;;  %v10205_v10 = vld [vmem:[#allocation110_spill] sm:$0xff] }
 0x2d6   :  { %10195 = vst [vmem:[#allocation84_spill] sm:$0xff] %v7360_v32  ;;  %v1294_v61 = vsel %vm1252_vm5, %v1245_v8, %v10203_v26  ;;  %v10206_v32 = vld [vmem:[#allocation111_spill] sm:$0xff]  ;;  %v10208_v4 = vld [vmem:[#allocation130_spill] sm:$0xff] }
 0x2d7   :  { %10196 = vst [vmem:[#allocation85_spill] sm:$0xff] %v7368_v38  ;;  %v1343_v38 = vsel %vm1301_vm6, %v1294_v61, %v10205_v10  ;;  %v1323_v59 = vsel %vm1301_vm6, %v1274_v52, %v10206_v32  ;;  %v2625_v32 = vor.u32 %v2623_v48, %v7245_v50  ;;  %v10211_v61 = vld [vmem:[#allocation15_spill] sm:$0xff] }
 0x2d8   :  { %10197 = vst [vmem:[#allocation104_spill] sm:$0xff] %v7370_v9  ;;  %v1392_v8 = vsel %vm1350_vm7, %v1343_v38, %v10208_v4  ;;  %v1372_v10 = vsel %vm1350_vm7, %v1323_v59, %v10209_v57  ;;  %v10213_v38 = vld [vmem:[#allocation146_spill] sm:$0xff]  ;;  %v10214_v59 = vld [vmem:[#allocation147_spill] sm:$0xff] }
 0x2d9   :  { %v1441_v26 = vsel %vm1399_vm8, %v1392_v8, %v10210_v11  ;;  %v1421_v43 = vsel %vm1399_vm8, %v1372_v10, %v10211_v61  ;;  %v2630_v8 = vsel %vm200_vm0, %v2625_v32, %v7416_v54 }
 0x2da   :  { %2941 = vrot.lane.b32.xlu2 %v10207_v16, %s4946_s8  ;;  %2861 = vrot.lane.b32.xlu1 %v7406_v40, %s4945_s30  ;;  %v1490_v4 = vsel %vm1448_vm9, %v1441_v26, %v10213_v38  ;;  %v7455_v26 = vld [vmem:[%s9702_s0 + $0x118] sm:$0xff]   ;;  %v10216_v38 = vld [vmem:[#allocation33_spill] sm:$0xff] }
 0x2db   :  { %2806 = vrot.lane.b32.xlu0 %v2759_v27, %s4944_s26  ;;  %v1470_v27 = vsel %vm1448_vm9, %v1421_v43, %v10214_v59  ;;  %v1539_v39 = vsel %vm1497_vm11, %v1490_v4, %v6690_v25  ;;  %v4887_v43 = vld [vmem:[%s9702_s0 + $0x58] sm:$0xff]   ;;  %v4888_v4 = vld [vmem:[%s9702_s0 + $0xa8] sm:$0xff]  }
 0x2dc   :  { %v7422_v52 = vpop.f32.mrf.mxu0  ;;  %v7424_v16 = vpop.permute.xlu2 %2703  ;;  %v1519_v48 = vsel %vm1497_vm11, %v1470_v27, %v6692_v30  ;;  %v10217_v59 = vld [vmem:[#allocation58_spill] sm:$0xff] }
 0x2dd   :  { %10212 = vst [vmem:[#allocation105_spill] sm:$0xff] %v7422_v52  ;;  %v7430_v57 = vpop.permute.xlu1 %2406  ;;  %v7432_v50 = vpop.permute.xlu0 %2404  ;;  %v1198_v27 = vsel %vm1154_vm3, %v4888_v4, %v10217_v59  ;;  %v10222_v52 = vld [vmem:[#allocation83_spill] sm:$0xff]  ;;  %v10223_v4 = vld [vmem:[#allocation102_spill] sm:$0xff] }
 0x2de   :  { %v1247_v25 = vsel %vm1203_vm4, %v1198_v27, %v10219_v36  ;;  %v10227_v36 = vld [vmem:[#allocation170_spill] sm:$0xff]  ;;  %v10230_v27 = vld [vmem:[#allocation8_spill] sm:$0xff] }
 0x2df   :  { %4154 = vmatmul.msk.bf16.gmra.mxu0 %vm1570_vm10, %v1519_v48  ;;  %4164 = vmatmul.msk.bf16.gmra.mxu2 %vm1570_vm10, %v1539_v39  ;;  %v2543_v48 = vshrl.u32 %v7284_v46, 16  ;;  %v2547_v39 = vshll.u32 %v7455_v26, 16  ;;  %v1296_v59 = vsel %vm1252_vm5, %v1247_v25, %v10223_v4 }
 0x2e1   :  { %v7507_v25 = vrot.slane %v2547_v39, 1 }
 0x2e2   :  { %v7442_v10 = vpop.f32.mrf.mxu2  ;;  %2731 = vrot.lane.b32.xlu2 %v2630_v8, %s4943_s23  ;;  %2484 = vrot.lane.b32.xlu1 %v7197_v12, %s4942_s27  ;;  %v10218_v8 = vld [vmem:[#allocation59_spill] sm:$0xff] }
 0x2e3   :  { %10215 = vst [vmem:[#allocation124_spill] sm:$0xff] %v7442_v10  ;;  %2997 = vrot.lane.b32.xlu0 %v6717_v44, %s4947_s12  ;;  %v1178_v44 = vsel %vm1154_vm3, %v4887_v43, %v10216_v38  ;;  %v10220_v10 = vrot.slane %v7366_v2, 1  ;;  %v10221_v43 = vrot.slane %v7197_v12, 1  ;;  %v7497_v12 = vld [vmem:[%s9702_s0 + $0x16c] sm:$0xff]  }
 0x2e4   :  { %v1643_v30 = vpop.f32.mrf.mxu0  ;;  %v7449_v11 = vpop.permute.xlu2 %2935 }
 0x2e5   :  { %v7457_v32 = vpop.permute.xlu1 %2412  ;;  %v7459_v61 = vpop.permute.xlu0 %2410  ;;  %v1227_v30 = vsel %vm1203_vm4, %v1178_v44, %v10218_v8  ;;  %v2781_v38 = vsel %vm445_vm1, %v10221_v43, %v10220_v10  ;;  %v1345_v44 = vsel %vm1301_vm6, %v1296_v59, %v10225_v53  ;;  %v2545_v53 = vor.u32 %v2543_v48, %v7329_v19  ;;  %v10231_v43 = vld [vmem:[#allocation29_spill] sm:$0xff] }
 0x2e6   :  { %v1276_v9 = vsel %vm1252_vm5, %v1227_v30, %v10222_v52  ;;  %v10228_v52 = vld [vmem:[#allocation123_spill] sm:$0xff] }
 0x2e7   :  { %v1325_v1 = vsel %vm1301_vm6, %v1276_v9, %v10224_v22  ;;  %v10229_v22 = vld [vmem:[#allocation7_spill] sm:$0xff] }
 0x2e8   :  { %v1374_v10 = vsel %vm1350_vm7, %v1325_v1, %v10228_v52  ;;  %v1394_v9 = vsel %vm1350_vm7, %v1345_v44, %v10229_v22  ;;  %v10233_v1 = vld [vmem:[#allocation30_spill] sm:$0xff] }
 0x2e9   :  { %v1423_v30 = vsel %vm1399_vm8, %v1374_v10, %v10230_v27  ;;  %v1443_v4 = vsel %vm1399_vm8, %v1394_v9, %v10231_v43  ;;  %v2550_v10 = vsel %vm200_vm0, %v2545_v53, %v7507_v25  ;;  %v7546_v9 = vld [vmem:[%s9702_s0 + $0x170] sm:$0xff]   ;;  %v10236_v43 = vld [vmem:[#allocation57_spill] sm:$0xff] }
 0x2ea   :  { %v7490_v8 = vpop.f32.mrf.mxu2  ;;  %2963 = vrot.lane.b32.xlu2 %v10227_v36, %s4946_s8  ;;  %2883 = vrot.lane.b32.xlu1 %v7497_v12, %s4945_s30  ;;  %v1472_v52 = vsel %vm1448_vm9, %v1423_v30, %v10233_v1  ;;  %v4890_v30 = vld [vmem:[%s9702_s0 + $0xb0] sm:$0xff]   ;;  %v2635_v1 = vshll.u32 %v7546_v9, 16 }
 0x2eb   :  { %10226 = vst [vmem:[#allocation125_spill] sm:$0xff] %v7490_v8  ;;  %2828 = vrot.lane.b32.xlu0 %v2781_v38, %s4944_s26  ;;  %v1492_v38 = vsel %vm1448_vm9, %v1443_v4, %v6579_v34  ;;  %v1521_v48 = vsel %vm1497_vm11, %v1472_v52, %v6609_v35  ;;  %v2631_v4 = vshrl.u32 %v7366_v2, 16  ;;  %v10237_v52 = vld [vmem:[#allocation81_spill] sm:$0xff] }
 0x2ec   :  { %v7513_v59 = vpop.f32.mrf.mxu0  ;;  %v7515_v36 = vpop.permute.xlu2 %2705  ;;  %v1541_v39 = vsel %vm1497_vm11, %v1492_v38, %v6869_v31  ;;  %v9775_v31 = vrot.slane %v7455_v26, 1  ;;  %v10240_v8 = vld [vmem:[#allocation121_spill] sm:$0xff] }
 0x2ed   :  { %10232 = vst [vmem:[#allocation9_spill] sm:$0xff] %v7513_v59  ;;  %v7521_v44 = vpop.permute.xlu1 %2418  ;;  %v7523_v19 = vpop.permute.xlu0 %2416 }
 0x2ef   :  { %4155 = vmatmul.msk.bf16.gmra.mxu0 %vm1570_vm10, %v1521_v48  ;;  %4165 = vmatmul.msk.bf16.gmra.mxu2 %vm1570_vm10, %v1541_v39  ;;  %v10238_v48 = vrot.slane %v7284_v46, 1 }
 0x2f1   :  { %v2761_v39 = vsel %vm445_vm1, %v10238_v48, %v9775_v31  ;;  %v10245_v31 = vld [vmem:[#allocation176_spill] sm:$0xff] }
 0x2f2   :  { %v1689_v22 = vpop.f32.mrf.mxu2  ;;  %2711 = vrot.lane.b32.xlu2 %v2550_v10, %s4943_s23  ;;  %2464 = vrot.lane.b32.xlu1 %v7284_v46, %s4942_s27  ;;  %v10239_v10 = vld [vmem:[#allocation101_spill] sm:$0xff]  ;;  %v10242_v46 = vld [vmem:[#allocation150_spill] sm:$0xff] }
 0x2f3   :  { %3019 = vrot.lane.b32.xlu0 %v6837_v51, %s4947_s12  ;;  %v1200_v51 = vsel %vm1154_vm3, %v4890_v30, %v10236_v43  ;;  %v4891_v30 = vld [vmem:[%s9702_s0 + $0xe4] sm:$0xff] }
 0x2f4   :  { %v7538_v34 = vpop.f32.mrf.mxu0  ;;  %v7540_v35 = vpop.permute.xlu2 %2937  ;;  %v1249_v38 = vsel %vm1203_vm4, %v1200_v51, %v10237_v52  ;;  %v3040_v43 = vsel %vm1154_vm3, %v4891_v30, %v6927_v21  ;;  %v10243_v21 = vld [vmem:[#allocation6_spill] sm:$0xff] }
 0x2f5   :  { %10234 = vst [vmem:[#allocation10_spill] sm:$0xff] %v7538_v34  ;;  %v2457_v53 = vpop.permute.xlu1 %2456  ;;  %v7548_v27 = vpop.permute.xlu0 %2422  ;;  %v1298_v22 = vsel %vm1252_vm5, %v1249_v38, %v10239_v10  ;;  %v3088_v51 = vsel %vm1203_vm4, %v3040_v43, %v7261_v55  ;;  %v7582_v38 = vld [vmem:[%s9702_s0 + $0x11c] sm:$0xff]   ;;  %v2633_v55 = vor.u32 %v2631_v4, %v7416_v54  ;;  %v7591_v10 = vrot.slane %v2635_v1, 1 }
 0x2f6   :  { %10235 = vst [vmem:[#allocation31_spill] sm:$0xff] %v7548_v27  ;;  %v1347_v34 = vsel %vm1301_vm6, %v1298_v22, %v10240_v8  ;;  %v3136_v8 = vsel %vm1252_vm5, %v3088_v51, %v2457_v53  ;;  %v10244_v22 = vld [vmem:[#allocation27_spill] sm:$0xff] }
 0x2f7   :  { %v1396_v48 = vsel %vm1350_vm7, %v1347_v34, %v10243_v21  ;;  %v3184_v34 = vsel %vm1301_vm6, %v3136_v8, %v7424_v16  ;;  %v2638_v4 = vsel %vm200_vm0, %v2633_v55, %v7591_v10  ;;  %v2551_v55 = vshrl.u32 %v7455_v26, 16 }
 0x2f8   :  { %v1445_v30 = vsel %vm1399_vm8, %v1396_v48, %v10244_v22  ;;  %v10246_v48 = vld [vmem:[#allocation47_spill] sm:$0xff] }
 0x2fa   :  { %v7575_v52 = vpop.f32.mrf.mxu2  ;;  %2943 = vrot.lane.b32.xlu2 %v10242_v46, %s4946_s8  ;;  %2863 = vrot.lane.b32.xlu1 %v7582_v38, %s4945_s30 }
 0x2fb   :  { %10241 = vst [vmem:[#allocation32_spill] sm:$0xff] %v7575_v52  ;;  %2808 = vrot.lane.b32.xlu0 %v2761_v39, %s4944_s26  ;;  %v1494_v52 = vsel %vm1448_vm9, %v1445_v30, %v10245_v31  ;;  %v2782_v31 = vrot.slane %v7546_v9, 1  ;;  %v10247_v30 = vld [vmem:[#allocation71_spill] sm:$0xff] }
 0x2fc   :  { %v1650_v43 = vpop.f32.mrf.mxu0  ;;  %v7595_v46 = vpop.permute.xlu2 %2727  ;;  %v1543_v53 = vsel %vm1497_vm11, %v1494_v52, %v6862_v18 }
 0x2fd   :  { %v2856_v59 = vpop.permute.xlu1 %2855  ;;  %v2801_v27 = vpop.permute.xlu0 %2800 }
 0x2fe   :  { %v3232_v54 = vsel %vm1350_vm7, %v3184_v34, %v2801_v27 }
 0x2ff   :  { %4166 = vmatmul.msk.bf16.gmra.mxu2 %vm1570_vm10, %v1543_v53  ;;  %v3280_v1 = vsel %vm1399_vm8, %v3232_v54, %v2856_v59  ;;  %v7623_v59 = vld [vmem:[%s9702_s0 + $0x120] sm:$0xff]  }
 0x300   :  { %v3328_v52 = vsel %vm1448_vm9, %v3280_v1, %v7449_v11  ;;  %v2555_v22 = vshll.u32 %v7623_v59, 16  ;;  %v10248_v11 = vrot.slane %v7366_v2, 1  ;;  %v10249_v53 = vld [vmem:[#allocation93_spill] sm:$0xff] }
 0x302   :  { %v7608_v39 = vpop.f32.mrf.mxu2  ;;  %2733 = vrot.lane.b32.xlu2 %v2638_v4, %s4943_s23  ;;  %2486 = vrot.lane.b32.xlu1 %v7366_v2, %s4942_s27  ;;  %v2783_v34 = vsel %vm445_vm1, %v10248_v11, %v2782_v31  ;;  %v4894_v4 = vld [vmem:[%s9702_s0 + $0xec] sm:$0xff]   ;;  %v7659_v2 = vld [vmem:[%s9702_s0 + $0x174] sm:$0xff]  }
 0x303   :  { %2999 = vrot.lane.b32.xlu0 %v6710_v24, %s4947_s12  ;;  %v4893_v24 = vld [vmem:[%s9702_s0 + $0xb8] sm:$0xff]   ;;  %v3042_v1 = vsel %vm1154_vm3, %v4894_v4, %v6920_v56 }
 0x304   :  { %v7615_v18 = vpop.f32.mrf.mxu0  ;;  %v7617_v16 = vpop.permute.xlu2 %2959  ;;  %v1202_v8 = vsel %vm1154_vm3, %v4893_v24, %v10246_v48  ;;  %v10251_v48 = vld [vmem:[#allocation133_spill] sm:$0xff] }
 0x305   :  { %v2459_v27 = vpop.permute.xlu1 %2458  ;;  %v2992_v51 = vpop.permute.xlu0 %2991  ;;  %v1251_v43 = vsel %vm1203_vm4, %v1202_v8, %v10247_v30  ;;  %v7668_v30 = vrot.slane %v2555_v22, 1 }
 0x306   :  { %v3376_v21 = vsel %vm1497_vm11, %v3328_v52, %v2992_v51  ;;  %v1300_v54 = vsel %vm1252_vm5, %v1251_v43, %v10249_v53  ;;  %v10250_v51 = vld [vmem:[#allocation113_spill] sm:$0xff] }
 0x307   :  { %4231 = vmatmul.msk.bf16.vlgmr.msra.gmra.mxu1 %vm1570_vm10, %v3376_v21  ;;  %v1349_v52 = vsel %vm1301_vm6, %v1300_v54, %v10250_v51  ;;  %v3090_v21 = vsel %vm1203_vm4, %v3042_v1, %v7259_v29  ;;  %v2553_v29 = vor.u32 %v2551_v55, %v7507_v25  ;;  %v10253_v54 = vld [vmem:[#allocation152_spill] sm:$0xff] }
 0x308   :  { %v1398_v56 = vsel %vm1350_vm7, %v1349_v52, %v10251_v48  ;;  %v3138_v8 = vsel %vm1252_vm5, %v3090_v21, %v2459_v27  ;;  %v2762_v21 = vrot.slane %v7623_v59, 1 }
 0x309   :  { %v3186_v27 = vsel %vm1301_vm6, %v3138_v8, %v7515_v36  ;;  %v2558_v22 = vsel %vm200_vm0, %v2553_v29, %v7668_v30 }
 0x30a   :  { %v1695_v24 = vpop.f32.mrf.mxu2  ;;  %2965 = vrot.lane.b32.xlu2 %v6592_v15, %s4946_s8  ;;  %2885 = vrot.lane.b32.xlu1 %v7659_v2, %s4945_s30  ;;  %v10252_v15 = vld [vmem:[#allocation17_spill] sm:$0xff] }
 0x30b   :  { %2830 = vrot.lane.b32.xlu0 %v2783_v34, %s4944_s26  ;;  %v1447_v43 = vsel %vm1399_vm8, %v1398_v56, %v10252_v15  ;;  %v7700_v24 = vld [vmem:[%s9702_s0 + $0x178] sm:$0xff]  }
 0x30c   :  { %v7672_v11 = vpop.f32.mrf.mxu0  ;;  %v7674_v53 = vpop.permute.xlu2 %2707  ;;  %v1496_v4 = vsel %vm1448_vm9, %v1447_v43, %v10253_v54  ;;  %v2643_v15 = vshll.u32 %v7700_v24, 16  ;;  %v10254_v43 = vrot.slane %v7455_v26, 1 }
 0x30d   :  { %v2858_v1 = vpop.permute.xlu1 %2857  ;;  %v2803_v51 = vpop.permute.xlu0 %2802  ;;  %v1545_v25 = vsel %vm1497_vm11, %v1496_v4, %v6742_v17  ;;  %v7716_v4 = vld [vmem:[%s9702_s0 + $0x144] sm:$0xff]  }
 0x30e   :  { %v3234_v55 = vsel %vm1350_vm7, %v3186_v27, %v2803_v51  ;;  %v2763_v54 = vsel %vm445_vm1, %v10254_v43, %v2762_v21  ;;  %v10255_v27 = vld [vmem:[#allocation149_spill] sm:$0xff] }
 0x30f   :  { %4167 = vmatmul.msk.bf16.gmra.mxu2 %vm1570_vm10, %v1545_v25  ;;  %v3282_v34 = vsel %vm1399_vm8, %v3234_v55, %v2858_v1 }
 0x310   :  { %v3330_v8 = vsel %vm1448_vm9, %v3282_v34, %v7540_v35  ;;  %v3064_v35 = vsel %vm1154_vm3, %v7716_v4, %v7093_v20 }
 0x311   :  { %v3112_v1 = vsel %vm1203_vm4, %v3064_v35, %v7432_v50  ;;  %v7737_v50 = vrot.slane %v2643_v15, 1  ;;  %v7762_v15 = vld [vmem:[%s9702_s0 + $0x128] sm:$0xff]  }
 0x312   :  { %v7687_v52 = vpop.f32.mrf.mxu2  ;;  %2713 = vrot.lane.b32.xlu2 %v2558_v22, %s4943_s23  ;;  %2466 = vrot.lane.b32.xlu1 %v7455_v26, %s4942_s27  ;;  %v7730_v26 = vld [vmem:[%s9702_s0 + $0x124] sm:$0xff]  }
 0x313   :  { %3021 = vrot.lane.b32.xlu0 %v6894_v23, %s4947_s12  ;;  %v2639_v23 = vshrl.u32 %v7546_v9, 16 }
 0x314   :  { %v1656_v17 = vpop.f32.mrf.mxu0  ;;  %v7694_v36 = vpop.permute.xlu2 %2939 }
 0x315   :  { %v2481_v48 = vpop.permute.xlu1 %2480  ;;  %v2994_v56 = vpop.permute.xlu0 %2993  ;;  %v2641_v20 = vor.u32 %v2639_v23, %v7591_v10 }
 0x316   :  { %v3378_v29 = vsel %vm1497_vm11, %v3330_v8, %v2994_v56  ;;  %v3160_v25 = vsel %vm1252_vm5, %v3112_v1, %v2481_v48 }
 0x317   :  { %4232 = vmatmul.msk.bf16.gmra.mxu1 %vm1570_vm10, %v3378_v29  ;;  %v3208_v56 = vsel %vm1301_vm6, %v3160_v25, %v7595_v46  ;;  %v2646_v48 = vsel %vm200_vm0, %v2641_v20, %v7737_v50  ;;  %v2784_v46 = vrot.slane %v7700_v24, 1  ;;  %v2563_v25 = vshll.u32 %v7762_v15, 16 }
 0x319   :  { %v2785_v20 = vsel %vm445_vm1, %v2782_v31, %v2784_v46 }
 0x31a   :  { %v7723_v51 = vpop.f32.mrf.mxu2  ;;  %2945 = vrot.lane.b32.xlu2 %v10255_v27, %s4946_s8  ;;  %2865 = vrot.lane.b32.xlu1 %v7730_v26, %s4945_s30 }
 0x31b   :  { %2810 = vrot.lane.b32.xlu0 %v2763_v54, %s4944_s26 }
 0x31c   :  { %v7739_v55 = vpop.f32.mrf.mxu0  ;;  %v7741_v22 = vpop.permute.xlu2 %2729 }
 0x31d   :  { %v2880_v34 = vpop.permute.xlu1 %2879  ;;  %v2825_v17 = vpop.permute.xlu0 %2824 }
 0x31e   :  { %v3256_v8 = vsel %vm1350_vm7, %v3208_v56, %v2825_v17 }
 0x31f   :  { %v3304_v29 = vsel %vm1399_vm8, %v3256_v8, %v2880_v34  ;;  %v4898_v34 = vld [vmem:[%s9702_s0 + $0xf4] sm:$0xff]  }
 0x320   :  { %v3352_v1 = vsel %vm1448_vm9, %v3304_v29, %v7617_v16  ;;  %v3044_v16 = vsel %vm1154_vm3, %v4898_v34, %v6771_v0 }
 0x321   :  { %v3092_v17 = vsel %vm1203_vm4, %v3044_v16, %v7108_v60  ;;  %v7796_v60 = vrot.slane %v2563_v25, 1  ;;  %v7821_v25 = vld [vmem:[%s9702_s0 + $0x180] sm:$0xff]  }
 0x322   :  { %v1702_v43 = vpop.f32.mrf.mxu2  ;;  %2735 = vrot.lane.b32.xlu2 %v2646_v48, %s4943_s23  ;;  %2488 = vrot.lane.b32.xlu1 %v7546_v9, %s4942_s27  ;;  %v7789_v9 = vld [vmem:[%s9702_s0 + $0x17c] sm:$0xff]  }
 0x323   :  { %3001 = vrot.lane.b32.xlu0 %v6707_v45, %s4947_s12  ;;  %v2559_v45 = vshrl.u32 %v7623_v59, 16 }
 0x324   :  { %v7754_v10 = vpop.f32.mrf.mxu0  ;;  %v7756_v23 = vpop.permute.xlu2 %2961 }
 0x325   :  { %v2461_v54 = vpop.permute.xlu1 %2460  ;;  %v3016_v35 = vpop.permute.xlu0 %3015  ;;  %v2561_v0 = vor.u32 %v2559_v45, %v7668_v30  ;;  %v2764_v45 = vrot.slane %v7762_v15, 1 }
 0x326   :  { %v3400_v27 = vsel %vm1497_vm11, %v3352_v1, %v3016_v35  ;;  %v3140_v31 = vsel %vm1252_vm5, %v3092_v17, %v2461_v54 }
 0x327   :  { %4243 = vmatmul.msk.bf16.vlgmr.msra.gmra.mxu3 %vm1570_vm10, %v3400_v27  ;;  %v3188_v43 = vsel %vm1301_vm6, %v3140_v31, %v7674_v53  ;;  %v2566_v1 = vsel %vm200_vm0, %v2561_v0, %v7796_v60  ;;  %v2651_v31 = vshll.u32 %v7821_v25, 16  ;;  %v2765_v0 = vsel %vm445_vm1, %v2762_v21, %v2764_v45 }
 0x32a   :  { %v7782_v56 = vpop.f32.mrf.mxu2  ;;  %2967 = vrot.lane.b32.xlu2 %v6585_v62, %s4946_s8  ;;  %2887 = vrot.lane.b32.xlu1 %v7789_v9, %s4945_s30 }
 0x32b   :  { %2832 = vrot.lane.b32.xlu0 %v2785_v20, %s4944_s26 }
 0x32c   :  { %v1663_v8 = vpop.f32.mrf.mxu0  ;;  %v7798_v48 = vpop.permute.xlu2 %2709 }
 0x32d   :  { %v2860_v62 = vpop.permute.xlu1 %2859  ;;  %v2805_v29 = vpop.permute.xlu0 %2804  ;;  %v7837_v8 = vld [vmem:[%s9702_s0 + $0x14c] sm:$0xff]  }
 0x32e   :  { %v3236_v35 = vsel %vm1350_vm7, %v3188_v43, %v2805_v29  ;;  %v10257_v43 = vld [vmem:[#allocation158_spill] sm:$0xff] }
 0x32f   :  { %v3284_v54 = vsel %vm1399_vm8, %v3236_v35, %v2860_v62  ;;  %v7856_v35 = vrot.slane %v2651_v31, 1  ;;  %v7881_v31 = vld [vmem:[%s9702_s0 + $0x130] sm:$0xff]  }
 0x330   :  { %v3332_v16 = vsel %vm1448_vm9, %v3284_v54, %v7694_v36  ;;  %v3066_v36 = vsel %vm1154_vm3, %v7837_v8, %v7087_v49 }
 0x331   :  { %v3114_v62 = vsel %vm1203_vm4, %v3066_v36, %v7430_v57 }
 0x332   :  { %v7806_v27 = vpop.f32.mrf.mxu2  ;;  %2715 = vrot.lane.b32.xlu2 %v2566_v1, %s4943_s23  ;;  %2468 = vrot.lane.b32.xlu1 %v7623_v59, %s4942_s27  ;;  %v7849_v59 = vld [vmem:[%s9702_s0 + $0x12c] sm:$0xff]  }
 0x333   :  { %10256 = vst [vmem:[#allocation24_spill] sm:$0xff] %v7806_v27  ;;  %3023 = vrot.lane.b32.xlu0 %v6885_v5, %s4947_s12  ;;  %v2647_v5 = vshrl.u32 %v7700_v24, 16  ;;  %v10289_v27 = vld [vmem:[#allocation164_spill] sm:$0xff] }
 0x334   :  { %v7813_v30 = vpop.f32.mrf.mxu0  ;;  %v7815_v53 = vpop.permute.xlu2 %2941 }
 0x335   :  { %v2483_v20 = vpop.permute.xlu1 %2482  ;;  %v2996_v34 = vpop.permute.xlu0 %2995  ;;  %v2649_v49 = vor.u32 %v2647_v5, %v7737_v50 }
 0x336   :  { %v3380_v17 = vsel %vm1497_vm11, %v3332_v16, %v2996_v34  ;;  %v3162_v21 = vsel %vm1252_vm5, %v3114_v62, %v2483_v20 }
 0x337   :  { %4233 = vmatmul.msk.bf16.gmra.mxu1 %vm1570_vm10, %v3380_v17  ;;  %v3210_v16 = vsel %vm1301_vm6, %v3162_v21, %v7741_v22  ;;  %v2654_v20 = vsel %vm200_vm0, %v2649_v49, %v7856_v35  ;;  %v2786_v22 = vrot.slane %v7821_v25, 1  ;;  %v2571_v49 = vshll.u32 %v7881_v31, 16 }
 0x33a   :  { %v1708_v29 = vpop.f32.mrf.mxu2  ;;  %2947 = vrot.lane.b32.xlu2 %v10257_v43, %s4946_s8  ;;  %2867 = vrot.lane.b32.xlu1 %v7849_v59, %s4945_s30 }
 0x33b   :  { %2812 = vrot.lane.b32.xlu0 %v2765_v0, %s4944_s26 }
 0x33c   :  { %v7858_v57 = vpop.f32.mrf.mxu0  ;;  %v7860_v1 = vpop.permute.xlu2 %2731 }
 0x33d   :  { %v2882_v54 = vpop.permute.xlu1 %2881  ;;  %v2827_v34 = vpop.permute.xlu0 %2826 }
 0x33e   :  { %v3258_v17 = vsel %vm1350_vm7, %v3210_v16, %v2827_v34  ;;  %v4902_v34 = vld [vmem:[%s9702_s0 + $0xfc] sm:$0xff]  }
 0x33f   :  { %v3306_v0 = vsel %vm1399_vm8, %v3258_v17, %v2882_v54  ;;  %v2787_v54 = vsel %vm445_vm1, %v2784_v46, %v2786_v22 }
 0x340   :  { %v3354_v43 = vsel %vm1448_vm9, %v3306_v0, %v7756_v23  ;;  %v3046_v23 = vsel %vm1154_vm3, %v4902_v34, %v6957_v6 }
 0x341   :  { %v3094_v16 = vsel %vm1203_vm4, %v3046_v23, %v7288_v7  ;;  %v7915_v7 = vrot.slane %v2571_v49, 1  ;;  %v7940_v49 = vld [vmem:[%s9702_s0 + $0x188] sm:$0xff]  }
 0x342   :  { %v7868_v36 = vpop.f32.mrf.mxu2  ;;  %2737 = vrot.lane.b32.xlu2 %v2654_v20, %s4943_s23  ;;  %2490 = vrot.lane.b32.xlu1 %v7700_v24, %s4942_s27  ;;  %v7908_v24 = vld [vmem:[%s9702_s0 + $0x184] sm:$0xff]  }
 0x343   :  { %10258 = vst [vmem:[#allocation52_spill] sm:$0xff] %v7868_v36  ;;  %3003 = vrot.lane.b32.xlu0 %v6760_v42, %s4947_s12  ;;  %v2567_v42 = vshrl.u32 %v7762_v15, 16 }
 0x344   :  { %v1669_v50 = vpop.f32.mrf.mxu0  ;;  %v7875_v5 = vpop.permute.xlu2 %2963 }
 0x345   :  { %v2463_v62 = vpop.permute.xlu1 %2462  ;;  %v3018_v29 = vpop.permute.xlu0 %3017  ;;  %v2569_v6 = vor.u32 %v2567_v42, %v7796_v60 }
 0x346   :  { %v3402_v21 = vsel %vm1497_vm11, %v3354_v43, %v3018_v29  ;;  %v3142_v46 = vsel %vm1252_vm5, %v3094_v16, %v2463_v62 }
 0x347   :  { %4244 = vmatmul.msk.bf16.gmra.mxu3 %vm1570_vm10, %v3402_v21  ;;  %v3190_v29 = vsel %vm1301_vm6, %v3142_v46, %v7798_v48  ;;  %v2574_v62 = vsel %vm200_vm0, %v2569_v6, %v7915_v7  ;;  %v2766_v48 = vrot.slane %v7881_v31, 1  ;;  %v2659_v6 = vshll.u32 %v7940_v49, 16 }
 0x34a   :  { %v7901_v17 = vpop.f32.mrf.mxu2  ;;  %2969 = vrot.lane.b32.xlu2 %v6582_v63, %s4946_s8  ;;  %2889 = vrot.lane.b32.xlu1 %v7908_v24, %s4945_s30 }
 0x34b   :  { %10259 = vst [vmem:[#allocation53_spill] sm:$0xff] %v7901_v17  ;;  %2834 = vrot.lane.b32.xlu0 %v2787_v54, %s4944_s26 }
 0x34c   :  { %v7917_v20 = vpop.f32.mrf.mxu0  ;;  %v7919_v0 = vpop.permute.xlu2 %2711 }
 0x34d   :  { %v2862_v63 = vpop.permute.xlu1 %2861  ;;  %v2807_v50 = vpop.permute.xlu0 %2806 }
 0x34e   :  { %v3238_v43 = vsel %vm1350_vm7, %v3190_v29, %v2807_v50  ;;  %v7956_v50 = vld [vmem:[%s9702_s0 + $0x154] sm:$0xff]  }
 0x34f   :  { %v3286_v21 = vsel %vm1399_vm8, %v3238_v43, %v2862_v63  ;;  %v2767_v63 = vsel %vm445_vm1, %v2764_v45, %v2766_v48 }
 0x350   :  { %v3334_v16 = vsel %vm1448_vm9, %v3286_v21, %v7815_v53  ;;  %v3068_v53 = vsel %vm1154_vm3, %v7956_v50, %v6946_v13 }
 0x351   :  { %v3116_v29 = vsel %vm1203_vm4, %v3068_v53, %v7278_v58  ;;  %v7977_v58 = vrot.slane %v2659_v6, 1  ;;  %v8002_v6 = vld [vmem:[%s9702_s0 + $0x138] sm:$0xff]  }
 0x352   :  { %v1715_v54 = vpop.f32.mrf.mxu2  ;;  %2717 = vrot.lane.b32.xlu2 %v2574_v62, %s4943_s23  ;;  %2470 = vrot.lane.b32.xlu1 %v7762_v15, %s4942_s27  ;;  %v10261_v62 = vld [vmem:[#allocation156_spill] sm:$0xff] }
 0x353   :  { %3025 = vrot.lane.b32.xlu0 %v6882_v33, %s4947_s12  ;;  %v2655_v33 = vshrl.u32 %v7821_v25, 16  ;;  %v7970_v15 = vld [vmem:[%s9702_s0 + $0x134] sm:$0xff]  }
 0x354   :  { %v7932_v60 = vpop.f32.mrf.mxu0  ;;  %v7934_v42 = vpop.permute.xlu2 %2943 }
 0x355   :  { %v2485_v34 = vpop.permute.xlu1 %2484  ;;  %v2998_v23 = vpop.permute.xlu0 %2997  ;;  %v2657_v13 = vor.u32 %v2655_v33, %v7856_v35  ;;  %v9777_v33 = vrot.slane %v7940_v49, 1 }
 0x356   :  { %v3382_v46 = vsel %vm1497_vm11, %v3334_v16, %v2998_v23  ;;  %v3164_v45 = vsel %vm1252_vm5, %v3116_v29, %v2485_v34 }
 0x357   :  { %4234 = vmatmul.msk.bf16.gmra.mxu1 %vm1570_vm10, %v3382_v46  ;;  %v3212_v46 = vsel %vm1301_vm6, %v3164_v45, %v7860_v1 }
 0x35a   :  { %v7963_v43 = vpop.f32.mrf.mxu2  ;;  %2949 = vrot.lane.b32.xlu2 %v10261_v62, %s4946_s8  ;;  %2869 = vrot.lane.b32.xlu1 %v7970_v15, %s4945_s30  ;;  %v2662_v62 = vsel %vm200_vm0, %v2657_v13, %v7977_v58 }
 0x35b   :  { %10260 = vst [vmem:[#allocation76_spill] sm:$0xff] %v7963_v43  ;;  %2814 = vrot.lane.b32.xlu0 %v2767_v63, %s4944_s26 }
 0x35c   :  { %v1676_v21 = vpop.f32.mrf.mxu0  ;;  %v7979_v54 = vpop.permute.xlu2 %2733 }
 0x35d   :  { %v2884_v23 = vpop.permute.xlu1 %2883  ;;  %v2829_v16 = vpop.permute.xlu0 %2828 }
 0x35e   :  { %v3260_v53 = vsel %vm1350_vm7, %v3212_v46, %v2829_v16  ;;  %v2789_v16 = vsel %vm445_vm1, %v2786_v22, %v9777_v33  ;;  %v4906_v46 = vld [vmem:[%s9702_s0 + $0x104] sm:$0xff]  }
 0x35f   :  { %v3308_v34 = vsel %vm1399_vm8, %v3260_v53, %v2884_v23  ;;  %v2579_v23 = vshll.u32 %v8002_v6, 16  ;;  %v10263_v53 = vld [vmem:[#allocation48_spill] sm:$0xff] }
 0x360   :  { %v3356_v13 = vsel %vm1448_vm9, %v3308_v34, %v7875_v5  ;;  %v3048_v5 = vsel %vm1154_vm3, %v4906_v46, %v10263_v53 }
 0x362   :  { %v7987_v63 = vpop.f32.mrf.mxu2  ;;  %2739 = vrot.lane.b32.xlu2 %v2662_v62, %s4943_s23  ;;  %2492 = vrot.lane.b32.xlu1 %v7821_v25, %s4942_s27  ;;  %v3096_v62 = vsel %vm1203_vm4, %v3048_v5, %v7286_v28  ;;  %v8027_v25 = vld [vmem:[%s9702_s0 + $0x18c] sm:$0xff]  }
 0x363   :  { %10262 = vst [vmem:[#allocation77_spill] sm:$0xff] %v7987_v63  ;;  %3005 = vrot.lane.b32.xlu0 %v6757_v41, %s4947_s12  ;;  %v2575_v41 = vshrl.u32 %v7881_v31, 16  ;;  %v10278_v63 = vrot.slane %v8002_v6, 1 }
 0x364   :  { %v7994_v35 = vpop.f32.mrf.mxu0  ;;  %v7996_v1 = vpop.permute.xlu2 %2965 }
 0x365   :  { %v2465_v29 = vpop.permute.xlu1 %2464  ;;  %v3020_v45 = vpop.permute.xlu0 %3019 }
 0x366   :  { %v3404_v21 = vsel %vm1497_vm11, %v3356_v13, %v3020_v45  ;;  %v10264_v45 = vld [vmem:[#allocation178_spill] sm:$0xff]  ;;  %v3144_v22 = vsel %vm1252_vm5, %v3096_v62, %v2465_v29  ;;  %v2577_v13 = vor.u32 %v2575_v41, %v7915_v7  ;;  %v10266_v7 = vld [vmem:[#allocation39_spill] sm:$0xff] }
 0x367   :  { %4245 = vmatmul.msk.bf16.gmra.mxu3 %vm1570_vm10, %v3404_v21  ;;  %v8034_v21 = vrot.slane %v2579_v23, 1 }
 0x369   :  { %v2582_v29 = vsel %vm200_vm0, %v2577_v13, %v8034_v21 }
 0x36a   :  { %v1721_v34 = vpop.f32.mrf.mxu2  ;;  %2971 = vrot.lane.b32.xlu2 %v10264_v45, %s4946_s8  ;;  %2891 = vrot.lane.b32.xlu1 %v8027_v25, %s4945_s30 }
 0x36b   :  { %2836 = vrot.lane.b32.xlu0 %v2789_v16, %s4944_s26  ;;  %v3192_v34 = vsel %vm1301_vm6, %v3144_v22, %v7919_v0  ;;  %v9776_v0 = vrot.slane %v8002_v6, 1  ;;  %v8059_v22 = vld [vmem:[%s9702_s0 + $0x190] sm:$0xff]  }
 0x36c   :  { %v8036_v28 = vpop.f32.mrf.mxu0  ;;  %v8038_v46 = vpop.permute.xlu2 %2713 }
 0x36d   :  { %v2864_v53 = vpop.permute.xlu1 %2863  ;;  %v2809_v5 = vpop.permute.xlu0 %2808 }
 0x36e   :  { %v3240_v45 = vsel %vm1350_vm7, %v3192_v34, %v2809_v5 }
 0x36f   :  { %v3288_v16 = vsel %vm1399_vm8, %v3240_v45, %v2864_v53  ;;  %v2663_v45 = vshrl.u32 %v7940_v49, 16 }
 0x370   :  { %v3336_v5 = vsel %vm1448_vm9, %v3288_v16, %v7934_v42 }
 0x372   :  { %v8046_v62 = vpop.f32.mrf.mxu2  ;;  %2719 = vrot.lane.b32.xlu2 %v2582_v29, %s4943_s23  ;;  %2472 = vrot.lane.b32.xlu1 %v7881_v31, %s4942_s27  ;;  %v2667_v29 = vshll.u32 %v8059_v22, 16  ;;  %v8086_v31 = vld [vmem:[%s9702_s0 + $0x13c] sm:$0xff]  }
 0x373   :  { %10265 = vst [vmem:[#allocation96_spill] sm:$0xff] %v8046_v62  ;;  %3027 = vrot.lane.b32.xlu0 %v10266_v7, %s4947_s12  ;;  %v2769_v7 = vsel %vm445_vm1, %v2766_v48, %v9776_v0 }
 0x374   :  { %v1682_v41 = vpop.f32.mrf.mxu0  ;;  %v8053_v23 = vpop.permute.xlu2 %2945 }
 0x375   :  { %v2487_v13 = vpop.permute.xlu1 %2486  ;;  %v3000_v53 = vpop.permute.xlu0 %2999  ;;  %v4908_v41 = vld [vmem:[%s9702_s0 + $0x15c] sm:$0xff]  }
 0x376   :  { %v3384_v34 = vsel %vm1497_vm11, %v3336_v5, %v3000_v53  ;;  %v3070_v42 = vsel %vm1154_vm3, %v4908_v41, %v7119_v37  ;;  %v10268_v5 = vld [vmem:[#allocation155_spill] sm:$0xff]  ;;  %v2665_v37 = vor.u32 %v2663_v45, %v7977_v58 }
 0x377   :  { %4235 = vmatmul.msk.bf16.gmra.mxu1 %vm1570_vm10, %v3384_v34  ;;  %v3118_v16 = vsel %vm1203_vm4, %v3070_v42, %v7459_v61  ;;  %v8093_v61 = vrot.slane %v2667_v29, 1  ;;  %v10269_v58 = vld [vmem:[#allocation35_spill] sm:$0xff] }
 0x378   :  { %v3166_v48 = vsel %vm1252_vm5, %v3118_v16, %v2487_v13 }
 0x379   :  { %v2670_v33 = vsel %vm200_vm0, %v2665_v37, %v8093_v61 }
 0x37a   :  { %v8079_v53 = vpop.f32.mrf.mxu2  ;;  %2951 = vrot.lane.b32.xlu2 %v10268_v5, %s4946_s8  ;;  %2871 = vrot.lane.b32.xlu1 %v8086_v31, %s4945_s30  ;;  %v3214_v5 = vsel %vm1301_vm6, %v3166_v48, %v7979_v54  ;;  %v9778_v54 = vrot.slane %v8059_v22, 1 }
 0x37b   :  { %10267 = vst [vmem:[#allocation97_spill] sm:$0xff] %v8079_v53  ;;  %2816 = vrot.lane.b32.xlu0 %v2769_v7, %s4944_s26  ;;  %v8116_v7 = vld [vmem:[%s9702_s0 + $0x140] sm:$0xff]  }
 0x37c   :  { %v8095_v34 = vpop.permute.xlu2 %2735 }
 0x37d   :  { %v2886_v41 = vpop.permute.xlu1 %2885  ;;  %v2831_v42 = vpop.permute.xlu0 %2830 }
 0x37e   :  { %v3262_v0 = vsel %vm1350_vm7, %v3214_v5, %v2831_v42  ;;  %v2587_v42 = vshll.u32 %v8116_v7, 16  ;;  %v10270_v5 = vrot.slane %v7940_v49, 1 }
 0x37f   :  { %v3310_v13 = vsel %vm1399_vm8, %v3262_v0, %v2886_v41  ;;  %v2583_v41 = vshrl.u32 %v8002_v6, 16 }
 0x382   :  { %v1728_v16 = vpop.f32.mrf.mxu2  ;;  %2741 = vrot.lane.b32.xlu2 %v2670_v33, %s4943_s23  ;;  %2494 = vrot.lane.b32.xlu1 %v7940_v49, %s4942_s27  ;;  %v3358_v33 = vsel %vm1448_vm9, %v3310_v13, %v7996_v1 }
 0x383   :  { %3007 = vrot.lane.b32.xlu0 %v10269_v58, %s4947_s12  ;;  %v2791_v16 = vsel %vm445_vm1, %v10270_v5, %v9778_v54  ;;  %v10271_v58 = vld [vmem:[#allocation50_spill] sm:$0xff]  ;;  %v8157_v5 = vld [vmem:[%s9702_s0 + $0x19c] sm:$0xff]  }
 0x384   :  { %v8108_v45 = vpop.f32.mrf.mxu1  ;;  %v8110_v29 = vpop.permute.xlu2 %2967  ;;  %v3050_v53 = vsel %vm1154_vm3, %v7235_v3, %v10271_v58  ;;  %v2585_v3 = vor.u32 %v2583_v41, %v8034_v21  ;;  %v8160_v58 = vrot.slane %v8157_v5, 1 }
 0x385   :  { %v2467_v0 = vpop.permute.xlu1 %2466  ;;  %v3022_v48 = vpop.permute.xlu0 %3021  ;;  %v3098_v1 = vsel %vm1203_vm4, %v3050_v53, %v7166_v47  ;;  %v8148_v47 = vrot.slane %v2587_v42, 1  ;;  %v10274_v42 = vld [vmem:[#allocation173_spill] sm:$0xff] }
 0x386   :  { %v3406_v37 = vsel %vm1497_vm11, %v3358_v33, %v3022_v48  ;;  %v10273_v48 = vld [vmem:[#allocation177_spill] sm:$0xff]  ;;  %v8141_v33 = vld [vmem:[%s9702_s0 + $0x194] sm:$0xff]   ;;  %v3146_v49 = vsel %vm1252_vm5, %v3098_v1, %v2467_v0  ;;  %v10275_v1 = vrot.slane %v10274_v42, 1 }
 0x387   :  { %4246 = vmatmul.msk.bf16.gmra.mxu3 %vm1570_vm10, %v3406_v37  ;;  %v2590_v41 = vsel %vm200_vm0, %v2585_v3, %v8148_v47 }
 0x388   :  { %v8171_v54 = vsel %vm445_vm1, %v10275_v1, %v8160_v58 }
 0x38a   :  { %v8134_v13 = vpop.f32.mrf.mxu2  ;;  %2973 = vrot.lane.b32.xlu2 %v10273_v48, %s4946_s8  ;;  %2893 = vrot.lane.b32.xlu1 %v8141_v33, %s4945_s30 }
 0x38b   :  { %10272 = vst [vmem:[#allocation116_spill] sm:$0xff] %v8134_v13  ;;  %2838 = vrot.lane.b32.xlu0 %v2791_v16, %s4944_s26  ;;  %v3194_v16 = vsel %vm1301_vm6, %v3146_v49, %v8038_v46  ;;  %v8184_v46 = vld [vmem:[%s9702_s0 + $0x1a8] sm:$0xff]  }
 0x38c   :  { %v8150_v53 = vpop.f32.mrf.mxu1  ;;  %v8152_v37 = vpop.permute.xlu2 %2715  ;;  %v4455_v1 = vunpack.c.l.b16 %v8184_v46 }
 0x38d   :  { %v2866_v48 = vpop.permute.xlu1 %2865  ;;  %v2811_v0 = vpop.permute.xlu0 %2810 }
 0x38e   :  { %v3242_v21 = vsel %vm1350_vm7, %v3194_v16, %v2811_v0  ;;  %v8192_v0 = vld [vmem:[%s9702_s0 + $0x198] sm:$0xff]  }
 0x38f   :  { %v3290_v13 = vsel %vm1399_vm8, %v3242_v21, %v2866_v48  ;;  %v2675_v48 = vshll.u32 %v8192_v0, 16 }
 0x392   :  { %v8174_v62 = vpop.f32.mrf.mxu2  ;;  %2721 = vrot.lane.b32.xlu2 %v2590_v41, %s4943_s23  ;;  %2474 = vrot.lane.b32.xlu1 %v8002_v6, %s4942_s27  ;;  %v3338_v41 = vsel %vm1448_vm9, %v3290_v13, %v8053_v23  ;;  %v4912_v23 = vld [vmem:[%s9702_s0 + $0x164] sm:$0xff]   ;;  %v10280_v6 = vld [vmem:[#allocation172_spill] sm:$0xff] }
 0x393   :  { %10276 = vst [vmem:[#allocation145_spill] sm:$0xff] %v8174_v62  ;;  %3029 = vrot.lane.b32.xlu0 %v8171_v54, %s4947_s12  ;;  %v10277_v62 = vrot.slane %v8116_v7, 1  ;;  %v3072_v13 = vsel %vm1154_vm3, %v4912_v23, %v7110_v14  ;;  %v8218_v17 = vpack.c.b16 %v4455_v1, %v10280_v6  ;;  %v8223_v14 = vrot.slane %v2675_v48, 1 }
 0x394   :  { %v3485_v49 = vpop.f32.mrf.mxu1  ;;  %v8186_v3 = vpop.permute.xlu2 %2947 }
 0x395   :  { %v2489_v16 = vpop.permute.xlu1 %2488  ;;  %v3002_v21 = vpop.permute.xlu0 %3001  ;;  %v2671_v49 = vshrl.u32 %v8059_v22, 16  ;;  %v2771_v43 = vsel %vm445_vm1, %v10278_v63, %v10277_v62 }
 0x396   :  { %v3386_v42 = vsel %vm1497_vm11, %v3338_v41, %v3002_v21  ;;  %v3120_v21 = vsel %vm1203_vm4, %v3072_v13, %v7457_v32 }
 0x397   :  { %4236 = vmatmul.msk.bf16.gmra.mxu1 %vm1570_vm10, %v3386_v42  ;;  %v10279_v42 = vld [vmem:[#allocation166_spill] sm:$0xff]  ;;  %v3168_v63 = vsel %vm1252_vm5, %v3120_v21, %v2489_v16  ;;  %v2673_v62 = vor.u32 %v2671_v49, %v8093_v61  ;;  %v2907_v16 = vshll.u32 %v8218_v17, 16  ;;  %v10281_v61 = vld [vmem:[#allocation49_spill] sm:$0xff]  ;;  %v9780_v49 = vrot.slane %v8192_v0, 1 }
 0x398   :  { %v8247_v21 = vld [vmem:[%s9702_s0 + $0x148] sm:$0xff]  }
 0x399   :  { %v2678_v1 = vsel %vm200_vm0, %v2673_v62, %v8223_v14  ;;  %v8239_v48 = vrot.slane %v2907_v16, 1 }
 0x39a   :  { %v1734_v41 = vpop.f32.mrf.mxu2  ;;  %2953 = vrot.lane.b32.xlu2 %v10279_v42, %s4946_s8  ;;  %2873 = vrot.lane.b32.xlu1 %v7716_v4, %s4945_s30 }
 0x39b   :  { %2818 = vrot.lane.b32.xlu0 %v2771_v43, %s4944_s26  ;;  %v3216_v41 = vsel %vm1301_vm6, %v3168_v63, %v8095_v34 }
 0x39c   :  { %v8225_v23 = vpop.permute.xlu2 %2737 }
 0x39d   :  { %v2888_v32 = vpop.permute.xlu1 %2887  ;;  %v2833_v13 = vpop.permute.xlu0 %2832 }
 0x39e   :  { %v3264_v4 = vsel %vm1350_vm7, %v3216_v41, %v2833_v13  ;;  %v2591_v41 = vshrl.u32 %v8116_v7, 16 }
 0x39f   :  { %v3312_v43 = vsel %vm1399_vm8, %v3264_v4, %v2888_v32  ;;  %v10282_v32 = vld [vmem:[#allocation61_spill] sm:$0xff]  ;;  %v2595_v4 = vshll.u32 %v8247_v21, 16 }
 0x3a0   :  { %v3360_v63 = vsel %vm1448_vm9, %v3312_v43, %v8110_v29  ;;  %v2910_v13 = vsel %vm200_vm0, %v10282_v32, %v8239_v48  ;;  %v10285_v43 = vld [vmem:[#allocation62_spill] sm:$0xff]  ;;  %v8276_v32 = vpop.f32.mrf.mxu1 }
 0x3a2   :  { %2743 = vrot.lane.b32.xlu2 %v2678_v1, %s4943_s23  ;;  %2496 = vrot.lane.b32.xlu1 %v8059_v22, %s4942_s27  ;;  %v10283_v1 = vrot.slane %v8059_v22, 1  ;;  %v2593_v22 = vor.u32 %v2591_v41, %v8148_v47 }
 0x3a3   :  { %3009 = vrot.lane.b32.xlu0 %v10281_v61, %s4947_s12  ;;  %v10284_v61 = vld [vmem:[#allocation86_spill] sm:$0xff] }
 0x3a4   :  { %v8241_v34 = vpop.permute.xlu2 %2969  ;;  %v2793_v16 = vsel %vm445_vm1, %v10283_v1, %v9780_v49  ;;  %v3052_v29 = vsel %vm1154_vm3, %v7406_v40, %v10284_v61  ;;  %v9779_v40 = vrot.slane %v8218_v17, 1 }
 0x3a5   :  { %v2469_v42 = vpop.permute.xlu1 %2468  ;;  %v3024_v6 = vpop.permute.xlu0 %3023 }
 0x3a6   :  { %v3408_v62 = vsel %vm1497_vm11, %v3360_v63, %v3024_v6  ;;  %v3100_v6 = vsel %vm1203_vm4, %v3052_v29, %v10285_v43  ;;  %v2984_v47 = vsel %vm445_vm1, %v8160_v58, %v9779_v40 }
 0x3a7   :  { %4247 = vmatmul.msk.bf16.gmra.mxu3 %vm1570_vm10, %v3408_v62  ;;  %v3148_v63 = vsel %vm1252_vm5, %v3100_v6, %v2469_v42  ;;  %v8274_v62 = vrot.slane %v2595_v4, 1  ;;  %v4219_v6 = vld [vmem:[%s9702_s0 + $0x1b0] sm:$0xf] }
 0x3a8   :  { %v8315_v40 = vunpack.c.l.b16 %v4219_v6 }
 0x3a9   :  { %v2598_v42 = vsel %vm200_vm0, %v2593_v22, %v8274_v62 }
 0x3aa   :  { %2975 = vrot.lane.b32.xlu2 %v2910_v13, %s4946_s8  ;;  %2895 = vrot.lane.b32.xlu1 %v8157_v5, %s4945_s30  ;;  %v3196_v13 = vsel %vm1301_vm6, %v3148_v63, %v8152_v37  ;;  %v8317_v49 = vpop.f32.mrf.mxu3 }
 0x3ab   :  { %2840 = vrot.lane.b32.xlu0 %v2793_v16, %s4944_s26  ;;  %v9781_v16 = vrot.slane %v8247_v21, 1 }
 0x3ac   :  { %v8278_v1 = vpop.permute.xlu2 %2717 }
 0x3ad   :  { %v2868_v61 = vpop.permute.xlu1 %2867  ;;  %v2813_v29 = vpop.permute.xlu0 %2812 }
 0x3ae   :  { %v3244_v43 = vsel %vm1350_vm7, %v3196_v13, %v2813_v29  ;;  %v2679_v13 = vshrl.u32 %v8192_v0, 16 }
 0x3af   :  { %v3292_v41 = vsel %vm1399_vm8, %v3244_v43, %v2868_v61  ;;  %v8311_v43 = vld [vmem:[%s9702_s0 + $0x1a0] sm:$0xff]  }
 0x3b0   :  { %v3340_v61 = vsel %vm1448_vm9, %v3292_v41, %v8186_v3  ;;  %v10286_v3 = vrot.slane %v8116_v7, 1 }
 0x3b2   :  { %2723 = vrot.lane.b32.xlu2 %v2598_v42, %s4943_s23  ;;  %2476 = vrot.lane.b32.xlu1 %v8116_v7, %s4942_s27  ;;  %v2683_v42 = vshll.u32 %v8311_v43, 16  ;;  %v2773_v41 = vsel %vm445_vm1, %v10286_v3, %v9781_v16  ;;  %v2681_v7 = vor.u32 %v2679_v13, %v8223_v14  ;;  %v8348_v13 = vpop.f32.mrf.mxu3 }
 0x3b3   :  { %3031 = vrot.lane.b32.xlu0 %v2984_v47, %s4947_s12  ;;  %v4456_v47 = vunpack.c.h.b16 %v8184_v46 }
 0x3b4   :  { %v8295_v37 = vpop.f32.mrf.mxu1  ;;  %v8297_v4 = vpop.permute.xlu2 %2949  ;;  %v8336_v3 = vrot.slane %v2683_v42, 1 }
 0x3b5   :  { %v2491_v63 = vpop.permute.xlu1 %2490  ;;  %v3004_v22 = vpop.permute.xlu0 %3003  ;;  %v8339_v16 = vpack.c.b16 %v8315_v40, %v4456_v47 }
 0x3b6   :  { %v3388_v29 = vsel %vm1497_vm11, %v3340_v61, %v3004_v22  ;;  %v10287_v22 = vld [vmem:[#allocation64_spill] sm:$0xff] }
 0x3b7   :  { %4237 = vmatmul.msk.bf16.gmra.mxu1 %vm1570_vm10, %v3388_v29  ;;  %v3074_v61 = vsel %vm1154_vm3, %v7497_v12, %v10287_v22  ;;  %v10288_v29 = vld [vmem:[#allocation20_spill] sm:$0xff]  ;;  %v2915_v14 = vshll.u32 %v8339_v16, 16 }
 0x3b8   :  { %v3122_v36 = vsel %vm1203_vm4, %v3074_v61, %v10288_v29 }
 0x3b9   :  { %v3170_v6 = vsel %vm1252_vm5, %v3122_v36, %v2491_v63  ;;  %v2686_v36 = vsel %vm200_vm0, %v2681_v7, %v8336_v3  ;;  %v2911_v63 = vshrl.u32 %v8218_v17, 16  ;;  %v2794_v7 = vrot.slane %v8311_v43, 1 }
 0x3ba   :  { %2955 = vrot.lane.b32.xlu2 %v10289_v27, %s4946_s8  ;;  %2875 = vrot.lane.b32.xlu1 %v7837_v8, %s4945_s30  ;;  %v3218_v27 = vsel %vm1301_vm6, %v3170_v6, %v8225_v23  ;;  %v10290_v23 = vld [vmem:[#allocation34_spill] sm:$0xff] }
 0x3bb   :  { %2820 = vrot.lane.b32.xlu0 %v2773_v41, %s4944_s26  ;;  %v2913_v47 = vor.u32 %v2911_v63, %v8239_v48  ;;  %v8357_v41 = vrot.slane %v2915_v14, 1  ;;  %v2599_v48 = vshrl.u32 %v8247_v21, 16  ;;  %v10292_v14 = vld [vmem:[#allocation72_spill] sm:$0xff] }
 0x3bc   :  { %v3491_v12 = vpop.f32.mrf.mxu1  ;;  %v2740_v22 = vpop.permute.xlu2 %2739 }
 0x3bd   :  { %v2890_v61 = vpop.permute.xlu1 %2889  ;;  %v2835_v29 = vpop.permute.xlu0 %2834 }
 0x3be   :  { %v3266_v8 = vsel %vm1350_vm7, %v3218_v27, %v2835_v29 }
 0x3bf   :  { %v3314_v42 = vsel %vm1399_vm8, %v3266_v8, %v2890_v61  ;;  %v2918_v8 = vsel %vm200_vm0, %v2913_v47, %v8357_v41 }
 0x3c0   :  { %v3362_v61 = vsel %vm1448_vm9, %v3314_v42, %v8241_v34  ;;  %v10293_v34 = vld [vmem:[#allocation38_spill] sm:$0xff] }
 0x3c2   :  { %2745 = vrot.lane.b32.xlu2 %v2686_v36, %s4943_s23  ;;  %2498 = vrot.lane.b32.xlu1 %v8192_v0, %s4942_s27  ;;  %v10291_v36 = vrot.slane %v8192_v0, 1  ;;  %v2601_v0 = vor.u32 %v2599_v48, %v8274_v62 }
 0x3c3   :  { %3011 = vrot.lane.b32.xlu0 %v10290_v23, %s4947_s12  ;;  %v3054_v23 = vsel %vm1154_vm3, %v7582_v38, %v10292_v14 }
 0x3c4   :  { %v8359_v6 = vpop.permute.xlu2 %2971  ;;  %v2795_v63 = vsel %vm445_vm1, %v10291_v36, %v2794_v7  ;;  %v3102_v42 = vsel %vm1203_vm4, %v3054_v23, %v10293_v34  ;;  %v10294_v23 = vld [vmem:[#allocation134_spill] sm:$0xff] }
 0x3c5   :  { %v2471_v12 = vpop.permute.xlu1 %2470  ;;  %v3026_v29 = vpop.permute.xlu0 %3025  ;;  %v2606_v34 = vsel %vm200_vm0, %v2601_v0, %v10294_v23 }
 0x3c6   :  { %v3410_v27 = vsel %vm1497_vm11, %v3362_v61, %v3026_v29  ;;  %v3150_v47 = vsel %vm1252_vm5, %v3102_v42, %v2471_v12  ;;  %v10295_v12 = vrot.slane %v8218_v17, 1 }
 0x3c7   :  { %4248 = vmatmul.msk.bf16.gmra.mxu3 %vm1570_vm10, %v3410_v27  ;;  %v2985_v27 = vrot.slane %v8339_v16, 1  ;;  %v3198_v14 = vsel %vm1301_vm6, %v3150_v47, %v8278_v1  ;;  %v10296_v47 = vld [vmem:[#allocation94_spill] sm:$0xff] }
 0x3c8   :  { %v10297_v0 = vrot.slane %v10296_v47, 1 }
 0x3c9   :  { %v2986_v62 = vsel %vm445_vm1, %v10295_v12, %v2985_v27 }
 0x3ca   :  { %v3537_v29 = vpop.f32.mrf.mxu3  ;;  %2977 = vrot.lane.b32.xlu2 %v2918_v8, %s4946_s8  ;;  %2897 = vrot.lane.b32.xlu1 %v8218_v17, %s4945_s30 }
 0x3cb   :  { %2842 = vrot.lane.b32.xlu0 %v2795_v63, %s4944_s26 }
 0x3cc   :  { %v8385_v61 = vpop.permute.xlu2 %2719 }
 0x3cd   :  { %v2870_v38 = vpop.permute.xlu1 %2869  ;;  %v2815_v36 = vpop.permute.xlu0 %2814 }
 0x3ce   :  { %v3246_v8 = vsel %vm1350_vm7, %v3198_v14, %v2815_v36  ;;  %v10299_v14 = vld [vmem:[#allocation157_spill] sm:$0xff] }
 0x3cf   :  { %v3294_v48 = vsel %vm1399_vm8, %v3246_v8, %v2870_v38  ;;  %v10298_v38 = vrot.slane %v8247_v21, 1  ;;  %v3076_v8 = vsel %vm1154_vm3, %v7659_v2, %v10299_v14 }
 0x3d0   :  { %v3342_v29 = vsel %vm1448_vm9, %v3294_v48, %v8297_v4  ;;  %v3124_v23 = vsel %vm1203_vm4, %v3076_v8, %v7523_v19  ;;  %v2687_v19 = vshrl.u32 %v8311_v43, 16 }
 0x3d1   :  { %v2775_v36 = vsel %vm445_vm1, %v10298_v38, %v10297_v0 }
 0x3d2   :  { %2725 = vrot.lane.b32.xlu2 %v2606_v34, %s4943_s23  ;;  %2478 = vrot.lane.b32.xlu1 %v8247_v21, %s4942_s27  ;;  %v10300_v34 = vld [vmem:[#allocation163_spill] sm:$0xff]  ;;  %v2689_v0 = vor.u32 %v2687_v19, %v8336_v3 }
 0x3d3   :  { %3033 = vrot.lane.b32.xlu0 %v2986_v62, %s4947_s12 }
 0x3d4   :  { %v8403_v1 = vpop.permute.xlu2 %2951 }
 0x3d5   :  { %v2493_v63 = vpop.permute.xlu1 %2492  ;;  %v3006_v42 = vpop.permute.xlu0 %3005 }
 0x3d6   :  { %v3390_v17 = vsel %vm1497_vm11, %v3342_v29, %v3006_v42  ;;  %v3172_v4 = vsel %vm1252_vm5, %v3124_v23, %v2493_v63  ;;  %v2691_v42 = vshll.u32 %v8184_v46, 16  ;;  %v8431_v29 = vpop.f32.mrf.mxu3  ;;  %v2796_v63 = vrot.slane %v8184_v46, 1 }
 0x3d7   :  { %4238 = vmatmul.msk.bf16.gmra.mxu1 %vm1570_vm10, %v3390_v17  ;;  %v3220_v48 = vsel %vm1301_vm6, %v3172_v4, %v2740_v22  ;;  %v8433_v17 = vpop.f32.mrf.mxu1  ;;  %v10301_v22 = vld [vmem:[#allocation60_spill] sm:$0xff]  ;;  %v2919_v4 = vshrl.u32 %v8339_v16, 16 }
 0x3d8   :  { %v2693_v38 = vrot.slane %v2691_v42, 1 }
 0x3da   :  { %2957 = vrot.lane.b32.xlu2 %v10300_v34, %s4946_s8  ;;  %2877 = vrot.lane.b32.xlu1 %v7956_v50, %s4945_s30  ;;  %v2797_v34 = vsel %vm445_vm1, %v2794_v7, %v2796_v63  ;;  %v2694_v3 = vsel %vm200_vm0, %v2689_v0, %v2693_v38 }
 0x3db   :  { %2822 = vrot.lane.b32.xlu0 %v2775_v36, %s4944_s26  ;;  %v8449_v36 = vld [vmem:[%s9702_s0 + $0x1b4] sm:$0xff] }
 0x3dc   :  { %v8425_v21 = vpop.permute.xlu2 %2741  ;;  %v2987_v42 = vrot.slane %v8449_v36, 1 }
 0x3dd   :  { %v2892_v12 = vpop.permute.xlu1 %2891  ;;  %v2837_v62 = vpop.permute.xlu0 %2836 }
 0x3de   :  { %v3268_v2 = vsel %vm1350_vm7, %v3220_v48, %v2837_v62  ;;  %v10302_v62 = vld [vmem:[#allocation73_spill] sm:$0xff] }
 0x3df   :  { %v3316_v50 = vsel %vm1399_vm8, %v3268_v2, %v2892_v12  ;;  %v2923_v12 = vshll.u32 %v8449_v36, 16  ;;  %v3056_v48 = vsel %vm1154_vm3, %v7730_v26, %v10302_v62  ;;  %v10303_v2 = vld [vmem:[#allocation140_spill] sm:$0xff]  ;;  %v2506_v26 = vpack.c.b16 %v8315_v40, %v8315_v40 }
 0x3e0   :  { %v2988_v40 = vsel %vm445_vm1, %v2985_v27, %v2987_v42 }
 0x3e1   :  { %v2798_v27 = vrot.slane %v2506_v26, 1 }
 0x3e2   :  { %2500 = vrot.lane.b32.xlu2 %v8311_v43, %s4942_s27  ;;  %2424 = vrot.lane.b32.xlu1 %v8171_v54, %s4941_s20  ;;  %v3364_v54 = vsel %vm1448_vm9, %v3316_v50, %v8359_v6  ;;  %v3104_v6 = vsel %vm1203_vm4, %v3056_v48, %v10303_v2  ;;  %v10304_v43 = vld [vmem:[#allocation175_spill] sm:$0xff] }
 0x3e3   :  { %3013 = vrot.lane.b32.xlu0 %v10301_v22, %s4947_s12  ;;  %v2378_v7 = vrot.slane %v10304_v43, 1  ;;  %v8477_v22 = vpop.f32.mrf.mxu1 }
 0x3e4   :  { %v8443_v47 = vpop.permute.xlu2 %2973 }
 0x3e5   :  { %v2473_v14 = vpop.permute.xlu1 %2472  ;;  %v3028_v8 = vpop.permute.xlu0 %3027 }
 0x3e6   :  { %v3412_v23 = vsel %vm1497_vm11, %v3364_v54, %v3028_v8  ;;  %v3152_v50 = vsel %vm1252_vm5, %v3104_v6, %v2473_v14  ;;  %v2921_v8 = vor.u32 %v2919_v4, %v8357_v41  ;;  %v2925_v54 = vrot.slane %v2923_v12, 1 }
 0x3e7   :  { %4249 = vmatmul.msk.bf16.gmra.mxu3 %vm1570_vm10, %v3412_v23  ;;  %v4222_v23 = vld [vmem:[%s9702_s0 + $0x1bc] sm:$0xf]  ;;  %v3200_v14 = vsel %vm1301_vm6, %v3152_v50, %v8385_v61  ;;  %v2695_v41 = vshrl.u32 %v8184_v46, 16  ;;  %v2699_v4 = vshll.u32 %v2506_v26, 16 }
 0x3e8   :  { %v2904_v12 = vunpack.c.l.b16 %v4222_v23  ;;  %v2926_v2 = vsel %vm200_vm0, %v2921_v8, %v2925_v54 }
 0x3ea   :  { %v8466_v19 = vpop.f32.mrf.mxu3  ;;  %2899 = vrot.lane.b32.xlu2 %v8339_v16, %s4945_s30  ;;  %2844 = vrot.lane.b32.xlu1 %v2797_v34, %s4944_s26  ;;  %v2701_v16 = vrot.slane %v2699_v4, 1  ;;  %v2905_v61 = vpack.c.b16 %v2904_v12, %v2904_v12 }
 0x3eb   :  { %2747 = vrot.lane.b32.xlu0 %v2694_v3, %s4943_s23  ;;  %v2379_v3 = vsel %vm445_vm1, %v8160_v58, %v2378_v7  ;;  %v2697_v58 = vor.u32 %v2695_v41, %v2693_v38  ;;  %v2799_v38 = vsel %vm445_vm1, %v2796_v63, %v2798_v27 }
 0x3ec   :  { %v8479_v0 = vpop.permute.xlu2 %2721 }
 0x3ed   :  { %v2872_v34 = vpop.permute.xlu1 %2871  ;;  %v2817_v62 = vpop.permute.xlu0 %2816 }
 0x3ee   :  { %v3248_v48 = vsel %vm1350_vm7, %v3200_v14, %v2817_v62 }
 0x3ef   :  { %v3296_v6 = vsel %vm1399_vm8, %v3248_v48, %v2872_v34  ;;  %v2702_v34 = vsel %vm200_vm0, %v2697_v58, %v2701_v16  ;;  %v10305_v48 = vld [vmem:[#allocation159_spill] sm:$0xff] }
 0x3f0   :  { %v3344_v8 = vsel %vm1448_vm9, %v3296_v6, %v8403_v1  ;;  %v3078_v26 = vsel %vm1154_vm3, %v7789_v9, %v10305_v48 }
 0x3f1   :  { %v3126_v41 = vsel %vm1203_vm4, %v3078_v26, %v7521_v44 }
 0x3f2   :  { %v3543_v43 = vpop.f32.mrf.mxu3  ;;  %2426 = vrot.lane.b32.xlu2 %v2379_v3, %s4941_s20  ;;  %3035 = vrot.lane.b32.xlu1 %v2988_v40, %s4947_s12  ;;  %v2927_v3 = vshrl.u32 %v8449_v36, 16  ;;  %v2931_v40 = vshll.u32 %v2905_v61, 16 }
 0x3f3   :  { %2979 = vrot.lane.b32.xlu0 %v2926_v2, %s4946_s8  ;;  %v2989_v2 = vrot.slane %v2905_v61, 1 }
 0x3f4   :  { %v3498_v7 = vpop.f32.mrf.mxu1  ;;  %v2954_v50 = vpop.permute.xlu2 %2953  ;;  %v2929_v4 = vor.u32 %v2927_v3, %v2925_v54  ;;  %v2933_v12 = vrot.slane %v2931_v40, 1 }
 0x3f5   :  { %v2495_v62 = vpop.permute.xlu1 %2494  ;;  %v3008_v14 = vpop.permute.xlu0 %3007  ;;  %v2990_v16 = vsel %vm445_vm1, %v2987_v42, %v2989_v2  ;;  %v10306_v42 = vld [vmem:[#allocation126_spill] sm:$0xff] }
 0x3f6   :  { %v3392_v23 = vsel %vm1497_vm11, %v3344_v8, %v3008_v14  ;;  %v3174_v1 = vsel %vm1252_vm5, %v3126_v41, %v2495_v62  ;;  %v2934_v58 = vsel %vm200_vm0, %v2929_v4, %v2933_v12  ;;  %v3058_v62 = vsel %vm1154_vm3, %v7849_v59, %v10306_v42  ;;  %v10307_v14 = vld [vmem:[#allocation104_spill] sm:$0xff]  ;;  %v10308_v2 = vld [vmem:[#allocation106_spill] sm:$0xff] }
 0x3f7   :  { %4239 = vmatmul.msk.bf16.gmra.mxu1 %vm1570_vm10, %v3392_v23  ;;  %v3222_v9 = vsel %vm1301_vm6, %v3174_v1, %v8425_v21  ;;  %v3106_v8 = vsel %vm1203_vm4, %v3058_v62, %v10307_v14 }
 0x3fa   :  { %2749 = vrot.lane.b32.xlu1 %v2702_v34, %s4943_s23  ;;  %2846 = vrot.lane.b32.xlu2 %v2799_v38, %s4944_s26 }
 0x3fb   :  { %2502 = vrot.lane.b32.xlu0 %v8184_v46, %s4942_s27 }
 0x3fc   :  { %v2744_v43 = vpop.permute.xlu2 %2743 }
 0x3fd   :  { %v2894_v63 = vpop.permute.xlu1 %2893  ;;  %v2839_v6 = vpop.permute.xlu0 %2838 }
 0x3fe   :  { %v3270_v44 = vsel %vm1350_vm7, %v3222_v9, %v2839_v6 }
 0x3ff   :  { %v3318_v27 = vsel %vm1399_vm8, %v3270_v44, %v2894_v63  ;;  %v10309_v63 = vld [vmem:[#allocation84_spill] sm:$0xff] }
 0x400   :  { %v3366_v21 = vsel %vm1448_vm9, %v3318_v27, %v8443_v47 }
 0x402   :  { %2981 = vrot.lane.b32.xlu1 %v2934_v58, %s4946_s8  ;;  %3037 = vrot.lane.b32.xlu2 %v2990_v16, %s4947_s12 }
 0x403   :  { %2901 = vrot.lane.b32.xlu0 %v8449_v36, %s4945_s30  ;;  %v8536_v36 = vpop.f32.mrf.mxu1 }
 0x404   :  { %v2976_v7 = vpop.permute.xlu2 %2975 }
 0x405   :  { %v2475_v46 = vpop.permute.xlu1 %2474  ;;  %v3030_v54 = vpop.permute.xlu0 %3029 }
 0x406   :  { %v3414_v61 = vsel %vm1497_vm11, %v3366_v21, %v3030_v54  ;;  %v3154_v23 = vsel %vm1252_vm5, %v3106_v8, %v2475_v46  ;;  %v10310_v8 = vld [vmem:[#allocation114_spill] sm:$0xff] }
 0x407   :  { %4250 = vmatmul.msk.bf16.gmra.mxu3 %vm1570_vm10, %v3414_v61  ;;  %v3202_v47 = vsel %vm1301_vm6, %v3154_v23, %v8479_v0  ;;  %v3080_v0 = vsel %vm1154_vm3, %v7908_v24, %v10308_v2  ;;  %v3060_v23 = vsel %vm1154_vm3, %v7970_v15, %v10310_v8 }
 0x408   :  { %v3128_v6 = vsel %vm1203_vm4, %v3080_v0, %v10309_v63  ;;  %v10312_v63 = vld [vmem:[#allocation36_spill] sm:$0xff] }
 0x40a   :  { %v8547_v12 = vpop.f32.mrf.mxu3 }
 0x40c   :  { %v2724_v38 = vpop.permute.xlu2 %2723 }
 0x40d   :  { %v2874_v34 = vpop.permute.xlu1 %2873  ;;  %v2819_v3 = vpop.permute.xlu0 %2818 }
 0x40e   :  { %v3250_v40 = vsel %vm1350_vm7, %v3202_v47, %v2819_v3 }
 0x40f   :  { %v3298_v48 = vsel %vm1399_vm8, %v3250_v40, %v2874_v34 }
 0x410   :  { %v3346_v1 = vsel %vm1448_vm9, %v3298_v48, %v2954_v50 }
 0x412   :  { %v8557_v54 = vpop.f32.mrf.mxu3 }
 0x414   :  { %v8542_v26 = vpop.f32.mrf.mxu1  ;;  %v2956_v44 = vpop.permute.xlu2 %2955 }
 0x415   :  { %v2497_v59 = vpop.permute.xlu1 %2496  ;;  %v3010_v41 = vpop.permute.xlu0 %3009 }
 0x416   :  { %v3394_v4 = vsel %vm1497_vm11, %v3346_v1, %v3010_v41  ;;  %v3176_v9 = vsel %vm1252_vm5, %v3128_v6, %v2497_v59  ;;  %v3082_v6 = vsel %vm1154_vm3, %v8027_v25, %v10312_v63 }
 0x417   :  { %4240 = vmatmul.msk.bf16.gmra.mxu1 %vm1570_vm10, %v3394_v4  ;;  %v3224_v50 = vsel %vm1301_vm6, %v3176_v9, %v2744_v43  ;;  %v10311_v43 = vld [vmem:[#allocation85_spill] sm:$0xff]  ;;  %v10313_v9 = vld [vmem:[#allocation31_spill] sm:$0xff] }
 0x418   :  { %v3108_v34 = vsel %vm1203_vm4, %v3060_v23, %v10311_v43  ;;  %v10314_v43 = vld [vmem:[#allocation74_spill] sm:$0xff] }
 0x41c   :  { %v3504_v58 = vpop.f32.mrf.mxu1  ;;  %v2746_v62 = vpop.permute.xlu2 %2745 }
 0x41d   :  { %v2896_v16 = vpop.permute.xlu1 %2895  ;;  %v2841_v27 = vpop.permute.xlu0 %2840 }
 0x41e   :  { %v3272_v46 = vsel %vm1350_vm7, %v3224_v50, %v2841_v27 }
 0x41f   :  { %v3320_v21 = vsel %vm1399_vm8, %v3272_v46, %v2896_v16 }
 0x420   :  { %v3368_v24 = vsel %vm1448_vm9, %v3320_v21, %v2976_v7 }
 0x424   :  { %v2978_v41 = vpop.permute.xlu2 %2977 }
 0x425   :  { %v2477_v61 = vpop.permute.xlu1 %2476  ;;  %v3032_v42 = vpop.permute.xlu0 %3031 }
 0x426   :  { %v3416_v14 = vsel %vm1497_vm11, %v3368_v24, %v3032_v42  ;;  %v3156_v47 = vsel %vm1252_vm5, %v3108_v34, %v2477_v61  ;;  %v10315_v34 = vld [vmem:[#allocation162_spill] sm:$0xff] }
 0x427   :  { %4251 = vmatmul.msk.bf16.gmra.mxu3 %vm1570_vm10, %v3416_v14  ;;  %v3204_v59 = vsel %vm1301_vm6, %v3156_v47, %v2724_v38  ;;  %v3130_v38 = vsel %vm1203_vm4, %v3082_v6, %v10313_v9 }
 0x42a   :  { %v3550_v3 = vpop.f32.mrf.mxu3 }
 0x42c   :  { %v2726_v58 = vpop.permute.xlu2 %2725 }
 0x42d   :  { %v2876_v40 = vpop.permute.xlu1 %2875  ;;  %v2821_v48 = vpop.permute.xlu0 %2820 }
 0x42e   :  { %v3252_v7 = vsel %vm1350_vm7, %v3204_v59, %v2821_v48 }
 0x42f   :  { %v3300_v1 = vsel %vm1399_vm8, %v3252_v7, %v2876_v40 }
 0x430   :  { %v3348_v0 = vsel %vm1448_vm9, %v3300_v1, %v2956_v44 }
 0x432   :  { %v8583_v21 = vpop.f32.mrf.mxu3 }
 0x434   :  { %v8585_v61 = vpop.f32.mrf.mxu1  ;;  %v2958_v24 = vpop.permute.xlu2 %2957 }
 0x435   :  { %v2499_v4 = vpop.permute.xlu1 %2498  ;;  %v3012_v2 = vpop.permute.xlu0 %3011 }
 0x436   :  { %v3396_v15 = vsel %vm1497_vm11, %v3348_v0, %v3012_v2  ;;  %v3178_v16 = vsel %vm1252_vm5, %v3130_v38, %v2499_v4 }
 0x437   :  { %4241 = vmatmul.msk.bf16.gmra.mxu1 %vm1570_vm10, %v3396_v15  ;;  %v3226_v46 = vsel %vm1301_vm6, %v3178_v16, %v2746_v62  ;;  %v3062_v62 = vsel %vm1154_vm3, %v8086_v31, %v10314_v43  ;;  %v10316_v16 = vld [vmem:[#allocation18_spill] sm:$0xff] }
 0x438   :  { %v3110_v3 = vsel %vm1203_vm4, %v3062_v62, %v10315_v34 }
 0x43c   :  { %v8599_v48 = vpop.f32.mrf.mxu1 }
 0x43d   :  { %v2898_v27 = vpop.permute.xlu1 %2897  ;;  %v2843_v50 = vpop.permute.xlu0 %2842 }
 0x43e   :  { %v3274_v44 = vsel %vm1350_vm7, %v3226_v46, %v2843_v50 }
 0x43f   :  { %v3322_v42 = vsel %vm1399_vm8, %v3274_v44, %v2898_v27  ;;  %v3084_v27 = vsel %vm1154_vm3, %v8141_v33, %v10316_v16 }
 0x440   :  { %v3370_v8 = vsel %vm1448_vm9, %v3322_v42, %v2978_v41  ;;  %v2501_v41 = vpop.permute.xlu2 %2500 }
 0x445   :  { %v2479_v25 = vpop.permute.xlu1 %2478  ;;  %v3034_v14 = vpop.permute.xlu0 %3033 }
 0x446   :  { %v3418_v23 = vsel %vm1497_vm11, %v3370_v8, %v3034_v14  ;;  %v3158_v40 = vsel %vm1252_vm5, %v3110_v3, %v2479_v25  ;;  %v10317_v3 = vld [vmem:[#allocation154_spill] sm:$0xff] }
 0x447   :  { %4252 = vmatmul.msk.bf16.gmra.mxu3 %vm1570_vm10, %v3418_v23  ;;  %v3206_v1 = vsel %vm1301_vm6, %v3158_v40, %v2726_v58  ;;  %v3086_v40 = vsel %vm1154_vm3, %v8157_v5, %v10317_v3 }
 0x448   :  { %v2900_v38 = vpop.permute.xlu2 %2899 }
 0x44a   :  { %v8596_v47 = vpop.f32.mrf.mxu3 }
 0x44d   :  { %v2878_v59 = vpop.permute.xlu1 %2877  ;;  %v2823_v7 = vpop.permute.xlu0 %2822 }
 0x44e   :  { %v3254_v4 = vsel %vm1350_vm7, %v3206_v1, %v2823_v7 }
 0x44f   :  { %v3302_v2 = vsel %vm1399_vm8, %v3254_v4, %v2878_v59 }
 0x450   :  { %v3350_v6 = vsel %vm1448_vm9, %v3302_v2, %v2958_v24  ;;  %v2427_v25 = vpop.permute.xlu2 %2426 }
 0x452   :  { %v3556_v0 = vpop.f32.mrf.mxu3 }
 0x454   :  { %v3511_v31 = vpop.f32.mrf.mxu1 }
 0x455   :  { %v2425_v15 = vpop.permute.xlu1 %2424  ;;  %v3014_v63 = vpop.permute.xlu0 %3013 }
 0x456   :  { %v3398_v9 = vsel %vm1497_vm11, %v3350_v6, %v3014_v63  ;;  %v3132_v58 = vsel %vm1203_vm4, %v3084_v27, %v2425_v15 }
 0x457   :  { %4242 = vmatmul.msk.bf16.gmra.mxu1 %vm1570_vm10, %v3398_v9  ;;  %v3180_v44 = vsel %vm1252_vm5, %v3132_v58, %v2501_v41  ;;  %v3134_v41 = vsel %vm1203_vm4, %v3086_v40, %v2427_v25  ;;  %v10322_v40 = vld [vmem:[#allocation9_spill] sm:$0xff] }
 0x458   :  { %v2847_v33 = vpop.permute.xlu2 %2846 }
 0x45c   :  { %v8618_v34 = vpop.f32.mrf.mxu1 }
 0x45d   :  { %v2748_v50 = vpop.permute.xlu0 %2747  ;;  %v2845_v46 = vpop.permute.xlu1 %2844 }
 0x45e   :  { %v3228_v42 = vsel %vm1301_vm6, %v3180_v44, %v2748_v50  ;;  %v8640_v50 = vld [vmem:[%s9704_s2] ss:$0 sm:$0xff] }
 0x45f   :  { %v3276_v24 = vsel %vm1350_vm7, %v3228_v42, %v2845_v46  ;;  %v10318_v46 = vld [vmem:[#allocation165_spill] sm:$0xff] }
 0x460   :  { %v3324_v14 = vsel %vm1399_vm8, %v3276_v24, %v2900_v38  ;;  %v3038_v0 = vpop.permute.xlu2 %3037  ;;  %v8644_v44 = vadd.f32 %v8640_v50, %v10318_v46  ;;  %v10319_v42 = vld [vmem:[#allocation153_spill] sm:$0xff]  ;;  %v10320_v24 = vld [vmem:[#allocation63_spill] sm:$0xff] }
 0x461   :  { %v8648_v25 = vadd.f32 %v8640_v50, %v10319_v42 }
 0x465   :  { %v2980_v8 = vpop.permute.xlu0 %2979  ;;  %v3036_v23 = vpop.permute.xlu1 %3035 }
 0x466   :  { %v3372_v43 = vsel %vm1448_vm9, %v3324_v14, %v2980_v8  ;;  %v8652_v14 = vadd.f32 %v8640_v50, %v10320_v24  ;;  %v1807_v8 = vmul.f32 %v8644_v44, %v8644_v44 }
 0x467   :  { %v3420_v62 = vsel %vm1497_vm11, %v3372_v43, %v3036_v23  ;;  %v10321_v23 = vld [vmem:[#allocation105_spill] sm:$0xff] }
 0x468   :  { %4253 = vmatmul.msk.bf16.gmra.mxu3 %vm1570_vm10, %v3420_v62  ;;  %v8658_v43 = vadd.f32 %v8640_v50, %v10321_v23  ;;  %v1806_v62 = vmul.f32 %v8648_v25, %v8648_v25  ;;  %v1808_v3 = vmul.f32 %v8652_v14, %v8652_v14  ;;  %v8698_v23 = vadd.f32 %v8640_v50, %v7672_v11 }
 0x46a   :  { %v8631_v5 = vpop.f32.mrf.mxu3  ;;  %10327 = vst [vmem:[#allocation21_spill] sm:$0xff] %v8698_v23 }
 0x46d   :  { %v2503_v59 = vpop.permute.xlu0 %2502  ;;  %v2750_v7 = vpop.permute.xlu1 %2749 }
 0x46e   :  { %v3182_v1 = vsel %vm1252_vm5, %v3134_v41, %v2503_v59  ;;  %v8668_v59 = vadd.f32 %v8640_v50, %v10322_v40  ;;  %v1839_v41 = vsel %vm1497_vm11, %v1807_v8, 0.0 }
 0x46f   :  { %v3230_v4 = vsel %vm1301_vm6, %v3182_v1, %v2750_v7  ;;  %v1736_v7 = vsel %vm1497_vm11, %v8648_v25, 0.0  ;;  %v1739_v1 = vsel %vm1497_vm11, %v8652_v14, 0.0 }
 0x470   :  { %v3278_v31 = vsel %vm1350_vm7, %v3230_v4, %v2847_v33  ;;  %v1737_v33 = vsel %vm1497_vm11, %v8644_v44, 0.0  ;;  %10323 = vst [vmem:[#allocation117_spill] sm:$0xff] %v8668_v59  ;;  %v1809_v4 = vmul.f32 %v8658_v43, %v8658_v43  ;;  %v1743_v24 = vsel %vm1497_vm11, %v8668_v59, 0.0 }
 0x472   :  { %v8635_v27 = vpop.f32.mrf.mxu3  ;;  %v1843_v42 = vsel %vm1497_vm11, %v1809_v4, 0.0 }
 0x474   :  { %v8626_v2 = vpop.f32.mrf.mxu1 }
 0x475   :  { %v2902_v15 = vpop.permute.xlu0 %2901  ;;  %v2982_v63 = vpop.permute.xlu1 %2981 }
 0x476   :  { %v3326_v6 = vsel %vm1399_vm8, %v3278_v31, %v2902_v15  ;;  %v1838_v15 = vsel %vm1497_vm11, %v1806_v62, 0.0 }
 0x477   :  { %v3374_v9 = vsel %vm1448_vm9, %v3326_v6, %v2982_v63  ;;  %v1738_v63 = vadd.f32 %v1737_v33, %v1736_v7  ;;  %v1841_v6 = vsel %vm1497_vm11, %v1808_v3, 0.0  ;;  %v8707_v7 = vadd.f32 %v8640_v50, %v7739_v55 }
 0x478   :  { %v3422_v38 = vsel %vm1497_vm11, %v3374_v9, %v3038_v0  ;;  %v10324_v0 = vld [vmem:[#allocation10_spill] sm:$0xff]  ;;  %v1741_v9 = vsel %vm1497_vm11, %v8658_v43, 0.0 }
 0x479   :  { %4254 = vmatmul.msk.bf16.gmra.mxu3 %vm1570_vm10, %v3422_v38  ;;  %v8679_v31 = vadd.f32 %v8640_v50, %v10324_v0  ;;  %v1810_v38 = vmul.f32 %v8668_v59, %v8668_v59  ;;  %v1740_v46 = vadd.f32 %v1739_v1, %v1738_v63  ;;  %10328 = vst [vmem:[#allocation22_spill] sm:$0xff] %v8707_v7 }
 0x47a   :  { %v1813_v0 = vmul.f32 %v8698_v23, %v8698_v23 }
 0x47b   :  { %10325 = vst [vmem:[#allocation136_spill] sm:$0xff] %v8679_v31  ;;  %v1811_v8 = vmul.f32 %v8679_v31, %v8679_v31  ;;  %v1742_v33 = vadd.f32 %v1741_v9, %v1740_v46  ;;  %v1845_v3 = vsel %vm1497_vm11, %v1810_v38, 0.0  ;;  %v1814_v46 = vmul.f32 %v8707_v7, %v8707_v7 }
 0x47c   :  { %v3517_v16 = vpop.f32.mrf.mxu1 }
 0x47d   :  { %v8689_v16 = vadd.f32 %v8640_v50, %v7615_v18  ;;  %v1745_v18 = vsel %vm1497_vm11, %v8679_v31, 0.0  ;;  %v1744_v1 = vadd.f32 %v1743_v24, %v1742_v33  ;;  %v1847_v4 = vsel %vm1497_vm11, %v1811_v8, 0.0 }
 0x47e   :  { %v1851_v33 = vsel %vm1497_vm11, %v1813_v0, 0.0  ;;  %v8751_v0 = vadd.f32 %v8640_v50, %v7917_v20  ;;  %v8944_v31 = vadd.f32 %v8640_v50, %v8542_v26 }
 0x47f   :  { %10326 = vst [vmem:[#allocation137_spill] sm:$0xff] %v8689_v16  ;;  %v1812_v40 = vmul.f32 %v8689_v16, %v8689_v16  ;;  %v1747_v11 = vsel %vm1497_vm11, %v8689_v16, 0.0 }
 0x480   :  { %10334 = vst [vmem:[#allocation67_spill] sm:$0xff] %v8751_v0 }
 0x481   :  { %v1849_v38 = vsel %vm1497_vm11, %v1812_v40, 0.0  ;;  %v8742_v40 = vadd.f32 %v8640_v50, %v7858_v57 }
 0x483   :  { %10333 = vst [vmem:[#allocation51_spill] sm:$0xff] %v8742_v40 }
 0x48a   :  { %v3563_v58 = vpop.f32.mrf.mxu3 }
 0x48b   :  { %v1840_v58 = vadd.f32 %v1839_v41, %v1838_v15  ;;  %v8716_v15 = vadd.f32 %v8640_v50, %v7754_v10  ;;  %v10331_v10 = vld [vmem:[#allocation124_spill] sm:$0xff] }
 0x48c   :  { %v8733_v24 = vadd.f32 %v8640_v50, %v10331_v10  ;;  %v8762_v10 = vadd.f32 %v8640_v50, %v7932_v60  ;;  %v1818_v60 = vmul.f32 %v8751_v0, %v8751_v0 }
 0x48d   :  { %v1842_v62 = vadd.f32 %v1841_v6, %v1840_v58  ;;  %10329 = vst [vmem:[#allocation161_spill] sm:$0xff] %v8716_v15  ;;  %v1746_v6 = vadd.f32 %v1745_v18, %v1744_v1  ;;  %v1749_v58 = vsel %vm1497_vm11, %v8698_v23, 0.0  ;;  %v1815_v18 = vmul.f32 %v8716_v15, %v8716_v15 }
 0x48e   :  { %10332 = vst [vmem:[#allocation43_spill] sm:$0xff] %v8733_v24  ;;  %v1853_v1 = vsel %vm1497_vm11, %v1814_v46, 0.0  ;;  %v1817_v46 = vmul.f32 %v8742_v40, %v8742_v40  ;;  %v8766_v20 = vsel %vm1497_vm11, %v8733_v24, 0.0 }
 0x48f   :  { %v1844_v41 = vadd.f32 %v1843_v42, %v1842_v62  ;;  %v8729_v42 = vadd.f32 %v8640_v50, %v7813_v30  ;;  %v1748_v62 = vadd.f32 %v1747_v11, %v1746_v6  ;;  %10335 = vst [vmem:[#allocation75_spill] sm:$0xff] %v8762_v10 }
 0x491   :  { %v1846_v63 = vadd.f32 %v1845_v3, %v1844_v41  ;;  %10330 = vst [vmem:[#allocation167_spill] sm:$0xff] %v8729_v42  ;;  %v1751_v3 = vsel %vm1497_vm11, %v8707_v7, 0.0  ;;  %v1750_v41 = vadd.f32 %v1749_v58, %v1748_v62  ;;  %v1816_v11 = vmul.f32 %v8729_v42, %v8729_v42 }
 0x492   :  { %v8718_v9 = vpop.f32.mrf.mxu3  ;;  %v1755_v58 = vsel %vm1497_vm11, %v8729_v42, 0.0 }
 0x493   :  { %v1848_v8 = vadd.f32 %v1847_v4, %v1846_v63  ;;  %v1753_v4 = vsel %vm1497_vm11, %v8716_v15, 0.0  ;;  %v1822_v63 = vmul.f32 %v8733_v24, %v8733_v24  ;;  %v1752_v57 = vadd.f32 %v1751_v3, %v1750_v41 }
 0x494   :  { %v8720_v55 = vpop.f32.mrf.mxu1  ;;  %v1757_v41 = vsel %vm1497_vm11, %v8742_v40, 0.0  ;;  %v8781_v24 = vadd.f32 %v8640_v50, %v7994_v35  ;;  %v1759_v40 = vsel %vm1497_vm11, %v8751_v0, 0.0  ;;  %v1819_v35 = vmul.f32 %v8762_v10, %v8762_v10 }
 0x495   :  { %v1850_v30 = vadd.f32 %v1849_v38, %v1848_v8  ;;  %v1855_v38 = vsel %vm1497_vm11, %v1815_v18, 0.0  ;;  %v10336_v8 = vld [vmem:[#allocation125_spill] sm:$0xff]  ;;  %v1754_v3 = vadd.f32 %v1753_v4, %v1752_v57  ;;  %v8784_v42 = vsel %vm1497_vm11, %v1822_v63, 0.0 }
 0x496   :  { %v8770_v62 = vadd.f32 %v8640_v50, %v10336_v8  ;;  %10338 = vst [vmem:[#allocation95_spill] sm:$0xff] %v8781_v24  ;;  %v10339_v8 = vld [vmem:[#allocation32_spill] sm:$0xff]  ;;  %v1859_v57 = vsel %vm1497_vm11, %v1817_v46, 0.0  ;;  %v8799_v63 = vadd.f32 %v8640_v50, %v8036_v28  ;;  %v8809_v46 = vadd.f32 %v8640_v50, %v7608_v39 }
 0x497   :  { %v1852_v6 = vadd.f32 %v1851_v33, %v1850_v30  ;;  %v1857_v30 = vsel %vm1497_vm11, %v1816_v11, 0.0  ;;  %v1761_v0 = vsel %vm1497_vm11, %v8762_v10, 0.0  ;;  %v1820_v28 = vmul.f32 %v8781_v24, %v8781_v24 }
 0x498   :  { %10337 = vst [vmem:[#allocation89_spill] sm:$0xff] %v8770_v62  ;;  %v8824_v39 = vadd.f32 %v8640_v50, %v7723_v51  ;;  %v1825_v51 = vmul.f32 %v8809_v46, %v8809_v46 }
 0x499   :  { %v1854_v33 = vadd.f32 %v1853_v1, %v1852_v6  ;;  %v8788_v1 = vadd.f32 %v8640_v50, %v10339_v8  ;;  %v1756_v6 = vadd.f32 %v1755_v58, %v1754_v3  ;;  %10341 = vst [vmem:[#allocation115_spill] sm:$0xff] %v8799_v63  ;;  %v8803_v8 = vsel %vm1497_vm11, %v8770_v62, 0.0 }
 0x49a   :  { %10342 = vst [vmem:[#allocation144_spill] sm:$0xff] %v8809_v46  ;;  %v1861_v3 = vsel %vm1497_vm11, %v1818_v60, 0.0  ;;  %v1863_v60 = vsel %vm1497_vm11, %v1819_v35, 0.0  ;;  %v1865_v35 = vsel %vm1497_vm11, %v1820_v28, 0.0  ;;  %v1827_v28 = vmul.f32 %v8824_v39, %v8824_v39 }
 0x49b   :  { %10340 = vst [vmem:[#allocation109_spill] sm:$0xff] %v8788_v1  ;;  %v1856_v4 = vadd.f32 %v1855_v38, %v1854_v33  ;;  %v1823_v38 = vmul.f32 %v8770_v62, %v8770_v62  ;;  %v1758_v33 = vadd.f32 %v1757_v41, %v1756_v6  ;;  %v1824_v15 = vmul.f32 %v8788_v1, %v8788_v1 }
 0x49c   :  { %v8790_v11 = vpop.f32.mrf.mxu1  ;;  %v8820_v62 = vadd.f32 %v8640_v50, %v7687_v52  ;;  %10344 = vst [vmem:[#allocation135_spill] sm:$0xff] %v8824_v39  ;;  %v1821_v6 = vmul.f32 %v8799_v63, %v8799_v63  ;;  %v8834_v52 = vsel %vm1497_vm11, %v8788_v1, 0.0 }
 0x49d   :  { %v1858_v58 = vadd.f32 %v1857_v30, %v1856_v4  ;;  %v1760_v41 = vadd.f32 %v1759_v40, %v1758_v33  ;;  %v1763_v4 = vsel %vm1497_vm11, %v8781_v24, 0.0  ;;  %v1871_v10 = vsel %vm1497_vm11, %v1823_v38, 0.0 }
 0x49e   :  { %10343 = vst [vmem:[#allocation129_spill] sm:$0xff] %v8820_v62  ;;  %v1765_v33 = vsel %vm1497_vm11, %v8799_v63, 0.0  ;;  %v8843_v24 = vadd.f32 %v8640_v50, %v8150_v53  ;;  %v1826_v38 = vmul.f32 %v8820_v62, %v8820_v62  ;;  %v8857_v53 = vadd.f32 %v8640_v50, %v8276_v32 }
 0x49f   :  { %v1860_v30 = vadd.f32 %v1859_v57, %v1858_v58  ;;  %v1762_v40 = vadd.f32 %v1761_v0, %v1760_v41  ;;  %v8849_v0 = vadd.f32 %v8640_v50, %v8108_v45  ;;  %v1867_v41 = vsel %vm1497_vm11, %v1821_v6, 0.0 }
 0x4a0   :  { %v8865_v45 = vadd.f32 %v8640_v50, %v7782_v56  ;;  %v8872_v6 = vsel %vm1497_vm11, %v8820_v62, 0.0  ;;  %v3655_v32 = vmul.f32 %v8843_v24, %v8843_v24  ;;  %v8885_v56 = vsel %vm1497_vm11, %v8824_v39, 0.0 }
 0x4a1   :  { %v1862_v57 = vadd.f32 %v1861_v3, %v1860_v30  ;;  %v1764_v7 = vadd.f32 %v1763_v4, %v1762_v40  ;;  %v1873_v30 = vsel %vm1497_vm11, %v1824_v15, 0.0  ;;  %v8868_v15 = vsel %vm1497_vm11, %v1825_v51, 0.0 }
 0x4a2   :  { %10345 = vst [vmem:[#allocation13_spill] sm:$0xff] %v8865_v45  ;;  %v8878_v40 = vadd.f32 %v8640_v50, %v8295_v37  ;;  %v8890_v51 = vsel %vm1497_vm11, %v1827_v28, 0.0  ;;  %v3656_v37 = vmul.f32 %v8857_v53, %v8857_v53  ;;  %v3587_v39 = vsel %vm1497_vm11, %v8857_v53, 0.0 }
 0x4a3   :  { %v1864_v1 = vadd.f32 %v1863_v60, %v1862_v57  ;;  %v8861_v60 = vsel %vm1497_vm11, %v8809_v46, 0.0  ;;  %v1766_v57 = vadd.f32 %v1765_v33, %v1764_v7  ;;  %v8898_v33 = vadd.f32 %v8640_v50, %v8433_v17  ;;  %v10346_v46 = vld [vmem:[#allocation24_spill] sm:$0xff] }
 0x4a4   :  { %v3657_v17 = vmul.f32 %v8878_v40, %v8878_v40  ;;  %v8916_v62 = vadd.f32 %v8640_v50, %v8477_v22  ;;  %v3589_v23 = vsel %vm1497_vm11, %v8878_v40, 0.0  ;;  %v8931_v22 = vadd.f32 %v8640_v50, %v8536_v36 }
 0x4a5   :  { %v1866_v4 = vadd.f32 %v1865_v35, %v1864_v1  ;;  %v3654_v1 = vmul.f32 %v8849_v0, %v8849_v0  ;;  %v3585_v35 = vsel %vm1497_vm11, %v8843_v24, 0.0  ;;  %v1768_v28 = vadd.f32 %v8766_v20, %v1766_v57 }
 0x4a6   :  { %v3658_v16 = vmul.f32 %v8898_v33, %v8898_v33 }
 0x4a7   :  { %v1868_v7 = vadd.f32 %v1867_v41, %v1866_v4  ;;  %v3584_v41 = vsel %vm1497_vm11, %v8849_v0, 0.0  ;;  %v3687_v4 = vsel %vm1497_vm11, %v3655_v32, 0.0  ;;  %v3686_v57 = vsel %vm1497_vm11, %v3654_v1, 0.0 }
 0x4a8   :  { %v3586_v63 = vadd.f32 %v3585_v35, %v3584_v41  ;;  %v3689_v32 = vsel %vm1497_vm11, %v3656_v37, 0.0  ;;  %v3691_v35 = vsel %vm1497_vm11, %v3657_v17, 0.0  ;;  %v3591_v37 = vsel %vm1497_vm11, %v8898_v33, 0.0 }
 0x4a9   :  { %v1870_v20 = vadd.f32 %v8784_v42, %v1868_v7  ;;  %v1770_v42 = vadd.f32 %v8803_v8, %v1768_v28  ;;  %v3688_v7 = vadd.f32 %v3687_v4, %v3686_v57  ;;  %v3659_v41 = vmul.f32 %v8916_v62, %v8916_v62 }
 0x4aa   :  { %v8772_v18 = vpop.f32.mrf.mxu3  ;;  %v3588_v1 = vadd.f32 %v3587_v39, %v3586_v63  ;;  %v3693_v63 = vsel %vm1497_vm11, %v3658_v16, 0.0  ;;  %v3593_v39 = vsel %vm1497_vm11, %v8916_v62, 0.0  ;;  %v3660_v4 = vmul.f32 %v8931_v22, %v8931_v22 }
 0x4ab   :  { %v3690_v8 = vadd.f32 %v3689_v32, %v3688_v7  ;;  %v8957_v17 = vadd.f32 %v8640_v50, %v8585_v61  ;;  %v1772_v57 = vadd.f32 %v8834_v52, %v1770_v42  ;;  %v3595_v16 = vsel %vm1497_vm11, %v8931_v22, 0.0  ;;  %v10348_v61 = vld [vmem:[#allocation52_spill] sm:$0xff] }
 0x4ac   :  { %v3590_v28 = vadd.f32 %v3589_v23, %v3588_v1  ;;  %v3695_v23 = vsel %vm1497_vm11, %v3659_v41, 0.0  ;;  %v3661_v32 = vmul.f32 %v8944_v31, %v8944_v31  ;;  %v8969_v7 = vadd.f32 %v8640_v50, %v8599_v48 }
 0x4ad   :  { %v8973_v1 = vadd.f32 %v8640_v50, %v10348_v61  ;;  %v3662_v41 = vmul.f32 %v8957_v17, %v8957_v17 }
 0x4af   :  { %10349 = vst [vmem:[#allocation142_spill] sm:$0xff] %v8973_v1 }
 0x4b2   :  { %v3569_v58 = vpop.f32.mrf.mxu3 }
 0x4b3   :  { %v8881_v58 = vsel %vm1497_vm11, %v1826_v38, 0.0  ;;  %v8902_v38 = vsel %vm1497_vm11, %v8865_v45, 0.0 }
 0x4b4   :  { %v3524_v3 = vpop.f32.mrf.mxu1 }
 0x4b5   :  { %v1828_v3 = vmul.f32 %v8865_v45, %v8865_v45  ;;  %v8920_v45 = vadd.f32 %v8640_v50, %v10346_v46 }
 0x4b7   :  { %10347 = vst [vmem:[#allocation19_spill] sm:$0xff] %v8920_v45  ;;  %v8934_v46 = vsel %vm1497_vm11, %v1828_v3, 0.0  ;;  %v8948_v36 = vsel %vm1497_vm11, %v8920_v45, 0.0  ;;  %v1872_v3 = vadd.f32 %v1871_v10, %v1870_v20  ;;  %v1829_v26 = vmul.f32 %v8920_v45, %v8920_v45 }
 0x4b8   :  { %v3692_v10 = vadd.f32 %v3691_v35, %v3690_v8  ;;  %v3592_v20 = vadd.f32 %v3591_v37, %v3590_v28  ;;  %v3697_v35 = vsel %vm1497_vm11, %v3660_v4, 0.0  ;;  %v3597_v37 = vsel %vm1497_vm11, %v8944_v31, 0.0 }
 0x4b9   :  { %v1874_v45 = vadd.f32 %v1873_v30, %v1872_v3  ;;  %v8982_v8 = vadd.f32 %v8640_v50, %v8618_v34  ;;  %v8985_v48 = vsel %vm1497_vm11, %v1829_v26, 0.0  ;;  %v1774_v28 = vadd.f32 %v8861_v60, %v1772_v57 }
 0x4ba   :  { %v3694_v52 = vadd.f32 %v3693_v63, %v3692_v10  ;;  %v3594_v42 = vadd.f32 %v3593_v39, %v3592_v20  ;;  %v3699_v63 = vsel %vm1497_vm11, %v3661_v32, 0.0  ;;  %v3599_v39 = vsel %vm1497_vm11, %v8957_v17, 0.0  ;;  %v10350_v32 = vld [vmem:[#allocation53_spill] sm:$0xff] }
 0x4bb   :  { %v3663_v4 = vmul.f32 %v8969_v7, %v8969_v7  ;;  %v8995_v10 = vadd.f32 %v8640_v50, %v8626_v2  ;;  %v8999_v34 = vsel %vm1497_vm11, %v8973_v1, 0.0  ;;  %v1876_v60 = vadd.f32 %v8868_v15, %v1874_v45 }
 0x4bc   :  { %v3696_v30 = vadd.f32 %v3695_v23, %v3694_v52  ;;  %v3596_v3 = vadd.f32 %v3595_v16, %v3594_v42  ;;  %v3701_v20 = vsel %vm1497_vm11, %v3662_v41, 0.0  ;;  %v3601_v23 = vsel %vm1497_vm11, %v8969_v7, 0.0  ;;  %v3525_v42 = vpop.f32.mrf.mxu1 }
 0x4bd   :  { %v3664_v16 = vmul.f32 %v8982_v8, %v8982_v8  ;;  %v9009_v2 = vadd.f32 %v8640_v50, %v8720_v55  ;;  %v9013_v61 = vadd.f32 %v8640_v50, %v10350_v32  ;;  %v1776_v45 = vadd.f32 %v8872_v6, %v1774_v28 }
 0x4be   :  { %v3698_v26 = vadd.f32 %v3697_v35, %v3696_v30  ;;  %v3598_v57 = vadd.f32 %v3597_v37, %v3596_v3  ;;  %v3703_v35 = vsel %vm1497_vm11, %v3663_v4, 0.0  ;;  %v3603_v37 = vsel %vm1497_vm11, %v8982_v8, 0.0 }
 0x4bf   :  { %10351 = vst [vmem:[#allocation160_spill] sm:$0xff] %v9013_v61  ;;  %v3665_v41 = vmul.f32 %v8995_v10, %v8995_v10  ;;  %v9023_v55 = vadd.f32 %v8640_v50, %v8790_v11  ;;  %v1830_v30 = vmul.f32 %v8973_v1, %v8973_v1  ;;  %v1878_v6 = vadd.f32 %v8881_v58, %v1876_v60  ;;  %v10352_v11 = vld [vmem:[#allocation76_spill] sm:$0xff] }
 0x4c0   :  { %v3700_v15 = vadd.f32 %v3699_v63, %v3698_v26  ;;  %v3600_v52 = vadd.f32 %v3599_v39, %v3598_v57  ;;  %v3705_v63 = vsel %vm1497_vm11, %v3664_v16, 0.0  ;;  %v3605_v39 = vsel %vm1497_vm11, %v8995_v10, 0.0 }
 0x4c1   :  { %v3666_v4 = vmul.f32 %v9009_v2, %v9009_v2  ;;  %v9034_v26 = vadd.f32 %v8640_v50, %v3525_v42  ;;  %v9038_v57 = vadd.f32 %v8640_v50, %v10352_v11  ;;  %v1778_v32 = vadd.f32 %v8885_v56, %v1776_v45 }
 0x4c2   :  { %v3702_v28 = vadd.f32 %v3701_v20, %v3700_v15  ;;  %v3602_v3 = vadd.f32 %v3601_v23, %v3600_v52  ;;  %v1831_v20 = vmul.f32 %v9013_v61, %v9013_v61  ;;  %v3707_v23 = vsel %vm1497_vm11, %v3665_v41, 0.0 }
 0x4c3   :  { %10353 = vst [vmem:[#allocation41_spill] sm:$0xff] %v9038_v57  ;;  %v3607_v16 = vsel %vm1497_vm11, %v9009_v2, 0.0  ;;  %v3667_v15 = vmul.f32 %v9023_v55, %v9023_v55  ;;  %v1885_v52 = vsel %vm1497_vm11, %v1830_v30, 0.0  ;;  %v1880_v42 = vadd.f32 %v8890_v51, %v1878_v6 }
 0x4c4   :  { %v3704_v58 = vadd.f32 %v3703_v35, %v3702_v28  ;;  %v3604_v60 = vadd.f32 %v3603_v37, %v3602_v3  ;;  %v1785_v56 = vsel %vm1497_vm11, %v9013_v61, 0.0  ;;  %v3709_v45 = vsel %vm1497_vm11, %v3666_v4, 0.0  ;;  %v10354_v4 = vld [vmem:[#allocation77_spill] sm:$0xff] }
 0x4c5   :  { %v3609_v35 = vsel %vm1497_vm11, %v9023_v55, 0.0  ;;  %v3668_v37 = vmul.f32 %v9034_v26, %v9034_v26  ;;  %v1832_v41 = vmul.f32 %v9038_v57, %v9038_v57  ;;  %v1780_v30 = vadd.f32 %v8902_v38, %v1778_v32 }
 0x4c6   :  { %v3706_v11 = vadd.f32 %v3705_v63, %v3704_v58  ;;  %v3606_v1 = vadd.f32 %v3605_v39, %v3604_v60  ;;  %v1887_v6 = vsel %vm1497_vm11, %v1831_v20, 0.0  ;;  %v9063_v3 = vadd.f32 %v8640_v50, %v8317_v49 }
 0x4c7   :  { %v3711_v63 = vsel %vm1497_vm11, %v3667_v15, 0.0  ;;  %v3611_v39 = vsel %vm1497_vm11, %v9034_v26, 0.0  ;;  %v9070_v58 = vadd.f32 %v8640_v50, %v10354_v4  ;;  %v1882_v60 = vadd.f32 %v8934_v46, %v1880_v42 }
 0x4c8   :  { %v3708_v28 = vadd.f32 %v3707_v23, %v3706_v11  ;;  %v3608_v51 = vadd.f32 %v3607_v16, %v3606_v1  ;;  %v1787_v20 = vsel %vm1497_vm11, %v9038_v57, 0.0  ;;  %v9077_v49 = vadd.f32 %v8640_v50, %v8348_v13 }
 0x4c9   :  { %10355 = vst [vmem:[#allocation42_spill] sm:$0xff] %v9070_v58  ;;  %v3713_v23 = vsel %vm1497_vm11, %v3668_v37, 0.0  ;;  %v1889_v15 = vsel %vm1497_vm11, %v1832_v41, 0.0  ;;  %v1782_v11 = vadd.f32 %v8948_v36, %v1780_v30  ;;  %v1789_v41 = vsel %vm1497_vm11, %v9070_v58, 0.0 }
 0x4ca   :  { %v3710_v38 = vadd.f32 %v3709_v45, %v3708_v28  ;;  %v3610_v32 = vadd.f32 %v3609_v35, %v3608_v51  ;;  %v3670_v45 = vmul.f32 %v9063_v3, %v9063_v3  ;;  %v9089_v35 = vadd.f32 %v8640_v50, %v8431_v29 }
 0x4cb   :  { %v1884_v36 = vadd.f32 %v8985_v48, %v1882_v60  ;;  %v3615_v51 = vsel %vm1497_vm11, %v9063_v3, 0.0  ;;  %v3671_v29 = vmul.f32 %v9077_v49, %v9077_v49  ;;  %v1784_v48 = vadd.f32 %v8999_v34, %v1782_v11 }
 0x4cc   :  { %v3712_v46 = vadd.f32 %v3711_v63, %v3710_v38  ;;  %v3612_v42 = vadd.f32 %v3611_v39, %v3610_v32  ;;  %v9104_v63 = vadd.f32 %v8640_v50, %v8466_v19  ;;  %v9106_v39 = vpop.f32.mrf.mxu3  ;;  %v1833_v38 = vmul.f32 %v9070_v58, %v9070_v58 }
 0x4cd   :  { %v3672_v19 = vmul.f32 %v9089_v35, %v9089_v35 }
 0x4ce   :  { %v3714_v30 = vadd.f32 %v3713_v23, %v3712_v46  ;;  %v3617_v23 = vsel %vm1497_vm11, %v9077_v49, 0.0  ;;  %v9119_v46 = vadd.f32 %v8640_v50, %v8547_v12  ;;  %v9132_v12 = vadd.f32 %v8640_v50, %v8557_v54 }
 0x4d4   :  { %v3528_v1 = vpop.f32.mrf.mxu1 }
 0x4d5   :  { %v9081_v16 = vadd.f32 %v8640_v50, %v3528_v1  ;;  %v3717_v1 = vsel %vm1497_vm11, %v3670_v45, 0.0  ;;  %v3719_v45 = vsel %vm1497_vm11, %v3671_v29, 0.0  ;;  %v3621_v29 = vsel %vm1497_vm11, %v9104_v63, 0.0 }
 0x4d7   :  { %v3613_v13 = vsel %vm1497_vm11, %v9081_v16, 0.0  ;;  %v3669_v37 = vmul.f32 %v9081_v16, %v9081_v16 }
 0x4d8   :  { %v3614_v28 = vadd.f32 %v3613_v13, %v3612_v42  ;;  %v10356_v42 = vld [vmem:[#allocation96_spill] sm:$0xff] }
 0x4d9   :  { %v3715_v4 = vsel %vm1497_vm11, %v3669_v37, 0.0  ;;  %v9123_v13 = vadd.f32 %v8640_v50, %v10356_v42  ;;  %v1886_v37 = vadd.f32 %v1885_v52, %v1884_v36  ;;  %v1786_v42 = vadd.f32 %v1785_v56, %v1784_v48 }
 0x4da   :  { %v3616_v60 = vadd.f32 %v3615_v51, %v3614_v28  ;;  %v3716_v32 = vadd.f32 %v3715_v4, %v3714_v30  ;;  %v3619_v28 = vsel %vm1497_vm11, %v9089_v35, 0.0  ;;  %v3673_v51 = vmul.f32 %v9104_v63, %v9104_v63 }
 0x4db   :  { %10357 = vst [vmem:[#allocation65_spill] sm:$0xff] %v9123_v13  ;;  %v1891_v4 = vsel %vm1497_vm11, %v1833_v38, 0.0  ;;  %v3721_v36 = vsel %vm1497_vm11, %v3672_v19, 0.0  ;;  %v1791_v54 = vsel %vm1497_vm11, %v9123_v13, 0.0  ;;  %v3675_v19 = vmul.f32 %v9132_v12, %v9132_v12 }
 0x4dc   :  { %v3618_v34 = vadd.f32 %v3617_v23, %v3616_v60  ;;  %v3718_v11 = vadd.f32 %v3717_v1, %v3716_v32  ;;  %v3530_v30 = vpop.f32.mrf.mxu1  ;;  %v3674_v60 = vmul.f32 %v9119_v46, %v9119_v46  ;;  %v9142_v32 = vadd.f32 %v8640_v50, %v8583_v21 }
 0x4dd   :  { %v1888_v1 = vadd.f32 %v1887_v6, %v1886_v37  ;;  %v3723_v48 = vsel %vm1497_vm11, %v3673_v51, 0.0  ;;  %v3623_v23 = vsel %vm1497_vm11, %v9119_v46, 0.0  ;;  %v1788_v21 = vadd.f32 %v1787_v20, %v1786_v42  ;;  %v10358_v20 = vld [vmem:[#allocation97_spill] sm:$0xff] }
 0x4de   :  { %v3620_v58 = vadd.f32 %v3619_v28, %v3618_v34  ;;  %v3720_v52 = vadd.f32 %v3719_v45, %v3718_v11  ;;  %v9153_v34 = vadd.f32 %v8640_v50, %v8596_v47  ;;  %v1834_v11 = vmul.f32 %v9123_v13, %v9123_v13  ;;  %v3573_v47 = vpop.f32.mrf.mxu3 }
 0x4df   :  { %v3625_v37 = vsel %vm1497_vm11, %v9132_v12, 0.0  ;;  %v3676_v45 = vmul.f32 %v9142_v32, %v9142_v32  ;;  %v9164_v28 = vadd.f32 %v8640_v50, %v8631_v5  ;;  %v1890_v51 = vadd.f32 %v1889_v15, %v1888_v1 }
 0x4e0   :  { %v3622_v38 = vadd.f32 %v3621_v29, %v3620_v58  ;;  %v3722_v56 = vadd.f32 %v3721_v36, %v3720_v52  ;;  %v3725_v58 = vsel %vm1497_vm11, %v3674_v60, 0.0  ;;  %v9168_v42 = vadd.f32 %v8640_v50, %v10358_v20 }
 0x4e1   :  { %v3727_v29 = vsel %vm1497_vm11, %v3675_v19, 0.0  ;;  %v3627_v60 = vsel %vm1497_vm11, %v9142_v32, 0.0  ;;  %v9177_v5 = vadd.f32 %v8640_v50, %v8635_v27  ;;  %v1893_v15 = vsel %vm1497_vm11, %v1834_v11, 0.0  ;;  %v10360_v11 = vld [vmem:[#allocation116_spill] sm:$0xff] }
 0x4e2   :  { %v3624_v30 = vadd.f32 %v3623_v23, %v3622_v38  ;;  %v3724_v6 = vadd.f32 %v3723_v48, %v3722_v56  ;;  %10359 = vst [vmem:[#allocation66_spill] sm:$0xff] %v9168_v42  ;;  %v3677_v38 = vmul.f32 %v9153_v34, %v9153_v34  ;;  %v1790_v56 = vadd.f32 %v1789_v41, %v1788_v21 }
 0x4e3   :  { %v3729_v23 = vsel %vm1497_vm11, %v3676_v45, 0.0  ;;  %v3629_v19 = vsel %vm1497_vm11, %v9153_v34, 0.0  ;;  %v1835_v27 = vmul.f32 %v9168_v42, %v9168_v42  ;;  %v3631_v20 = vsel %vm1497_vm11, %v9164_v28, 0.0 }
 0x4e4   :  { %v3626_v52 = vadd.f32 %v3625_v37, %v3624_v30  ;;  %v3726_v36 = vadd.f32 %v3725_v58, %v3724_v6  ;;  %v3678_v30 = vmul.f32 %v9164_v28, %v9164_v28  ;;  %v9187_v6 = vadd.f32 %v8640_v50, %v8718_v9 }
 0x4e5   :  { %v1892_v58 = vadd.f32 %v1891_v4, %v1890_v51  ;;  %v9193_v37 = vadd.f32 %v8640_v50, %v10360_v11  ;;  %v3731_v45 = vsel %vm1497_vm11, %v3677_v38, 0.0  ;;  %v1792_v9 = vadd.f32 %v1791_v54, %v1790_v56 }
 0x4e6   :  { %v3628_v1 = vadd.f32 %v3627_v60, %v3626_v52  ;;  %v3728_v48 = vadd.f32 %v3727_v29, %v3726_v36  ;;  %v3679_v52 = vmul.f32 %v9177_v5, %v9177_v5  ;;  %v10361_v36 = vld [vmem:[#allocation145_spill] sm:$0xff]  ;;  %v3733_v60 = vsel %vm1497_vm11, %v3678_v30, 0.0 }
 0x4e7   :  { %v9202_v4 = vadd.f32 %v8640_v50, %v10361_v36  ;;  %v3680_v38 = vmul.f32 %v9187_v6, %v9187_v6  ;;  %v1894_v54 = vadd.f32 %v1893_v15, %v1892_v58  ;;  %v1793_v56 = vsel %vm1497_vm11, %v9168_v42, 0.0 }
 0x4e8   :  { %v3730_v41 = vadd.f32 %v3729_v23, %v3728_v48  ;;  %v3630_v21 = vadd.f32 %v3629_v19, %v3628_v1  ;;  %v3633_v1 = vsel %vm1497_vm11, %v9177_v5, 0.0  ;;  %v9211_v48 = vadd.f32 %v8640_v50, %v8772_v18 }
 0x4e9   :  { %v1836_v30 = vmul.f32 %v9193_v37, %v9193_v37  ;;  %v3735_v11 = vsel %vm1497_vm11, %v3679_v52, 0.0  ;;  %v1795_v18 = vsel %vm1497_vm11, %v9193_v37, 0.0  ;;  %v1837_v36 = vmul.f32 %v9202_v4, %v9202_v4 }
 0x4ea   :  { %v3632_v51 = vadd.f32 %v3631_v20, %v3630_v21  ;;  %v3732_v29 = vadd.f32 %v3731_v45, %v3730_v41  ;;  %v1895_v41 = vsel %vm1497_vm11, %v1835_v27, 0.0  ;;  %v3635_v45 = vsel %vm1497_vm11, %v9187_v6, 0.0 }
 0x4eb   :  { %v3576_v23 = vpop.f32.mrf.mxu3  ;;  %v1794_v20 = vadd.f32 %v1793_v56, %v1792_v9  ;;  %v3681_v27 = vmul.f32 %v9211_v48, %v9211_v48  ;;  %v9230_v52 = vadd.f32 %v8640_v50, %v9106_v39  ;;  %v1897_v9 = vsel %vm1497_vm11, %v1836_v30, 0.0 }
 0x4ec   :  { %v3634_v19 = vadd.f32 %v3633_v1, %v3632_v51  ;;  %v3734_v21 = vadd.f32 %v3733_v60, %v3732_v29  ;;  %v3737_v51 = vsel %vm1497_vm11, %v3680_v38, 0.0  ;;  %v1896_v29 = vadd.f32 %v1895_v41, %v1894_v54 }
 0x4ed   :  { %10362 = vst [vmem:[#allocation87_spill] sm:$0xff] %v9230_v52  ;;  %v1797_v1 = vsel %vm1497_vm11, %v9202_v4, 0.0  ;;  %v3637_v23 = vsel %vm1497_vm11, %v9211_v48, 0.0  ;;  %v1796_v56 = vadd.f32 %v1795_v18, %v1794_v20  ;;  %v1899_v38 = vsel %vm1497_vm11, %v1837_v36, 0.0 }
 0x4ee   :  { %v3636_v15 = vadd.f32 %v3635_v45, %v3634_v19  ;;  %v3736_v58 = vadd.f32 %v3735_v11, %v3734_v21  ;;  %v3739_v21 = vsel %vm1497_vm11, %v3681_v27, 0.0  ;;  %v3682_v39 = vmul.f32 %v9230_v52, %v9230_v52 }
 0x4ef   :  { %v9242_v54 = vadd.f32 %v8640_v50, %v3573_v47  ;;  %v1898_v30 = vadd.f32 %v1897_v9, %v1896_v29  ;;  %v1798_v11 = vadd.f32 %v1797_v1, %v1796_v56  ;;  %v3639_v20 = vsel %vm1497_vm11, %v9230_v52, 0.0 }
 0x4f0   :  { %v3738_v60 = vadd.f32 %v3737_v51, %v3736_v58  ;;  %v3638_v19 = vadd.f32 %v3637_v23, %v3636_v15  ;;  %v4948_v58 = vmov 512.0   ;;  %v3741_v51 = vsel %vm1497_vm11, %v3682_v39, 0.0 }
 0x4f1   :  { %10363 = vst [vmem:[#allocation88_spill] sm:$0xff] %v9242_v54  ;;  %4844 = vrcp.f32 %v4948_v58  ;;  %v1900_v15 = vadd.f32 %v1899_v38, %v1898_v30  ;;  %v3683_v47 = vmul.f32 %v9242_v54, %v9242_v54  ;;  %v1799_v27 = vrot.slane %v1798_v11, 4 }
 0x4f2   :  { %v3740_v45 = vadd.f32 %v3739_v21, %v3738_v60  ;;  %v3640_v36 = vadd.f32 %v3639_v20, %v3638_v19  ;;  %v3641_v29 = vsel %vm1497_vm11, %v9242_v54, 0.0 }
 0x4f3   :  { %v3577_v41 = vpop.f32.mrf.mxu3  ;;  %v1901_v1 = vrot.slane %v1900_v15, 4  ;;  %v3743_v21 = vsel %vm1497_vm11, %v3683_v47, 0.0  ;;  %v1800_v38 = vadd.f32 %v1799_v27, %v1798_v11 }
 0x4f4   :  { %v9247_v18 = vadd.f32 %v8640_v50, %v3577_v41  ;;  %v3742_v23 = vadd.f32 %v3741_v51, %v3740_v45  ;;  %v3642_v56 = vadd.f32 %v3641_v29, %v3640_v36 }
 0x4f5   :  { %v1902_v20 = vadd.f32 %v1901_v1, %v1900_v15  ;;  %v1801_v57 = vrot.slane %v1800_v38, 2 }
 0x4f6   :  { %10364 = vst [vmem:[#allocation107_spill] sm:$0xff] %v9247_v18  ;;  %v3684_v60 = vmul.f32 %v9247_v18, %v9247_v18  ;;  %v3643_v19 = vsel %vm1497_vm11, %v9247_v18, 0.0  ;;  %v3744_v39 = vadd.f32 %v3743_v21, %v3742_v23 }
 0x4f7   :  { %v4845_v9 = vpop.eup %4844  ;;  %v3644_v51 = vadd.f32 %v3643_v19, %v3642_v56  ;;  %v1903_v59 = vrot.slane %v1902_v20, 2  ;;  %v1802_v23 = vadd.f32 %v1801_v57, %v1800_v38 }
 0x4f8   :  { %v3745_v30 = vsel %vm1497_vm11, %v3684_v60, 0.0  ;;  %v3757_v58 = vmul.f32 512.0, %v4845_v9  ;;  %vm3761_vm12 = vweird.f32 %v4845_v9 }
 0x4f9   :  { %v3746_v36 = vadd.f32 %v3745_v30, %v3744_v39  ;;  %v1803_v56 = vrot.slane %v1802_v23, 1 }
 0x4fa   :  { %v3758_v61 = vsub.f32 1.0, %v3757_v58 }
 0x4fc   :  { %v3580_v41 = vpop.f32.mrf.mxu3 }
 0x4fd   :  { %v3581_v45 = vadd.f32 %v8640_v50, %v3580_v41  ;;  %v3759_v50 = vmul.f32 %v4845_v9, %v3758_v61  ;;  %v1904_v41 = vadd.f32 %v1903_v59, %v1902_v20 }
 0x4ff   :  { %v3645_v42 = vsel %vm1497_vm11, %v3581_v45, 0.0  ;;  %v3685_v13 = vmul.f32 %v3581_v45, %v3581_v45  ;;  %v3760_v52 = vadd.f32 %v4845_v9, %v3759_v50  ;;  %v1905_v39 = vrot.slane %v1904_v41, 1 }
 0x500   :  { %v3646_v29 = vadd.f32 %v3645_v42, %v3644_v51 }
 0x501   :  { %v3747_v47 = vsel %vm1497_vm11, %v3685_v13, 0.0  ;;  %v1804_v13 = vadd.f32 %v1803_v56, %v1802_v23  ;;  %v1906_v57 = vadd.f32 %v1905_v39, %v1904_v41 }
 0x502   :  { %v3647_v11 = vrot.slane %v3646_v29, 4  ;;  %v3748_v27 = vadd.f32 %v3747_v47, %v3746_v36  ;;  %v3762_v36 = vsel %vm3761_vm12, %v4845_v9, %v3760_v52  ;;  %v3767_v52 = vld [vmem:[%s9705_s3] sm:$0x1]  ;;  %s4949_s3 = smov [#allocation2]  }
 0x504   :  { %v3648_v21 = vadd.f32 %v3647_v11, %v3646_v29  ;;  %v3749_v60 = vrot.slane %v3748_v27, 4  ;;  %v3582_v18 = vpop.f32.mrf.mxu3 }
 0x506   :  { %v3649_v15 = vrot.slane %v3648_v21, 2  ;;  %v3750_v1 = vadd.f32 %v3749_v60, %v3748_v27 }
 0x508   :  { %v3650_v19 = vadd.f32 %v3649_v15, %v3648_v21  ;;  %v3751_v54 = vrot.slane %v3750_v1, 2  ;;  %v3780_v15 = vld [vmem:[%s9706_s4] sm:$0x1]  ;;  %s4114_s4 = sshll.u32 %s4949_s3, 4  ;;  %s4115_s4 = int_to_ptr.vmem [resolvable:$true] %s4114_s4 }
 0x50a   :  { %v3651_v42 = vrot.slane %v3650_v19, 1  ;;  %v3752_v30 = vadd.f32 %v3751_v54, %v3750_v1 }
 0x50c   :  { %v3652_v58 = vadd.f32 %v3651_v42, %v3650_v19  ;;  %v3753_v51 = vrot.slane %v3752_v30, 1 }
 0x50e   :  { %v3653_v38 = vadd.f32 %v3652_v58, %v1804_v13  ;;  %v3754_v29 = vadd.f32 %v3753_v51, %v3752_v30 }
 0x510   :  { %v3755_v18 = vadd.f32 %v3754_v29, %v1906_v57  ;;  %v3763_v61 = vmul.f32 %v3762_v36, %v3653_v38 }
 0x512   :  { %v3764_v59 = vmul.f32 %v3762_v36, %v3755_v18  ;;  %v3765_v20 = vmul.f32 %v3763_v61, %v3763_v61 }
 0x514   :  { %v3766_v47 = vsub.f32 %v3764_v59, %v3765_v20  ;;  %v10366_v59 = vld [vmem:[#allocation88_spill] sm:$0xff]  ;;  %v10367_v20 = vld [vmem:[#allocation107_spill] sm:$0xff] }
 0x516   :  { %v3768_v11 = vadd.f32 1e-05, %v3766_v47 }
 0x518   :  { %4846 = vrsqrt.f32 %v3768_v11  ;;  %vm3775_vm14 = vweird.f32 %v3768_v11 }
 0x51e   :  { %v4847_v27 = vpop.eup %4846 }
 0x51f   :  { %v3770_v21 = vmul.f32 %v4847_v27, %v3768_v11  ;;  %vm3776_vm13 = vweird.f32 %v4847_v27 }
 0x520   :  { %vm3777_vm15 = vmor %vm3775_vm14, %vm3776_vm13 }
 0x521   :  { %v3771_v60 = vmul.f32 %v4847_v27, %v3770_v21 }
 0x523   :  { %v3772_v50 = vmul.f32 0.5, %v3771_v60 }
 0x525   :  { %v3773_v54 = vsub.f32 1.5, %v3772_v50 }
 0x527   :  { %v3774_v9 = vmul.f32 %v4847_v27, %v3773_v54 }
 0x529   :  { %v3778_v23 = vsel %vm3777_vm15, %v4847_v27, %v3774_v9 }
 0x52a   :  { %v3779_v41 = vmul.f32 %v3778_v23, %v3767_v52 }
 0x52c   :  { %v3781_v1 = vmul.f32 %v3779_v41, %v3763_v61  ;;  %v9269_v56 = vperm.slane %v3779_v41, 0  ;;  %v10365_v61 = vld [vmem:[#allocation87_spill] sm:$0xff] }
 0x52e   :  { %v3782_v19 = vsub.f32 %v3780_v15, %v3781_v1  ;;  %v3980_v42 = vmul.f32 %v9269_v56, %v3581_v45  ;;  %v3786_v51 = vmul.f32 %v9269_v56, %v8648_v25  ;;  %v3787_v36 = vmul.f32 %v9269_v56, %v8644_v44 }
 0x52f   :  { %v9282_v57 = vmul.f32 %v9269_v56, %v8652_v14  ;;  %v9286_v38 = vmul.f32 %v9269_v56, %v8658_v43  ;;  %v3816_v45 = vmul.f32 %v9269_v56, %v9193_v37  ;;  %v3817_v29 = vmul.f32 %v9269_v56, %v9202_v4 }
 0x530   :  { %v9271_v39 = vperm.slane %v3782_v19, 0  ;;  %v3949_v25 = vmul.f32 %v9269_v56, %v8849_v0  ;;  %v3950_v44 = vmul.f32 %v9269_v56, %v8843_v24  ;;  %v3951_v14 = vmul.f32 %v9269_v56, %v8857_v53 }
 0x531   :  { %v3952_v18 = vmul.f32 %v9269_v56, %v8878_v40  ;;  %v3953_v43 = vmul.f32 %v9269_v56, %v8898_v33  ;;  %v3954_v37 = vmul.f32 %v9269_v56, %v8916_v62  ;;  %v3955_v4 = vmul.f32 %v9269_v56, %v8931_v22 }
 0x532   :  { %v4012_v30 = vadd.f32 %v3980_v42, %v9271_v39  ;;  %v3956_v0 = vmul.f32 %v9269_v56, %v8944_v31  ;;  %v3957_v24 = vmul.f32 %v9269_v56, %v8957_v17  ;;  %v3958_v53 = vmul.f32 %v9269_v56, %v8969_v7 }
 0x533   :  { %v3959_v40 = vmul.f32 %v9269_v56, %v8982_v8  ;;  %v3960_v33 = vmul.f32 %v9269_v56, %v8995_v10  ;;  %v3961_v62 = vmul.f32 %v9269_v56, %v9009_v2  ;;  %v3962_v22 = vmul.f32 %v9269_v56, %v9023_v55 }
 0x534   :  { %v4044_v13 = vmul.f32 0.1, %v4012_v30  ;;  %v3963_v31 = vmul.f32 %v9269_v56, %v9034_v26  ;;  %v3964_v17 = vmul.f32 %v9269_v56, %v9081_v16  ;;  %v3965_v7 = vmul.f32 %v9269_v56, %v9063_v3 }
 0x535   :  { %v3966_v8 = vmul.f32 %v9269_v56, %v9077_v49  ;;  %v3967_v10 = vmul.f32 %v9269_v56, %v9089_v35  ;;  %v3968_v2 = vmul.f32 %v9269_v56, %v9104_v63  ;;  %v3969_v55 = vmul.f32 %v9269_v56, %v9119_v46 }
 0x536   :  { %v4076_v58 = vmax.f32 %v4012_v30, %v4044_v13  ;;  %v3970_v26 = vmul.f32 %v9269_v56, %v9132_v12  ;;  %v3971_v16 = vmul.f32 %v9269_v56, %v9142_v32  ;;  %v3972_v3 = vmul.f32 %v9269_v56, %v9153_v34 }
 0x537   :  { %v3973_v49 = vmul.f32 %v9269_v56, %v9164_v28  ;;  %v3974_v35 = vmul.f32 %v9269_v56, %v9177_v5  ;;  %v3975_v63 = vmul.f32 %v9269_v56, %v9187_v6  ;;  %v3976_v46 = vmul.f32 %v9269_v56, %v9211_v48 }
 0x538   :  { %4109 = vst.msk [vmem:[#allocation2 + $0x1f8] sm:$0xff] %vm1497_vm11, %v4076_v58  ;;  %v3977_v12 = vmul.f32 %v9269_v56, %v10365_v61  ;;  %v3978_v32 = vmul.f32 %v9269_v56, %v10366_v59  ;;  %v3979_v34 = vmul.f32 %v9269_v56, %v10367_v20  ;;  %v9355_v28 = vadd.f32 %v9271_v39, %v3786_v51 }
 0x539   :  { %v9358_v5 = vadd.f32 %v9271_v39, %v3787_v36  ;;  %v9361_v6 = vadd.f32 %v9271_v39, %v3816_v45  ;;  %v9364_v48 = vadd.f32 %v9271_v39, %v3817_v29  ;;  %v9367_v47 = vadd.f32 %v3949_v25, %v9271_v39 }
 0x53a   :  { %v9370_v11 = vadd.f32 %v3950_v44, %v9271_v39  ;;  %v9373_v27 = vadd.f32 %v3951_v14, %v9271_v39  ;;  %v9376_v21 = vadd.f32 %v3952_v18, %v9271_v39  ;;  %v9379_v60 = vadd.f32 %v3953_v43, %v9271_v39 }
 0x53b   :  { %v9382_v50 = vadd.f32 %v3954_v37, %v9271_v39  ;;  %v9385_v54 = vadd.f32 %v3955_v4, %v9271_v39  ;;  %v9388_v52 = vadd.f32 %v3956_v0, %v9271_v39  ;;  %v9391_v9 = vadd.f32 %v3957_v24, %v9271_v39 }
 0x53c   :  { %v9394_v23 = vadd.f32 %v3958_v53, %v9271_v39  ;;  %v9397_v41 = vadd.f32 %v3959_v40, %v9271_v39  ;;  %v9400_v15 = vadd.f32 %v3960_v33, %v9271_v39  ;;  %v9403_v1 = vadd.f32 %v3961_v62, %v9271_v39  ;;  %v10370_v53 = vld [vmem:[#allocation117_spill] sm:$0xff]  ;;  %v10371_v62 = vld [vmem:[#allocation136_spill] sm:$0xff] }
 0x53d   :  { %v9406_v19 = vadd.f32 %v3962_v22, %v9271_v39  ;;  %v9409_v42 = vadd.f32 %v3963_v31, %v9271_v39  ;;  %v9412_v30 = vadd.f32 %v3964_v17, %v9271_v39  ;;  %v9415_v13 = vadd.f32 %v3965_v7, %v9271_v39  ;;  %v10372_v17 = vld [vmem:[#allocation137_spill] sm:$0xff] }
 0x53e   :  { %v9418_v58 = vadd.f32 %v3966_v8, %v9271_v39  ;;  %v9421_v51 = vadd.f32 %v3967_v10, %v9271_v39  ;;  %v9424_v36 = vadd.f32 %v3968_v2, %v9271_v39  ;;  %v9427_v45 = vadd.f32 %v3969_v55, %v9271_v39  ;;  %v10373_v2 = vld [vmem:[#allocation21_spill] sm:$0xff] }
 0x53f   :  { %v9430_v29 = vadd.f32 %v3970_v26, %v9271_v39  ;;  %v9433_v25 = vadd.f32 %v3971_v16, %v9271_v39  ;;  %v9436_v44 = vadd.f32 %v3972_v3, %v9271_v39  ;;  %v9439_v14 = vadd.f32 %v3973_v49, %v9271_v39  ;;  %v10374_v16 = vld [vmem:[#allocation22_spill] sm:$0xff] }
 0x540   :  { %v9442_v18 = vadd.f32 %v3974_v35, %v9271_v39  ;;  %v9445_v43 = vadd.f32 %v3975_v63, %v9271_v39  ;;  %v9448_v37 = vadd.f32 %v3976_v46, %v9271_v39  ;;  %v9451_v4 = vadd.f32 %v3977_v12, %v9271_v39  ;;  %v10375_v35 = vld [vmem:[#allocation161_spill] sm:$0xff]  ;;  %v10376_v12 = vld [vmem:[#allocation167_spill] sm:$0xff] }
 0x541   :  { %v9454_v0 = vadd.f32 %v3978_v32, %v9271_v39  ;;  %v9457_v24 = vadd.f32 %v3979_v34, %v9271_v39  ;;  %v3790_v40 = vmul.f32 %v9269_v56, %v10370_v53  ;;  %v3823_v33 = vadd.f32 %v9271_v39, %v9282_v57  ;;  %v10377_v53 = vld [vmem:[#allocation51_spill] sm:$0xff] }
 0x542   :  { %v3791_v22 = vmul.f32 %v9269_v56, %v10371_v62  ;;  %v3824_v31 = vadd.f32 %v9271_v39, %v9286_v38  ;;  %v3792_v7 = vmul.f32 %v9269_v56, %v10372_v17  ;;  %v3853_v10 = vmul.f32 0.1, %v9355_v28 }
 0x543   :  { %10368 = vst [vmem:[#allocation108_spill] sm:$0xff] %v9454_v0  ;;  %v3825_v8 = vadd.f32 %v9271_v39, %v3790_v40  ;;  %v3793_v55 = vmul.f32 %v9269_v56, %v10373_v2  ;;  %v3854_v57 = vmul.f32 0.1, %v9358_v5  ;;  %v3794_v3 = vmul.f32 %v9269_v56, %v10374_v16 }
 0x544   :  { %10369 = vst [vmem:[#allocation174_spill] sm:$0xff] %v9457_v24  ;;  %v3826_v26 = vadd.f32 %v9271_v39, %v3791_v22  ;;  %v3827_v49 = vadd.f32 %v9271_v39, %v3792_v7  ;;  %v3855_v38 = vmul.f32 0.1, %v3823_v33  ;;  %v3795_v63 = vmul.f32 %v9269_v56, %v10375_v35  ;;  %v10378_v7 = vld [vmem:[#allocation67_spill] sm:$0xff] }
 0x545   :  { %v3828_v46 = vadd.f32 %v9271_v39, %v3793_v55  ;;  %v3856_v61 = vmul.f32 0.1, %v3824_v31  ;;  %v3796_v59 = vmul.f32 %v9269_v56, %v10376_v12  ;;  %v3829_v32 = vadd.f32 %v9271_v39, %v3794_v3  ;;  %v10379_v12 = vld [vmem:[#allocation75_spill] sm:$0xff] }
 0x546   :  { %v3857_v20 = vmul.f32 0.1, %v3825_v8  ;;  %v3885_v34 = vmax.f32 %v9355_v28, %v3853_v10  ;;  %v3797_v40 = vmul.f32 %v9269_v56, %v10377_v53  ;;  %v3830_v62 = vadd.f32 %v9271_v39, %v3795_v63  ;;  %v10380_v24 = vld [vmem:[#allocation95_spill] sm:$0xff] }
 0x547   :  { %v3858_v22 = vmul.f32 0.1, %v3826_v26  ;;  %v3886_v17 = vmax.f32 %v9358_v5, %v3854_v57  ;;  %v3798_v2 = vmul.f32 %v9269_v56, %v10378_v7  ;;  %v3831_v55 = vadd.f32 %v9271_v39, %v3796_v59  ;;  %v10381_v59 = vld [vmem:[#allocation115_spill] sm:$0xff] }
 0x548   :  { %v3859_v16 = vmul.f32 0.1, %v3827_v49  ;;  %v3887_v35 = vmax.f32 %v3823_v33, %v3855_v38  ;;  %v3799_v3 = vmul.f32 %v9269_v56, %v10379_v12  ;;  %v9495_v28 = vadd.f32 %v9271_v39, %v3797_v40  ;;  %3917 = vst.msk [vmem:[#allocation2] sm:$0xff] %vm1497_vm11, %v3885_v34 }
 0x549   :  { %v3860_v10 = vmul.f32 0.1, %v3828_v46  ;;  %v3888_v53 = vmax.f32 %v3824_v31, %v3856_v61  ;;  %v3800_v63 = vmul.f32 %v9269_v56, %v10380_v24  ;;  %v9500_v5 = vadd.f32 %v9271_v39, %v3798_v2  ;;  %3918 = vst.msk [vmem:[#allocation2 + $0x8] sm:$0xff] %vm1497_vm11, %v3886_v17  ;;  %v10382_v31 = vld [vmem:[#allocation43_spill] sm:$0xff]  ;;  %v10384_v17 = vld [vmem:[#allocation109_spill] sm:$0xff] }
 0x54a   :  { %v3861_v57 = vmul.f32 0.1, %v3829_v32  ;;  %v3889_v7 = vmax.f32 %v3825_v8, %v3857_v20  ;;  %v3801_v33 = vmul.f32 %v9269_v56, %v10381_v59  ;;  %v9506_v38 = vadd.f32 %v9271_v39, %v3799_v3  ;;  %3919 = vst.msk [vmem:[#allocation2 + $0x10] sm:$0xff] %vm1497_vm11, %v3887_v35  ;;  %v10383_v20 = vld [vmem:[#allocation89_spill] sm:$0xff]  ;;  %v10385_v35 = vld [vmem:[#allocation144_spill] sm:$0xff] }
 0x54b   :  { %v3862_v40 = vmul.f32 0.1, %v3830_v62  ;;  %v3890_v12 = vmax.f32 %v3826_v26, %v3858_v22  ;;  %v3802_v24 = vmul.f32 %v9269_v56, %v10382_v31  ;;  %v9512_v61 = vadd.f32 %v9271_v39, %v3800_v63  ;;  %3920 = vst.msk [vmem:[#allocation2 + $0x18] sm:$0xff] %vm1497_vm11, %v3888_v53  ;;  %v10386_v53 = vld [vmem:[#allocation129_spill] sm:$0xff] }
 0x54c   :  { %v3863_v2 = vmul.f32 0.1, %v3831_v55  ;;  %v3891_v8 = vmax.f32 %v3827_v49, %v3859_v16  ;;  %v3803_v34 = vmul.f32 %v9269_v56, %v10383_v20  ;;  %v9518_v3 = vadd.f32 %v9271_v39, %v3801_v33  ;;  %3921 = vst.msk [vmem:[#allocation2 + $0x20] sm:$0xff] %vm1497_vm11, %v3889_v7 }
 0x54d   :  { %v3864_v26 = vmul.f32 0.1, %v9495_v28  ;;  %v3892_v22 = vmax.f32 %v3828_v46, %v3860_v10  ;;  %v3804_v59 = vmul.f32 %v9269_v56, %v10384_v17  ;;  %v9525_v63 = vadd.f32 %v9271_v39, %v3802_v24  ;;  %3922 = vst.msk [vmem:[#allocation2 + $0x28] sm:$0xff] %vm1497_vm11, %v3890_v12 }
 0x54e   :  { %v3865_v49 = vmul.f32 0.1, %v9500_v5  ;;  %v3893_v16 = vmax.f32 %v3829_v32, %v3861_v57  ;;  %v3805_v33 = vmul.f32 %v9269_v56, %v10385_v35  ;;  %v3838_v31 = vadd.f32 %v9271_v39, %v3803_v34  ;;  %3923 = vst.msk [vmem:[#allocation2 + $0x30] sm:$0xff] %vm1497_vm11, %v3891_v8  ;;  %v10387_v57 = vld [vmem:[#allocation135_spill] sm:$0xff] }
 0x54f   :  { %v3866_v46 = vmul.f32 0.1, %v9506_v38  ;;  %v3894_v10 = vmax.f32 %v3830_v62, %v3862_v40  ;;  %v3806_v20 = vmul.f32 %v9269_v56, %v10386_v53  ;;  %v3839_v24 = vadd.f32 %v9271_v39, %v3804_v59  ;;  %3924 = vst.msk [vmem:[#allocation2 + $0x38] sm:$0xff] %vm1497_vm11, %v3892_v22  ;;  %v10388_v40 = vld [vmem:[#allocation13_spill] sm:$0xff]  ;;  %v10389_v8 = vld [vmem:[#allocation19_spill] sm:$0xff] }
 0x550   :  { %v3867_v17 = vmul.f32 0.1, %v9512_v61  ;;  %v3895_v32 = vmax.f32 %v3831_v55, %v3863_v2  ;;  %v3807_v7 = vmul.f32 %v9269_v56, %v10387_v57  ;;  %v3840_v34 = vadd.f32 %v9271_v39, %v3805_v33  ;;  %3925 = vst.msk [vmem:[#allocation2 + $0x40] sm:$0xff] %vm1497_vm11, %v3893_v16 }
 0x551   :  { %v3868_v35 = vmul.f32 0.1, %v9518_v3  ;;  %v3896_v62 = vmax.f32 %v9495_v28, %v3864_v26  ;;  %v3808_v12 = vmul.f32 %v9269_v56, %v10388_v40  ;;  %v3841_v59 = vadd.f32 %v9271_v39, %v3806_v20  ;;  %3926 = vst.msk [vmem:[#allocation2 + $0x48] sm:$0xff] %vm1497_vm11, %v3894_v10  ;;  %v10390_v26 = vld [vmem:[#allocation142_spill] sm:$0xff] }
 0x552   :  { %v3869_v55 = vmul.f32 0.1, %v9525_v63  ;;  %v3897_v2 = vmax.f32 %v9500_v5, %v3865_v49  ;;  %v3809_v33 = vmul.f32 %v9269_v56, %v10389_v8  ;;  %v3842_v53 = vadd.f32 %v9271_v39, %v3807_v7  ;;  %3927 = vst.msk [vmem:[#allocation2 + $0x50] sm:$0xff] %vm1497_vm11, %v3895_v32  ;;  %v10391_v49 = vld [vmem:[#allocation160_spill] sm:$0xff] }
 0x553   :  { %v3870_v57 = vmul.f32 0.1, %v3838_v31  ;;  %v3898_v28 = vmax.f32 %v9506_v38, %v3866_v46  ;;  %v3810_v22 = vmul.f32 %v9269_v56, %v10390_v26  ;;  %v3843_v20 = vadd.f32 %v9271_v39, %v3808_v12  ;;  %3928 = vst.msk [vmem:[#allocation2 + $0x58] sm:$0xff] %vm1497_vm11, %v3896_v62  ;;  %v10392_v46 = vld [vmem:[#allocation41_spill] sm:$0xff] }
 0x554   :  { %v3871_v40 = vmul.f32 0.1, %v3839_v24  ;;  %v3899_v5 = vmax.f32 %v9512_v61, %v3867_v17  ;;  %v3811_v16 = vmul.f32 %v9269_v56, %v10391_v49  ;;  %v3844_v7 = vadd.f32 %v9271_v39, %v3809_v33  ;;  %3929 = vst.msk [vmem:[#allocation2 + $0x60] sm:$0xff] %vm1497_vm11, %v3897_v2  ;;  %v10393_v17 = vld [vmem:[#allocation42_spill] sm:$0xff] }
 0x555   :  { %v3872_v8 = vmul.f32 0.1, %v3840_v34  ;;  %v3900_v38 = vmax.f32 %v9518_v3, %v3868_v35  ;;  %v3812_v10 = vmul.f32 %v9269_v56, %v10392_v46  ;;  %v3845_v12 = vadd.f32 %v9271_v39, %v3810_v22  ;;  %3930 = vst.msk [vmem:[#allocation2 + $0x68] sm:$0xff] %vm1497_vm11, %v3898_v28  ;;  %v10394_v3 = vld [vmem:[#allocation65_spill] sm:$0xff] }
 0x556   :  { %v3873_v26 = vmul.f32 0.1, %v3841_v59  ;;  %v3901_v61 = vmax.f32 %v9525_v63, %v3869_v55  ;;  %v3813_v32 = vmul.f32 %v9269_v56, %v10393_v17  ;;  %v3846_v33 = vadd.f32 %v9271_v39, %v3811_v16  ;;  %3931 = vst.msk [vmem:[#allocation2 + $0x70] sm:$0xff] %vm1497_vm11, %v3899_v5  ;;  %v10395_v63 = vld [vmem:[#allocation66_spill] sm:$0xff] }
 0x557   :  { %v3874_v49 = vmul.f32 0.1, %v3842_v53  ;;  %v3902_v0 = vmax.f32 %v3838_v31, %v3870_v57  ;;  %v3814_v35 = vmul.f32 %v9269_v56, %v10394_v3  ;;  %v3847_v62 = vadd.f32 %v9271_v39, %v3812_v10  ;;  %3932 = vst.msk [vmem:[#allocation2 + $0x78] sm:$0xff] %vm1497_vm11, %v3900_v38 }
 0x558   :  { %v3875_v22 = vmul.f32 0.1, %v3843_v20  ;;  %v3903_v46 = vmax.f32 %v3839_v24, %v3871_v40  ;;  %v3815_v55 = vmul.f32 %v9269_v56, %v10395_v63  ;;  %v3848_v2 = vadd.f32 %v9271_v39, %v3813_v32  ;;  %3933 = vst.msk [vmem:[#allocation2 + $0x80] sm:$0xff] %vm1497_vm11, %v3901_v61 }
 0x559   :  { %v3876_v17 = vmul.f32 0.1, %v3844_v7  ;;  %v3904_v16 = vmax.f32 %v3840_v34, %v3872_v8  ;;  %v3849_v31 = vadd.f32 %v9271_v39, %v3814_v35  ;;  %v3877_v57 = vmul.f32 0.1, %v3845_v12  ;;  %3934 = vst.msk [vmem:[#allocation2 + $0x88] sm:$0xff] %vm1497_vm11, %v3902_v0 }
 0x55a   :  { %v3905_v28 = vmax.f32 %v3841_v59, %v3873_v26  ;;  %v3850_v10 = vadd.f32 %v9271_v39, %v3815_v55  ;;  %v3878_v24 = vmul.f32 0.1, %v3846_v33  ;;  %v3906_v40 = vmax.f32 %v3842_v53, %v3874_v49  ;;  %3935 = vst.msk [vmem:[#allocation2 + $0x90] sm:$0xff] %vm1497_vm11, %v3903_v46 }
 0x55b   :  { %v3879_v5 = vmul.f32 0.1, %v3847_v62  ;;  %v3907_v56 = vmax.f32 %v3843_v20, %v3875_v22  ;;  %v3880_v32 = vmul.f32 0.1, %v3848_v2  ;;  %v3908_v34 = vmax.f32 %v3844_v7, %v3876_v17  ;;  %3936 = vst.msk [vmem:[#allocation2 + $0x98] sm:$0xff] %vm1497_vm11, %v3904_v16 }
 0x55c   :  { %v3881_v8 = vmul.f32 0.1, %v3849_v31  ;;  %v3909_v38 = vmax.f32 %v3845_v12, %v3877_v57  ;;  %3937 = vst.msk [vmem:[#allocation2 + $0xa0] sm:$0xff] %vm1497_vm11, %v3905_v28  ;;  %v3882_v59 = vmul.f32 0.1, %v3850_v10  ;;  %v3910_v26 = vmax.f32 %v3846_v33, %v3878_v24 }
 0x55d   :  { %3938 = vst.msk [vmem:[#allocation2 + $0xa8] sm:$0xff] %vm1497_vm11, %v3906_v40  ;;  %v3883_v39 = vmul.f32 0.1, %v9361_v6  ;;  %v3911_v53 = vmax.f32 %v3847_v62, %v3879_v5  ;;  %v3884_v0 = vmul.f32 0.1, %v9364_v48  ;;  %v3912_v20 = vmax.f32 %v3848_v2, %v3880_v32 }
 0x55e   :  { %3939 = vst.msk [vmem:[#allocation2 + $0xb0] sm:$0xff] %vm1497_vm11, %v3907_v56  ;;  %v3913_v7 = vmax.f32 %v3849_v31, %v3881_v8  ;;  %v4013_v12 = vmul.f32 0.1, %v9367_v47  ;;  %v3914_v61 = vmax.f32 %v3850_v10, %v3882_v59  ;;  %v4014_v33 = vmul.f32 0.1, %v9370_v11 }
 0x55f   :  { %3940 = vst.msk [vmem:[#allocation2 + $0xb8] sm:$0xff] %vm1497_vm11, %v3908_v34  ;;  %v3915_v49 = vmax.f32 %v9361_v6, %v3883_v39  ;;  %v4015_v3 = vmul.f32 0.1, %v9373_v27  ;;  %v3916_v35 = vmax.f32 %v9364_v48, %v3884_v0  ;;  %v4016_v62 = vmul.f32 0.1, %v9376_v21 }
 0x560   :  { %3941 = vst.msk [vmem:[#allocation2 + $0xc0] sm:$0xff] %vm1497_vm11, %v3909_v38  ;;  %v4017_v22 = vmul.f32 0.1, %v9379_v60  ;;  %v4045_v46 = vmax.f32 %v9367_v47, %v4013_v12  ;;  %v4018_v6 = vmul.f32 0.1, %v9382_v50  ;;  %v4046_v63 = vmax.f32 %v9370_v11, %v4014_v33 }
 0x561   :  { %3942 = vst.msk [vmem:[#allocation2 + $0xc8] sm:$0xff] %vm1497_vm11, %v3910_v26  ;;  %v4019_v48 = vmul.f32 0.1, %v9385_v54  ;;  %v4047_v55 = vmax.f32 %v9373_v27, %v4015_v3  ;;  %v4020_v2 = vmul.f32 0.1, %v9388_v52  ;;  %v4048_v17 = vmax.f32 %v9376_v21, %v4016_v62 }
 0x562   :  { %3943 = vst.msk [vmem:[#allocation2 + $0xd0] sm:$0xff] %vm1497_vm11, %v3911_v53  ;;  %v4021_v47 = vmul.f32 0.1, %v9391_v9  ;;  %v4049_v16 = vmax.f32 %v9379_v60, %v4017_v22  ;;  %v4022_v11 = vmul.f32 0.1, %v9394_v23  ;;  %v4050_v31 = vmax.f32 %v9382_v50, %v4018_v6 }
 0x563   :  { %3944 = vst.msk [vmem:[#allocation2 + $0xd8] sm:$0xff] %vm1497_vm11, %v3912_v20  ;;  %v4023_v27 = vmul.f32 0.1, %v9397_v41  ;;  %v4051_v57 = vmax.f32 %v9385_v54, %v4019_v48  ;;  %v4024_v21 = vmul.f32 0.1, %v9400_v15  ;;  %v4052_v28 = vmax.f32 %v9388_v52, %v4020_v2 }
 0x564   :  { %3945 = vst.msk [vmem:[#allocation2 + $0xe0] sm:$0xff] %vm1497_vm11, %v3913_v7  ;;  %v4025_v60 = vmul.f32 0.1, %v9403_v1  ;;  %v4053_v10 = vmax.f32 %v9391_v9, %v4021_v47  ;;  %v4026_v50 = vmul.f32 0.1, %v9406_v19  ;;  %v4054_v24 = vmax.f32 %v9394_v23, %v4022_v11 }
 0x565   :  { %3946 = vst.msk [vmem:[#allocation2 + $0xe8] sm:$0xff] %vm1497_vm11, %v3914_v61  ;;  %v4027_v54 = vmul.f32 0.1, %v9409_v42  ;;  %v4055_v40 = vmax.f32 %v9397_v41, %v4023_v27  ;;  %v4028_v52 = vmul.f32 0.1, %v9412_v30  ;;  %v4056_v5 = vmax.f32 %v9400_v15, %v4024_v21 }
 0x566   :  { %3947 = vst.msk [vmem:[#allocation2 + $0xf0] sm:$0xff] %vm1497_vm11, %v3915_v49  ;;  %v4029_v9 = vmul.f32 0.1, %v9415_v13  ;;  %v4057_v56 = vmax.f32 %v9403_v1, %v4025_v60  ;;  %v4030_v23 = vmul.f32 0.1, %v9418_v58  ;;  %v4058_v32 = vmax.f32 %v9406_v19, %v4026_v50 }
 0x567   :  { %3948 = vst.msk [vmem:[#allocation2 + $0xf8] sm:$0xff] %vm1497_vm11, %v3916_v35  ;;  %v4031_v41 = vmul.f32 0.1, %v9421_v51  ;;  %v4059_v34 = vmax.f32 %v9409_v42, %v4027_v54  ;;  %v4032_v15 = vmul.f32 0.1, %v9424_v36  ;;  %v4060_v8 = vmax.f32 %v9412_v30, %v4028_v52 }
 0x568   :  { %4078 = vst.msk [vmem:[#allocation2 + $0x100] sm:$0xff] %vm1497_vm11, %v4045_v46  ;;  %v4033_v1 = vmul.f32 0.1, %v9427_v45  ;;  %v4061_v38 = vmax.f32 %v9415_v13, %v4029_v9  ;;  %v4034_v19 = vmul.f32 0.1, %v9430_v29  ;;  %v4062_v59 = vmax.f32 %v9418_v58, %v4030_v23 }
 0x569   :  { %4079 = vst.msk [vmem:[#allocation2 + $0x108] sm:$0xff] %vm1497_vm11, %v4046_v63  ;;  %v4035_v42 = vmul.f32 0.1, %v9433_v25  ;;  %v4063_v26 = vmax.f32 %v9421_v51, %v4031_v41  ;;  %v4036_v30 = vmul.f32 0.1, %v9436_v44  ;;  %v4064_v39 = vmax.f32 %v9424_v36, %v4032_v15 }
 0x56a   :  { %4080 = vst.msk [vmem:[#allocation2 + $0x110] sm:$0xff] %vm1497_vm11, %v4047_v55  ;;  %v4037_v13 = vmul.f32 0.1, %v9439_v14  ;;  %v4065_v53 = vmax.f32 %v9427_v45, %v4033_v1  ;;  %v4038_v58 = vmul.f32 0.1, %v9442_v18  ;;  %v4066_v0 = vmax.f32 %v9430_v29, %v4034_v19  ;;  %v10396_v29 = vld [vmem:[#allocation108_spill] sm:$0xff] }
 0x56b   :  { %4081 = vst.msk [vmem:[#allocation2 + $0x118] sm:$0xff] %vm1497_vm11, %v4048_v17  ;;  %v4039_v51 = vmul.f32 0.1, %v9445_v43  ;;  %v4067_v20 = vmax.f32 %v9433_v25, %v4035_v42  ;;  %v4040_v36 = vmul.f32 0.1, %v9448_v37  ;;  %v4068_v7 = vmax.f32 %v9436_v44, %v4036_v30  ;;  %v10397_v25 = vld [vmem:[#allocation174_spill] sm:$0xff] }
 0x56c   :  { %4082 = vst.msk [vmem:[#allocation2 + $0x120] sm:$0xff] %vm1497_vm11, %v4049_v16  ;;  %v4041_v45 = vmul.f32 0.1, %v9451_v4  ;;  %v4069_v12 = vmax.f32 %v9439_v14, %v4037_v13  ;;  %v4042_v61 = vmul.f32 0.1, %v10396_v29  ;;  %v4070_v33 = vmax.f32 %v9442_v18, %v4038_v58 }
 0x56d   :  { %4083 = vst.msk [vmem:[#allocation2 + $0x128] sm:$0xff] %vm1497_vm11, %v4050_v31  ;;  %v4043_v49 = vmul.f32 0.1, %v10397_v25  ;;  %v4071_v3 = vmax.f32 %v9445_v43, %v4039_v51  ;;  %v4072_v44 = vmax.f32 %v9448_v37, %v4040_v36 }
 0x56e   :  { %4084 = vst.msk [vmem:[#allocation2 + $0x130] sm:$0xff] %vm1497_vm11, %v4051_v57  ;;  %v4073_v14 = vmax.f32 %v9451_v4, %v4041_v45  ;;  %v4074_v18 = vmax.f32 %v10396_v29, %v4042_v61 }
 0x56f   :  { %4085 = vst.msk [vmem:[#allocation2 + $0x138] sm:$0xff] %vm1497_vm11, %v4052_v28  ;;  %v4075_v43 = vmax.f32 %v10397_v25, %v4043_v49 }
 0x570   :  { %4086 = vst.msk [vmem:[#allocation2 + $0x140] sm:$0xff] %vm1497_vm11, %v4053_v10 }
 0x571   :  { %4087 = vst.msk [vmem:[#allocation2 + $0x148] sm:$0xff] %vm1497_vm11, %v4054_v24 }
 0x572   :  { %4088 = vst.msk [vmem:[#allocation2 + $0x150] sm:$0xff] %vm1497_vm11, %v4055_v40 }
 0x573   :  { %4089 = vst.msk [vmem:[#allocation2 + $0x158] sm:$0xff] %vm1497_vm11, %v4056_v5 }
 0x574   :  { %4090 = vst.msk [vmem:[#allocation2 + $0x160] sm:$0xff] %vm1497_vm11, %v4057_v56 }
 0x575   :  { %4091 = vst.msk [vmem:[#allocation2 + $0x168] sm:$0xff] %vm1497_vm11, %v4058_v32 }
 0x576   :  { %4092 = vst.msk [vmem:[#allocation2 + $0x170] sm:$0xff] %vm1497_vm11, %v4059_v34 }
 0x577   :  { %4093 = vst.msk [vmem:[#allocation2 + $0x178] sm:$0xff] %vm1497_vm11, %v4060_v8 }
 0x578   :  { %4094 = vst.msk [vmem:[#allocation2 + $0x180] sm:$0xff] %vm1497_vm11, %v4061_v38 }
 0x579   :  { %4095 = vst.msk [vmem:[#allocation2 + $0x188] sm:$0xff] %vm1497_vm11, %v4062_v59 }
 0x57a   :  { %4096 = vst.msk [vmem:[#allocation2 + $0x190] sm:$0xff] %vm1497_vm11, %v4063_v26 }
 0x57b   :  { %4097 = vst.msk [vmem:[#allocation2 + $0x198] sm:$0xff] %vm1497_vm11, %v4064_v39 }
 0x57c   :  { %4098 = vst.msk [vmem:[#allocation2 + $0x1a0] sm:$0xff] %vm1497_vm11, %v4065_v53 }
 0x57d   :  { %4099 = vst.msk [vmem:[#allocation2 + $0x1a8] sm:$0xff] %vm1497_vm11, %v4066_v0 }
 0x57e   :  { %4100 = vst.msk [vmem:[#allocation2 + $0x1b0] sm:$0xff] %vm1497_vm11, %v4067_v20 }
 0x57f   :  { %4101 = vst.msk [vmem:[#allocation2 + $0x1b8] sm:$0xff] %vm1497_vm11, %v4068_v7 }
 0x580   :  { %4102 = vst.msk [vmem:[#allocation2 + $0x1c0] sm:$0xff] %vm1497_vm11, %v4069_v12 }
 0x581   :  { %4103 = vst.msk [vmem:[#allocation2 + $0x1c8] sm:$0xff] %vm1497_vm11, %v4070_v33 }
 0x582   :  { %4104 = vst.msk [vmem:[#allocation2 + $0x1d0] sm:$0xff] %vm1497_vm11, %v4071_v3 }
 0x583   :  { %4105 = vst.msk [vmem:[#allocation2 + $0x1d8] sm:$0xff] %vm1497_vm11, %v4072_v44 }
 0x584   :  { %4106 = vst.msk [vmem:[#allocation2 + $0x1e0] sm:$0xff] %vm1497_vm11, %v4073_v14 }
 0x585   :  { %4107 = vst.msk [vmem:[#allocation2 + $0x1e8] sm:$0xff] %vm1497_vm11, %v4074_v18 }
 0x586   :  { %4108 = vst.msk [vmem:[#allocation2 + $0x1f0] sm:$0xff] %vm1497_vm11, %v4075_v43 }
 0x587   :  { %4122 = dma.vmem_to_hbm [thread:$0]  %s4115_s4, 8192, %s4117_s6, [#allocation3], %s4950_s7, %s4950_s7, %s4941_s20  }
 0x588   :  { %4938 = dma.done.wait [#allocation3], 8192  }
 0x589   :  { %4939 = vsyncadd [#allocation3], 4294959104 }
 0x58a   :  { %4127 = vsyncpa [#allocation3], 1 }

</bundles_post_ra>
